<compile_context>
chip_gen: v6e
topology: v6e:2x2x1
jax: 0.10.0
libtpu: 0.0.40
codegen_flags: <defaults>
</compile_context>

<pallas_src>
import functools

import jax
import jax.numpy as jnp
from jax.experimental import pallas as pl
from jax.experimental.pallas import tpu as pltpu


def _round_up(x, m):
    return ((x + m - 1) // m) * m


# ---------------------------------------------------------------------------
# Fused forward kernel: conv5x5 + ReLU  ->  FC1 + ReLU  ->  output Linear
# ---------------------------------------------------------------------------
def _fused_classifier_kernel(x_ref, wc_ref, bc_ref, w1p_ref, b1_ref, w2_ref,
                             b2_ref, o_ref, acc_ref, *, n_batch, c_out, ksize,
                             wp, plane):
    n_lanes = n_batch * plane

    # ---- Conv layer: K*K shifted bf16 matmuls accumulated into a lane-dense
    #      (Cout, N*plane) f32 accumulator (kept in vregs, stored once to VMEM).
    acc = jnp.zeros((c_out, n_lanes), jnp.float32)
    for t in range(ksize * ksize):
        i, j = divmod(t, ksize)
        off = i * wp + j
        patch = x_ref[:, off:off + n_lanes]            # (Cin_pad, N*plane) bf16
        acc = acc + jnp.dot(wc_ref[t], patch,
                            preferred_element_type=jnp.float32)
    acc_ref[...] = jnp.maximum(acc + bc_ref[...], 0.0)  # bias + ReLU in f32

    # ---- FC stack.  The NCHW flatten is folded into w1p (scattered weights),
    #      so FC1 is a plain contraction over (channel, padded-plane position).
    b1 = b1_ref[...]                                   # (1, F1)        f32
    w2 = w2_ref[...]                                   # (F1, classes)  bf16
    b2 = b2_ref[...]                                   # (1, classes)   f32
    f1 = b1.shape[1]
    for n in range(n_batch):
        y = jnp.zeros((1, f1), jnp.float32)
        for c in range(c_out):
            a_nc = acc_ref[c:c + 1, n * plane:(n + 1) * plane]   # (1, plane)
            y = y + jnp.dot(a_nc.astype(jnp.bfloat16), w1p_ref[c],
                            preferred_element_type=jnp.float32)
        y = jnp.maximum(y + b1, 0.0)       # ReLU; dropout = identity in eval()
        out_n = jnp.dot(y.astype(jnp.bfloat16), w2,
                        preferred_element_type=jnp.float32) + b2
        o_ref[n:n + 1, :] = out_n.astype(o_ref.dtype)


def _full_spec(arr):
    nd = arr.ndim
    return pl.BlockSpec(arr.shape, lambda i, _nd=nd: (0,) * _nd)


# ---------------------------------------------------------------------------
# Parameter construction mirroring Classifier.__init__ (PyTorch layout, f32)
# ---------------------------------------------------------------------------
def init_params(key, size, conv, fc, n_classes):
    size = list(size)
    kernel_size = [5] * (len(conv) - 1)
    stride = [1] * (len(conv) - 1)
    padding = [1] * (len(conv) - 1)

    params = {"conv": [], "fc": [], "out": None}
    for i in range(len(conv) - 1):
        key, kw_, kb_ = jax.random.split(key, 3)
        w = jax.random.uniform(kw_, (conv[i + 1], conv[i], kernel_size[i], kernel_size[i]),
                               jnp.float32, -0.1, 0.1)
        b = jax.random.uniform(kb_, (conv[i + 1],), jnp.float32, -0.1, 0.1)
        params["conv"].append((w, b))
        size[0] = conv[i + 1]
        size[1] = (size[1] + 2 * padding[i] - kernel_size[i]) // stride[i] + 1
        size[2] = (size[2] + 2 * padding[i] - kernel_size[i]) // stride[i] + 1

    flat_size = size[0] * size[1] * size[2]
    fc_full = [flat_size] + list(fc)
    for i in range(len(fc_full) - 1):
        key, kw_, kb_ = jax.random.split(key, 3)
        w = jax.random.uniform(kw_, (fc_full[i], fc_full[i + 1]), jnp.float32, -0.05, 0.05)
        b = jax.random.uniform(kb_, (fc_full[i + 1],), jnp.float32, -0.05, 0.05)
        params["fc"].append((w, b))

    key, kw_, kb_ = jax.random.split(key, 3)
    wo = jax.random.uniform(kw_, (fc_full[-1], n_classes), jnp.float32, -0.05, 0.05)
    bo = jax.random.uniform(kb_, (n_classes,), jnp.float32, -0.05, 0.05)
    params["out"] = (wo, bo)
    return params, flat_size


# ---------------------------------------------------------------------------
# One-time transform of PyTorch-layout params into the fused-kernel layout
# ---------------------------------------------------------------------------
def prepare_params(params, size, pad=1):
    assert len(params["conv"]) == 1 and len(params["fc"]) == 1, (
        "fused kernel is specialised to Classifier(conv=[Cin,Cout], fc=[F1])")

    wc, bc = params["conv"][0]                 # (Cout, Cin, K, K), (Cout,)
    c_out, c_in, k, _ = wc.shape
    h, w = size[1], size[2]
    hp, wp = h + 2 * pad, w + 2 * pad
    oh, ow = hp - k + 1, wp - k + 1
    plane = hp * wp
    c_in_pad = _round_up(c_in, 8)

    # Conv weights as per-tap (Cout, Cin_pad) matrices, bf16.
    wc_taps = jnp.transpose(wc, (2, 3, 0, 1)).reshape(k * k, c_out, c_in)
    wc_taps = jnp.pad(wc_taps, ((0, 0), (0, 0), (0, c_in_pad - c_in)))
    wc_taps = wc_taps.astype(jnp.bfloat16)
    bc_col = bc.reshape(c_out, 1).astype(jnp.float32)

    # FC1 weight: rows are NCHW-flat (c*oh*ow + y*ow + x); scatter them into
    # the padded-plane coordinate system (c, y*wp + x), zero rows elsewhere.
    w1, b1 = params["fc"][0]
    f1 = w1.shape[1]
    w1_chw = w1.reshape(c_out, oh, ow, f1)
    w1p = jnp.zeros((c_out, hp, wp, f1), w1.dtype).at[:, :oh, :ow, :].set(w1_chw)
    w1p = w1p.reshape(c_out, plane, f1).astype(jnp.bfloat16)
    b1_row = b1.reshape(1, f1).astype(jnp.float32)

    w2, b2 = params["out"]
    n_classes = w2.shape[1]

    kparams = {
        "wc": wc_taps, "bc": bc_col, "w1p": w1p, "b1": b1_row,
        "w2": w2.astype(jnp.bfloat16),
        "b2": b2.reshape(1, n_classes).astype(jnp.float32),
    }
    meta = {"c_out": c_out, "c_in": c_in, "c_in_pad": c_in_pad, "k": k,
            "pad": pad, "n_classes": n_classes, "plane": plane,
            "hp": hp, "wp": wp, "oh": oh, "ow": ow}
    return kparams, meta


# ---------------------------------------------------------------------------
# Forward pass: one fused pallas_call
# ---------------------------------------------------------------------------
def classifier_forward(kparams, x, *, meta):
    n, c_in, h, w = x.shape
    pad, k = meta["pad"], meta["k"]
    c_in_pad, c_out = meta["c_in_pad"], meta["c_out"]
    hp, wp = h + 2 * pad, w + 2 * pad
    plane = hp * wp
    n_lanes = n * plane
    max_off = (k - 1) * wp + (k - 1)
    lanes_pad = _round_up(n_lanes + max_off, 128)

    # Tiny XLA-side prep: zero-pad spatially, channel-major flatten, pad lanes.
    xp = jnp.pad(x, ((0, 0), (0, 0), (pad, pad), (pad, pad)))
    xf = jnp.transpose(xp, (1, 0, 2, 3)).reshape(c_in, n_lanes)
    xf = jnp.pad(xf, ((0, c_in_pad - c_in), (0, lanes_pad - n_lanes)))
    xf = xf.astype(jnp.bfloat16)

    kernel = functools.partial(
        _fused_classifier_kernel, n_batch=n, c_out=c_out, ksize=k, wp=wp,
        plane=plane)

    args = (xf, kparams["wc"], kparams["bc"], kparams["w1p"], kparams["b1"],
            kparams["w2"], kparams["b2"])
    return pl.pallas_call(
        kernel,
        out_shape=jax.ShapeDtypeStruct((n, meta["n_classes"]), jnp.float32),
        grid=(1,),
        in_specs=[_full_spec(a) for a in args],
        out_specs=pl.BlockSpec((n, meta["n_classes"]), lambda i: (0, 0)),
        scratch_shapes=[pltpu.VMEM((c_out, n_lanes), jnp.float32)],
        compiler_params=pltpu.CompilerParams(
            dimension_semantics=("arbitrary",)),
    )(*args)


# Pure-JAX f32 reference for the correctness check.
def reference_forward(params, x, flat_size):
    for (w, b) in params["conv"]:
        x = jax.lax.conv_general_dilated(
            x, w, window_strides=(1, 1), padding=[(1, 1), (1, 1)],
            dimension_numbers=("NCHW", "OIHW", "NCHW"))
        x = jnp.maximum(x + b[None, :, None, None], 0.0)
    x = x.reshape(-1, flat_size)
    for (w, b) in params["fc"]:
        x = jnp.maximum(x @ w + b, 0.0)
    w, b = params["out"]
    return x @ w + b


if __name__ == "__main__":
    # Classifier(size=[4,16,16], conv=[4,8], fc=[32], n_classes=10)
    size = [4, 16, 16]
    conv = [4, 8]
    fc = [32]
    n_classes = 10

    key = jax.random.PRNGKey(0)
    params, flat_size = init_params(key, size, conv, fc, n_classes)
    kparams, meta = prepare_params(params, size)

    x = jax.random.normal(jax.random.fold_in(key, 99),
                          (2, size[0], size[1], size[2]), jnp.float32)

    fwd = jax.jit(functools.partial(classifier_forward, meta=meta))
    out = jax.block_until_ready(fwd(kparams, x))

    ref = reference_forward(params, x, flat_size)
    assert out.shape == (2, n_classes), out.shape
    assert jnp.all(jnp.isfinite(out))
    max_err = float(jnp.max(jnp.abs(out - ref)))
    # bf16 matmul operands with f32 accumulation: comfortably within 2e-2.
    assert jnp.allclose(out, ref, atol=2e-2, rtol=2e-2), max_err

    print("KERNEL_OK")
</pallas_src>

<mosaic_0001>
module attributes {stable_mosaic.version = 11 : i64} {
  func.func @_fused_classifier_kernel(%arg0: i32, %arg1: memref<8x768xbf16, #tpu.memory_space<vmem>>, %arg2: memref<25x8x8xbf16, #tpu.memory_space<vmem>>, %arg3: memref<8x1xf32, #tpu.memory_space<vmem>>, %arg4: memref<8x324x32xbf16, #tpu.memory_space<vmem>>, %arg5: memref<1x32xf32, #tpu.memory_space<vmem>>, %arg6: memref<32x10xbf16, #tpu.memory_space<vmem>>, %arg7: memref<1x10xf32, #tpu.memory_space<vmem>>, %arg8: memref<2x10xf32, #tpu.memory_space<vmem>>, %arg9: memref<8x648xf32, #tpu.memory_space<vmem>>) attributes {dimension_semantics = [#tpu.dimension_semantics<arbitrary>], iteration_bounds = array<i64: 1>, scalar_prefetch = 0 : i64, scratch_operands = 1 : i64, tpu.core_type = #tpu.core_type<tc>, window_params = [{pipeline_mode = #tpu.pipeline_mode<synchronous>, transform_indices = @transform_0, window_bounds = array<i64: 8, 768>}, {pipeline_mode = #tpu.pipeline_mode<synchronous>, transform_indices = @transform_1, window_bounds = array<i64: 25, 8, 8>}, {pipeline_mode = #tpu.pipeline_mode<synchronous>, transform_indices = @transform_2, window_bounds = array<i64: 8, 1>}, {pipeline_mode = #tpu.pipeline_mode<synchronous>, transform_indices = @transform_3, window_bounds = array<i64: 8, 324, 32>}, {pipeline_mode = #tpu.pipeline_mode<synchronous>, transform_indices = @transform_4, window_bounds = array<i64: 1, 32>}, {pipeline_mode = #tpu.pipeline_mode<synchronous>, transform_indices = @transform_5, window_bounds = array<i64: 32, 10>}, {pipeline_mode = #tpu.pipeline_mode<synchronous>, transform_indices = @transform_6, window_bounds = array<i64: 1, 10>}, {pipeline_mode = #tpu.pipeline_mode<synchronous>, transform_indices = @transform_7, window_bounds = array<i64: 2, 10>}]} {
    %cst = arith.constant 0.000000e+00 : f32
    %0 = vector.broadcast %cst : f32 to vector<8x648xf32>
    %c0 = arith.constant 0 : index
    %c0_0 = arith.constant 0 : index
    %1 = vector.load %arg1[%c0, %c0_0] : memref<8x768xbf16, #tpu.memory_space<vmem>>, vector<8x648xbf16>
    %c0_1 = arith.constant 0 : index
    %c0_2 = arith.constant 0 : index
    %c0_3 = arith.constant 0 : index
    %2 = vector.load %arg2[%c0_1, %c0_2, %c0_3] : memref<25x8x8xbf16, #tpu.memory_space<vmem>>, vector<1x8x8xbf16>
    %3 = vector.shape_cast %2 : vector<1x8x8xbf16> to vector<8x8xbf16>
    %cst_4 = arith.constant dense<0.000000e+00> : vector<8x648xf32>
    %4 = tpu.matmul %3, %1, %cst_4 {dimension_numbers = #tpu.dot_dimension_numbers<[1], [0], [0], [1], [0, 0, 1, 1], [], []>} : vector<8x8xbf16>, vector<8x648xbf16>, vector<8x648xf32> -> vector<8x648xf32>
    %5 = arith.addf %0, %4 : vector<8x648xf32>
    %c0_5 = arith.constant 0 : index
    %c1 = arith.constant 1 : index
    %6 = vector.load %arg1[%c0_5, %c1] : memref<8x768xbf16, #tpu.memory_space<vmem>>, vector<8x648xbf16>
    %c1_6 = arith.constant 1 : index
    %c0_7 = arith.constant 0 : index
    %c0_8 = arith.constant 0 : index
    %7 = vector.load %arg2[%c1_6, %c0_7, %c0_8] : memref<25x8x8xbf16, #tpu.memory_space<vmem>>, vector<1x8x8xbf16>
    %8 = vector.shape_cast %7 : vector<1x8x8xbf16> to vector<8x8xbf16>
    %cst_9 = arith.constant dense<0.000000e+00> : vector<8x648xf32>
    %9 = tpu.matmul %8, %6, %cst_9 {dimension_numbers = #tpu.dot_dimension_numbers<[1], [0], [0], [1], [0, 0, 1, 1], [], []>} : vector<8x8xbf16>, vector<8x648xbf16>, vector<8x648xf32> -> vector<8x648xf32>
    %10 = arith.addf %5, %9 : vector<8x648xf32>
    %c0_10 = arith.constant 0 : index
    %c2 = arith.constant 2 : index
    %11 = vector.load %arg1[%c0_10, %c2] : memref<8x768xbf16, #tpu.memory_space<vmem>>, vector<8x648xbf16>
    %c2_11 = arith.constant 2 : index
    %c0_12 = arith.constant 0 : index
    %c0_13 = arith.constant 0 : index
    %12 = vector.load %arg2[%c2_11, %c0_12, %c0_13] : memref<25x8x8xbf16, #tpu.memory_space<vmem>>, vector<1x8x8xbf16>
    %13 = vector.shape_cast %12 : vector<1x8x8xbf16> to vector<8x8xbf16>
    %cst_14 = arith.constant dense<0.000000e+00> : vector<8x648xf32>
    %14 = tpu.matmul %13, %11, %cst_14 {dimension_numbers = #tpu.dot_dimension_numbers<[1], [0], [0], [1], [0, 0, 1, 1], [], []>} : vector<8x8xbf16>, vector<8x648xbf16>, vector<8x648xf32> -> vector<8x648xf32>
    %15 = arith.addf %10, %14 : vector<8x648xf32>
    %c0_15 = arith.constant 0 : index
    %c3 = arith.constant 3 : index
    %16 = vector.load %arg1[%c0_15, %c3] : memref<8x768xbf16, #tpu.memory_space<vmem>>, vector<8x648xbf16>
    %c3_16 = arith.constant 3 : index
    %c0_17 = arith.constant 0 : index
    %c0_18 = arith.constant 0 : index
    %17 = vector.load %arg2[%c3_16, %c0_17, %c0_18] : memref<25x8x8xbf16, #tpu.memory_space<vmem>>, vector<1x8x8xbf16>
    %18 = vector.shape_cast %17 : vector<1x8x8xbf16> to vector<8x8xbf16>
    %cst_19 = arith.constant dense<0.000000e+00> : vector<8x648xf32>
    %19 = tpu.matmul %18, %16, %cst_19 {dimension_numbers = #tpu.dot_dimension_numbers<[1], [0], [0], [1], [0, 0, 1, 1], [], []>} : vector<8x8xbf16>, vector<8x648xbf16>, vector<8x648xf32> -> vector<8x648xf32>
    %20 = arith.addf %15, %19 : vector<8x648xf32>
    %c0_20 = arith.constant 0 : index
    %c4 = arith.constant 4 : index
    %21 = vector.load %arg1[%c0_20, %c4] : memref<8x768xbf16, #tpu.memory_space<vmem>>, vector<8x648xbf16>
    %c4_21 = arith.constant 4 : index
    %c0_22 = arith.constant 0 : index
    %c0_23 = arith.constant 0 : index
    %22 = vector.load %arg2[%c4_21, %c0_22, %c0_23] : memref<25x8x8xbf16, #tpu.memory_space<vmem>>, vector<1x8x8xbf16>
    %23 = vector.shape_cast %22 : vector<1x8x8xbf16> to vector<8x8xbf16>
    %cst_24 = arith.constant dense<0.000000e+00> : vector<8x648xf32>
    %24 = tpu.matmul %23, %21, %cst_24 {dimension_numbers = #tpu.dot_dimension_numbers<[1], [0], [0], [1], [0, 0, 1, 1], [], []>} : vector<8x8xbf16>, vector<8x648xbf16>, vector<8x648xf32> -> vector<8x648xf32>
    %25 = arith.addf %20, %24 : vector<8x648xf32>
    %c0_25 = arith.constant 0 : index
    %c18 = arith.constant 18 : index
    %26 = vector.load %arg1[%c0_25, %c18] : memref<8x768xbf16, #tpu.memory_space<vmem>>, vector<8x648xbf16>
    %c5 = arith.constant 5 : index
    %c0_26 = arith.constant 0 : index
    %c0_27 = arith.constant 0 : index
    %27 = vector.load %arg2[%c5, %c0_26, %c0_27] : memref<25x8x8xbf16, #tpu.memory_space<vmem>>, vector<1x8x8xbf16>
    %28 = vector.shape_cast %27 : vector<1x8x8xbf16> to vector<8x8xbf16>
    %cst_28 = arith.constant dense<0.000000e+00> : vector<8x648xf32>
    %29 = tpu.matmul %28, %26, %cst_28 {dimension_numbers = #tpu.dot_dimension_numbers<[1], [0], [0], [1], [0, 0, 1, 1], [], []>} : vector<8x8xbf16>, vector<8x648xbf16>, vector<8x648xf32> -> vector<8x648xf32>
    %30 = arith.addf %25, %29 : vector<8x648xf32>
    %c0_29 = arith.constant 0 : index
    %c19 = arith.constant 19 : index
    %31 = vector.load %arg1[%c0_29, %c19] : memref<8x768xbf16, #tpu.memory_space<vmem>>, vector<8x648xbf16>
    %c6 = arith.constant 6 : index
    %c0_30 = arith.constant 0 : index
    %c0_31 = arith.constant 0 : index
    %32 = vector.load %arg2[%c6, %c0_30, %c0_31] : memref<25x8x8xbf16, #tpu.memory_space<vmem>>, vector<1x8x8xbf16>
    %33 = vector.shape_cast %32 : vector<1x8x8xbf16> to vector<8x8xbf16>
    %cst_32 = arith.constant dense<0.000000e+00> : vector<8x648xf32>
    %34 = tpu.matmul %33, %31, %cst_32 {dimension_numbers = #tpu.dot_dimension_numbers<[1], [0], [0], [1], [0, 0, 1, 1], [], []>} : vector<8x8xbf16>, vector<8x648xbf16>, vector<8x648xf32> -> vector<8x648xf32>
    %35 = arith.addf %30, %34 : vector<8x648xf32>
    %c0_33 = arith.constant 0 : index
    %c20 = arith.constant 20 : index
    %36 = vector.load %arg1[%c0_33, %c20] : memref<8x768xbf16, #tpu.memory_space<vmem>>, vector<8x648xbf16>
    %c7 = arith.constant 7 : index
    %c0_34 = arith.constant 0 : index
    %c0_35 = arith.constant 0 : index
    %37 = vector.load %arg2[%c7, %c0_34, %c0_35] : memref<25x8x8xbf16, #tpu.memory_space<vmem>>, vector<1x8x8xbf16>
    %38 = vector.shape_cast %37 : vector<1x8x8xbf16> to vector<8x8xbf16>
    %cst_36 = arith.constant dense<0.000000e+00> : vector<8x648xf32>
    %39 = tpu.matmul %38, %36, %cst_36 {dimension_numbers = #tpu.dot_dimension_numbers<[1], [0], [0], [1], [0, 0, 1, 1], [], []>} : vector<8x8xbf16>, vector<8x648xbf16>, vector<8x648xf32> -> vector<8x648xf32>
    %40 = arith.addf %35, %39 : vector<8x648xf32>
    %c0_37 = arith.constant 0 : index
    %c21 = arith.constant 21 : index
    %41 = vector.load %arg1[%c0_37, %c21] : memref<8x768xbf16, #tpu.memory_space<vmem>>, vector<8x648xbf16>
    %c8 = arith.constant 8 : index
    %c0_38 = arith.constant 0 : index
    %c0_39 = arith.constant 0 : index
    %42 = vector.load %arg2[%c8, %c0_38, %c0_39] : memref<25x8x8xbf16, #tpu.memory_space<vmem>>, vector<1x8x8xbf16>
    %43 = vector.shape_cast %42 : vector<1x8x8xbf16> to vector<8x8xbf16>
    %cst_40 = arith.constant dense<0.000000e+00> : vector<8x648xf32>
    %44 = tpu.matmul %43, %41, %cst_40 {dimension_numbers = #tpu.dot_dimension_numbers<[1], [0], [0], [1], [0, 0, 1, 1], [], []>} : vector<8x8xbf16>, vector<8x648xbf16>, vector<8x648xf32> -> vector<8x648xf32>
    %45 = arith.addf %40, %44 : vector<8x648xf32>
    %c0_41 = arith.constant 0 : index
    %c22 = arith.constant 22 : index
    %46 = vector.load %arg1[%c0_41, %c22] : memref<8x768xbf16, #tpu.memory_space<vmem>>, vector<8x648xbf16>
    %c9 = arith.constant 9 : index
    %c0_42 = arith.constant 0 : index
    %c0_43 = arith.constant 0 : index
    %47 = vector.load %arg2[%c9, %c0_42, %c0_43] : memref<25x8x8xbf16, #tpu.memory_space<vmem>>, vector<1x8x8xbf16>
    %48 = vector.shape_cast %47 : vector<1x8x8xbf16> to vector<8x8xbf16>
    %cst_44 = arith.constant dense<0.000000e+00> : vector<8x648xf32>
    %49 = tpu.matmul %48, %46, %cst_44 {dimension_numbers = #tpu.dot_dimension_numbers<[1], [0], [0], [1], [0, 0, 1, 1], [], []>} : vector<8x8xbf16>, vector<8x648xbf16>, vector<8x648xf32> -> vector<8x648xf32>
    %50 = arith.addf %45, %49 : vector<8x648xf32>
    %c0_45 = arith.constant 0 : index
    %c36 = arith.constant 36 : index
    %51 = vector.load %arg1[%c0_45, %c36] : memref<8x768xbf16, #tpu.memory_space<vmem>>, vector<8x648xbf16>
    %c10 = arith.constant 10 : index
    %c0_46 = arith.constant 0 : index
    %c0_47 = arith.constant 0 : index
    %52 = vector.load %arg2[%c10, %c0_46, %c0_47] : memref<25x8x8xbf16, #tpu.memory_space<vmem>>, vector<1x8x8xbf16>
    %53 = vector.shape_cast %52 : vector<1x8x8xbf16> to vector<8x8xbf16>
    %cst_48 = arith.constant dense<0.000000e+00> : vector<8x648xf32>
    %54 = tpu.matmul %53, %51, %cst_48 {dimension_numbers = #tpu.dot_dimension_numbers<[1], [0], [0], [1], [0, 0, 1, 1], [], []>} : vector<8x8xbf16>, vector<8x648xbf16>, vector<8x648xf32> -> vector<8x648xf32>
    %55 = arith.addf %50, %54 : vector<8x648xf32>
    %c0_49 = arith.constant 0 : index
    %c37 = arith.constant 37 : index
    %56 = vector.load %arg1[%c0_49, %c37] : memref<8x768xbf16, #tpu.memory_space<vmem>>, vector<8x648xbf16>
    %c11 = arith.constant 11 : index
    %c0_50 = arith.constant 0 : index
    %c0_51 = arith.constant 0 : index
    %57 = vector.load %arg2[%c11, %c0_50, %c0_51] : memref<25x8x8xbf16, #tpu.memory_space<vmem>>, vector<1x8x8xbf16>
    %58 = vector.shape_cast %57 : vector<1x8x8xbf16> to vector<8x8xbf16>
    %cst_52 = arith.constant dense<0.000000e+00> : vector<8x648xf32>
    %59 = tpu.matmul %58, %56, %cst_52 {dimension_numbers = #tpu.dot_dimension_numbers<[1], [0], [0], [1], [0, 0, 1, 1], [], []>} : vector<8x8xbf16>, vector<8x648xbf16>, vector<8x648xf32> -> vector<8x648xf32>
    %60 = arith.addf %55, %59 : vector<8x648xf32>
    %c0_53 = arith.constant 0 : index
    %c38 = arith.constant 38 : index
    %61 = vector.load %arg1[%c0_53, %c38] : memref<8x768xbf16, #tpu.memory_space<vmem>>, vector<8x648xbf16>
    %c12 = arith.constant 12 : index
    %c0_54 = arith.constant 0 : index
    %c0_55 = arith.constant 0 : index
    %62 = vector.load %arg2[%c12, %c0_54, %c0_55] : memref<25x8x8xbf16, #tpu.memory_space<vmem>>, vector<1x8x8xbf16>
    %63 = vector.shape_cast %62 : vector<1x8x8xbf16> to vector<8x8xbf16>
    %cst_56 = arith.constant dense<0.000000e+00> : vector<8x648xf32>
    %64 = tpu.matmul %63, %61, %cst_56 {dimension_numbers = #tpu.dot_dimension_numbers<[1], [0], [0], [1], [0, 0, 1, 1], [], []>} : vector<8x8xbf16>, vector<8x648xbf16>, vector<8x648xf32> -> vector<8x648xf32>
    %65 = arith.addf %60, %64 : vector<8x648xf32>
    %c0_57 = arith.constant 0 : index
    %c39 = arith.constant 39 : index
    %66 = vector.load %arg1[%c0_57, %c39] : memref<8x768xbf16, #tpu.memory_space<vmem>>, vector<8x648xbf16>
    %c13 = arith.constant 13 : index
    %c0_58 = arith.constant 0 : index
    %c0_59 = arith.constant 0 : index
    %67 = vector.load %arg2[%c13, %c0_58, %c0_59] : memref<25x8x8xbf16, #tpu.memory_space<vmem>>, vector<1x8x8xbf16>
    %68 = vector.shape_cast %67 : vector<1x8x8xbf16> to vector<8x8xbf16>
    %cst_60 = arith.constant dense<0.000000e+00> : vector<8x648xf32>
    %69 = tpu.matmul %68, %66, %cst_60 {dimension_numbers = #tpu.dot_dimension_numbers<[1], [0], [0], [1], [0, 0, 1, 1], [], []>} : vector<8x8xbf16>, vector<8x648xbf16>, vector<8x648xf32> -> vector<8x648xf32>
    %70 = arith.addf %65, %69 : vector<8x648xf32>
    %c0_61 = arith.constant 0 : index
    %c40 = arith.constant 40 : index
    %71 = vector.load %arg1[%c0_61, %c40] : memref<8x768xbf16, #tpu.memory_space<vmem>>, vector<8x648xbf16>
    %c14 = arith.constant 14 : index
    %c0_62 = arith.constant 0 : index
    %c0_63 = arith.constant 0 : index
    %72 = vector.load %arg2[%c14, %c0_62, %c0_63] : memref<25x8x8xbf16, #tpu.memory_space<vmem>>, vector<1x8x8xbf16>
    %73 = vector.shape_cast %72 : vector<1x8x8xbf16> to vector<8x8xbf16>
    %cst_64 = arith.constant dense<0.000000e+00> : vector<8x648xf32>
    %74 = tpu.matmul %73, %71, %cst_64 {dimension_numbers = #tpu.dot_dimension_numbers<[1], [0], [0], [1], [0, 0, 1, 1], [], []>} : vector<8x8xbf16>, vector<8x648xbf16>, vector<8x648xf32> -> vector<8x648xf32>
    %75 = arith.addf %70, %74 : vector<8x648xf32>
    %c0_65 = arith.constant 0 : index
    %c54 = arith.constant 54 : index
    %76 = vector.load %arg1[%c0_65, %c54] : memref<8x768xbf16, #tpu.memory_space<vmem>>, vector<8x648xbf16>
    %c15 = arith.constant 15 : index
    %c0_66 = arith.constant 0 : index
    %c0_67 = arith.constant 0 : index
    %77 = vector.load %arg2[%c15, %c0_66, %c0_67] : memref<25x8x8xbf16, #tpu.memory_space<vmem>>, vector<1x8x8xbf16>
    %78 = vector.shape_cast %77 : vector<1x8x8xbf16> to vector<8x8xbf16>
    %cst_68 = arith.constant dense<0.000000e+00> : vector<8x648xf32>
    %79 = tpu.matmul %78, %76, %cst_68 {dimension_numbers = #tpu.dot_dimension_numbers<[1], [0], [0], [1], [0, 0, 1, 1], [], []>} : vector<8x8xbf16>, vector<8x648xbf16>, vector<8x648xf32> -> vector<8x648xf32>
    %80 = arith.addf %75, %79 : vector<8x648xf32>
    %c0_69 = arith.constant 0 : index
    %c55 = arith.constant 55 : index
    %81 = vector.load %arg1[%c0_69, %c55] : memref<8x768xbf16, #tpu.memory_space<vmem>>, vector<8x648xbf16>
    %c16 = arith.constant 16 : index
    %c0_70 = arith.constant 0 : index
    %c0_71 = arith.constant 0 : index
    %82 = vector.load %arg2[%c16, %c0_70, %c0_71] : memref<25x8x8xbf16, #tpu.memory_space<vmem>>, vector<1x8x8xbf16>
    %83 = vector.shape_cast %82 : vector<1x8x8xbf16> to vector<8x8xbf16>
    %cst_72 = arith.constant dense<0.000000e+00> : vector<8x648xf32>
    %84 = tpu.matmul %83, %81, %cst_72 {dimension_numbers = #tpu.dot_dimension_numbers<[1], [0], [0], [1], [0, 0, 1, 1], [], []>} : vector<8x8xbf16>, vector<8x648xbf16>, vector<8x648xf32> -> vector<8x648xf32>
    %85 = arith.addf %80, %84 : vector<8x648xf32>
    %c0_73 = arith.constant 0 : index
    %c56 = arith.constant 56 : index
    %86 = vector.load %arg1[%c0_73, %c56] : memref<8x768xbf16, #tpu.memory_space<vmem>>, vector<8x648xbf16>
    %c17 = arith.constant 17 : index
    %c0_74 = arith.constant 0 : index
    %c0_75 = arith.constant 0 : index
    %87 = vector.load %arg2[%c17, %c0_74, %c0_75] : memref<25x8x8xbf16, #tpu.memory_space<vmem>>, vector<1x8x8xbf16>
    %88 = vector.shape_cast %87 : vector<1x8x8xbf16> to vector<8x8xbf16>
    %cst_76 = arith.constant dense<0.000000e+00> : vector<8x648xf32>
    %89 = tpu.matmul %88, %86, %cst_76 {dimension_numbers = #tpu.dot_dimension_numbers<[1], [0], [0], [1], [0, 0, 1, 1], [], []>} : vector<8x8xbf16>, vector<8x648xbf16>, vector<8x648xf32> -> vector<8x648xf32>
    %90 = arith.addf %85, %89 : vector<8x648xf32>
    %c0_77 = arith.constant 0 : index
    %c57 = arith.constant 57 : index
    %91 = vector.load %arg1[%c0_77, %c57] : memref<8x768xbf16, #tpu.memory_space<vmem>>, vector<8x648xbf16>
    %c18_78 = arith.constant 18 : index
    %c0_79 = arith.constant 0 : index
    %c0_80 = arith.constant 0 : index
    %92 = vector.load %arg2[%c18_78, %c0_79, %c0_80] : memref<25x8x8xbf16, #tpu.memory_space<vmem>>, vector<1x8x8xbf16>
    %93 = vector.shape_cast %92 : vector<1x8x8xbf16> to vector<8x8xbf16>
    %cst_81 = arith.constant dense<0.000000e+00> : vector<8x648xf32>
    %94 = tpu.matmul %93, %91, %cst_81 {dimension_numbers = #tpu.dot_dimension_numbers<[1], [0], [0], [1], [0, 0, 1, 1], [], []>} : vector<8x8xbf16>, vector<8x648xbf16>, vector<8x648xf32> -> vector<8x648xf32>
    %95 = arith.addf %90, %94 : vector<8x648xf32>
    %c0_82 = arith.constant 0 : index
    %c58 = arith.constant 58 : index
    %96 = vector.load %arg1[%c0_82, %c58] : memref<8x768xbf16, #tpu.memory_space<vmem>>, vector<8x648xbf16>
    %c19_83 = arith.constant 19 : index
    %c0_84 = arith.constant 0 : index
    %c0_85 = arith.constant 0 : index
    %97 = vector.load %arg2[%c19_83, %c0_84, %c0_85] : memref<25x8x8xbf16, #tpu.memory_space<vmem>>, vector<1x8x8xbf16>
    %98 = vector.shape_cast %97 : vector<1x8x8xbf16> to vector<8x8xbf16>
    %cst_86 = arith.constant dense<0.000000e+00> : vector<8x648xf32>
    %99 = tpu.matmul %98, %96, %cst_86 {dimension_numbers = #tpu.dot_dimension_numbers<[1], [0], [0], [1], [0, 0, 1, 1], [], []>} : vector<8x8xbf16>, vector<8x648xbf16>, vector<8x648xf32> -> vector<8x648xf32>
    %100 = arith.addf %95, %99 : vector<8x648xf32>
    %c0_87 = arith.constant 0 : index
    %c72 = arith.constant 72 : index
    %101 = vector.load %arg1[%c0_87, %c72] : memref<8x768xbf16, #tpu.memory_space<vmem>>, vector<8x648xbf16>
    %c20_88 = arith.constant 20 : index
    %c0_89 = arith.constant 0 : index
    %c0_90 = arith.constant 0 : index
    %102 = vector.load %arg2[%c20_88, %c0_89, %c0_90] : memref<25x8x8xbf16, #tpu.memory_space<vmem>>, vector<1x8x8xbf16>
    %103 = vector.shape_cast %102 : vector<1x8x8xbf16> to vector<8x8xbf16>
    %cst_91 = arith.constant dense<0.000000e+00> : vector<8x648xf32>
    %104 = tpu.matmul %103, %101, %cst_91 {dimension_numbers = #tpu.dot_dimension_numbers<[1], [0], [0], [1], [0, 0, 1, 1], [], []>} : vector<8x8xbf16>, vector<8x648xbf16>, vector<8x648xf32> -> vector<8x648xf32>
    %105 = arith.addf %100, %104 : vector<8x648xf32>
    %c0_92 = arith.constant 0 : index
    %c73 = arith.constant 73 : index
    %106 = vector.load %arg1[%c0_92, %c73] : memref<8x768xbf16, #tpu.memory_space<vmem>>, vector<8x648xbf16>
    %c21_93 = arith.constant 21 : index
    %c0_94 = arith.constant 0 : index
    %c0_95 = arith.constant 0 : index
    %107 = vector.load %arg2[%c21_93, %c0_94, %c0_95] : memref<25x8x8xbf16, #tpu.memory_space<vmem>>, vector<1x8x8xbf16>
    %108 = vector.shape_cast %107 : vector<1x8x8xbf16> to vector<8x8xbf16>
    %cst_96 = arith.constant dense<0.000000e+00> : vector<8x648xf32>
    %109 = tpu.matmul %108, %106, %cst_96 {dimension_numbers = #tpu.dot_dimension_numbers<[1], [0], [0], [1], [0, 0, 1, 1], [], []>} : vector<8x8xbf16>, vector<8x648xbf16>, vector<8x648xf32> -> vector<8x648xf32>
    %110 = arith.addf %105, %109 : vector<8x648xf32>
    %c0_97 = arith.constant 0 : index
    %c74 = arith.constant 74 : index
    %111 = vector.load %arg1[%c0_97, %c74] : memref<8x768xbf16, #tpu.memory_space<vmem>>, vector<8x648xbf16>
    %c22_98 = arith.constant 22 : index
    %c0_99 = arith.constant 0 : index
    %c0_100 = arith.constant 0 : index
    %112 = vector.load %arg2[%c22_98, %c0_99, %c0_100] : memref<25x8x8xbf16, #tpu.memory_space<vmem>>, vector<1x8x8xbf16>
    %113 = vector.shape_cast %112 : vector<1x8x8xbf16> to vector<8x8xbf16>
    %cst_101 = arith.constant dense<0.000000e+00> : vector<8x648xf32>
    %114 = tpu.matmul %113, %111, %cst_101 {dimension_numbers = #tpu.dot_dimension_numbers<[1], [0], [0], [1], [0, 0, 1, 1], [], []>} : vector<8x8xbf16>, vector<8x648xbf16>, vector<8x648xf32> -> vector<8x648xf32>
    %115 = arith.addf %110, %114 : vector<8x648xf32>
    %c0_102 = arith.constant 0 : index
    %c75 = arith.constant 75 : index
    %116 = vector.load %arg1[%c0_102, %c75] : memref<8x768xbf16, #tpu.memory_space<vmem>>, vector<8x648xbf16>
    %c23 = arith.constant 23 : index
    %c0_103 = arith.constant 0 : index
    %c0_104 = arith.constant 0 : index
    %117 = vector.load %arg2[%c23, %c0_103, %c0_104] : memref<25x8x8xbf16, #tpu.memory_space<vmem>>, vector<1x8x8xbf16>
    %118 = vector.shape_cast %117 : vector<1x8x8xbf16> to vector<8x8xbf16>
    %cst_105 = arith.constant dense<0.000000e+00> : vector<8x648xf32>
    %119 = tpu.matmul %118, %116, %cst_105 {dimension_numbers = #tpu.dot_dimension_numbers<[1], [0], [0], [1], [0, 0, 1, 1], [], []>} : vector<8x8xbf16>, vector<8x648xbf16>, vector<8x648xf32> -> vector<8x648xf32>
    %120 = arith.addf %115, %119 : vector<8x648xf32>
    %c0_106 = arith.constant 0 : index
    %c76 = arith.constant 76 : index
    %121 = vector.load %arg1[%c0_106, %c76] : memref<8x768xbf16, #tpu.memory_space<vmem>>, vector<8x648xbf16>
    %c24 = arith.constant 24 : index
    %c0_107 = arith.constant 0 : index
    %c0_108 = arith.constant 0 : index
    %122 = vector.load %arg2[%c24, %c0_107, %c0_108] : memref<25x8x8xbf16, #tpu.memory_space<vmem>>, vector<1x8x8xbf16>
    %123 = vector.shape_cast %122 : vector<1x8x8xbf16> to vector<8x8xbf16>
    %cst_109 = arith.constant dense<0.000000e+00> : vector<8x648xf32>
    %124 = tpu.matmul %123, %121, %cst_109 {dimension_numbers = #tpu.dot_dimension_numbers<[1], [0], [0], [1], [0, 0, 1, 1], [], []>} : vector<8x8xbf16>, vector<8x648xbf16>, vector<8x648xf32> -> vector<8x648xf32>
    %125 = arith.addf %120, %124 : vector<8x648xf32>
    %c0_110 = arith.constant 0 : index
    %c0_111 = arith.constant 0 : index
    %126 = vector.load %arg3[%c0_110, %c0_111] : memref<8x1xf32, #tpu.memory_space<vmem>>, vector<8x1xf32>
    %127 = vector.broadcast %126 : vector<8x1xf32> to vector<8x648xf32>
    %128 = arith.addf %125, %127 : vector<8x648xf32>
    %cst_112 = arith.constant 0.000000e+00 : f32
    %129 = vector.broadcast %cst_112 : f32 to vector<8x648xf32>
    %130 = arith.maximumf %128, %129 : vector<8x648xf32>
    %c0_113 = arith.constant 0 : index
    %c0_114 = arith.constant 0 : index
    %131 = vector.load %arg9[%c0_113, %c0_114] : memref<8x648xf32, #tpu.memory_space<vmem>>, vector<8x648xf32>
    tpu.vector_store %arg9[%c0_113, %c0_114], %130 {strides = array<i32>} : memref<8x648xf32, #tpu.memory_space<vmem>>, vector<8x648xf32>,
    %c0_115 = arith.constant 0 : index
    %c0_116 = arith.constant 0 : index
    %132 = vector.load %arg5[%c0_115, %c0_116] : memref<1x32xf32, #tpu.memory_space<vmem>>, vector<1x32xf32>
    %c0_117 = arith.constant 0 : index
    %c0_118 = arith.constant 0 : index
    %133 = vector.load %arg6[%c0_117, %c0_118] : memref<32x10xbf16, #tpu.memory_space<vmem>>, vector<32x10xbf16>
    %c0_119 = arith.constant 0 : index
    %c0_120 = arith.constant 0 : index
    %134 = vector.load %arg7[%c0_119, %c0_120] : memref<1x10xf32, #tpu.memory_space<vmem>>, vector<1x10xf32>
    %cst_121 = arith.constant 0.000000e+00 : f32
    %135 = vector.broadcast %cst_121 : f32 to vector<1x32xf32>
    %c0_122 = arith.constant 0 : index
    %c0_123 = arith.constant 0 : index
    %136 = vector.load %arg9[%c0_122, %c0_123] : memref<8x648xf32, #tpu.memory_space<vmem>>, vector<1x324xf32>
    %137 = arith.truncf %136 : vector<1x324xf32> to vector<1x324xbf16>
    %c0_124 = arith.constant 0 : index
    %c0_125 = arith.constant 0 : index
    %c0_126 = arith.constant 0 : index
    %138 = vector.load %arg4[%c0_124, %c0_125, %c0_126] : memref<8x324x32xbf16, #tpu.memory_space<vmem>>, vector<1x324x32xbf16>
    %139 = vector.shape_cast %138 : vector<1x324x32xbf16> to vector<324x32xbf16>
    %cst_127 = arith.constant dense<0.000000e+00> : vector<1x32xf32>
    %140 = tpu.matmul %137, %139, %cst_127 {dimension_numbers = #tpu.dot_dimension_numbers<[1], [0], [0], [1], [0, 0, 1, 1], [], []>} : vector<1x324xbf16>, vector<324x32xbf16>, vector<1x32xf32> -> vector<1x32xf32>
    %141 = arith.addf %135, %140 : vector<1x32xf32>
    %c1_128 = arith.constant 1 : index
    %c0_129 = arith.constant 0 : index
    %142 = vector.load %arg9[%c1_128, %c0_129] : memref<8x648xf32, #tpu.memory_space<vmem>>, vector<1x324xf32>
    %143 = arith.truncf %142 : vector<1x324xf32> to vector<1x324xbf16>
    %c1_130 = arith.constant 1 : index
    %c0_131 = arith.constant 0 : index
    %c0_132 = arith.constant 0 : index
    %144 = vector.load %arg4[%c1_130, %c0_131, %c0_132] : memref<8x324x32xbf16, #tpu.memory_space<vmem>>, vector<1x324x32xbf16>
    %145 = vector.shape_cast %144 : vector<1x324x32xbf16> to vector<324x32xbf16>
    %cst_133 = arith.constant dense<0.000000e+00> : vector<1x32xf32>
    %146 = tpu.matmul %143, %145, %cst_133 {dimension_numbers = #tpu.dot_dimension_numbers<[1], [0], [0], [1], [0, 0, 1, 1], [], []>} : vector<1x324xbf16>, vector<324x32xbf16>, vector<1x32xf32> -> vector<1x32xf32>
    %147 = arith.addf %141, %146 : vector<1x32xf32>
    %c2_134 = arith.constant 2 : index
    %c0_135 = arith.constant 0 : index
    %148 = vector.load %arg9[%c2_134, %c0_135] : memref<8x648xf32, #tpu.memory_space<vmem>>, vector<1x324xf32>
    %149 = arith.truncf %148 : vector<1x324xf32> to vector<1x324xbf16>
    %c2_136 = arith.constant 2 : index
    %c0_137 = arith.constant 0 : index
    %c0_138 = arith.constant 0 : index
    %150 = vector.load %arg4[%c2_136, %c0_137, %c0_138] : memref<8x324x32xbf16, #tpu.memory_space<vmem>>, vector<1x324x32xbf16>
    %151 = vector.shape_cast %150 : vector<1x324x32xbf16> to vector<324x32xbf16>
    %cst_139 = arith.constant dense<0.000000e+00> : vector<1x32xf32>
    %152 = tpu.matmul %149, %151, %cst_139 {dimension_numbers = #tpu.dot_dimension_numbers<[1], [0], [0], [1], [0, 0, 1, 1], [], []>} : vector<1x324xbf16>, vector<324x32xbf16>, vector<1x32xf32> -> vector<1x32xf32>
    %153 = arith.addf %147, %152 : vector<1x32xf32>
    %c3_140 = arith.constant 3 : index
    %c0_141 = arith.constant 0 : index
    %154 = vector.load %arg9[%c3_140, %c0_141] : memref<8x648xf32, #tpu.memory_space<vmem>>, vector<1x324xf32>
    %155 = arith.truncf %154 : vector<1x324xf32> to vector<1x324xbf16>
    %c3_142 = arith.constant 3 : index
    %c0_143 = arith.constant 0 : index
    %c0_144 = arith.constant 0 : index
    %156 = vector.load %arg4[%c3_142, %c0_143, %c0_144] : memref<8x324x32xbf16, #tpu.memory_space<vmem>>, vector<1x324x32xbf16>
    %157 = vector.shape_cast %156 : vector<1x324x32xbf16> to vector<324x32xbf16>
    %cst_145 = arith.constant dense<0.000000e+00> : vector<1x32xf32>
    %158 = tpu.matmul %155, %157, %cst_145 {dimension_numbers = #tpu.dot_dimension_numbers<[1], [0], [0], [1], [0, 0, 1, 1], [], []>} : vector<1x324xbf16>, vector<324x32xbf16>, vector<1x32xf32> -> vector<1x32xf32>
    %159 = arith.addf %153, %158 : vector<1x32xf32>
    %c4_146 = arith.constant 4 : index
    %c0_147 = arith.constant 0 : index
    %160 = vector.load %arg9[%c4_146, %c0_147] : memref<8x648xf32, #tpu.memory_space<vmem>>, vector<1x324xf32>
    %161 = arith.truncf %160 : vector<1x324xf32> to vector<1x324xbf16>
    %c4_148 = arith.constant 4 : index
    %c0_149 = arith.constant 0 : index
    %c0_150 = arith.constant 0 : index
    %162 = vector.load %arg4[%c4_148, %c0_149, %c0_150] : memref<8x324x32xbf16, #tpu.memory_space<vmem>>, vector<1x324x32xbf16>
    %163 = vector.shape_cast %162 : vector<1x324x32xbf16> to vector<324x32xbf16>
    %cst_151 = arith.constant dense<0.000000e+00> : vector<1x32xf32>
    %164 = tpu.matmul %161, %163, %cst_151 {dimension_numbers = #tpu.dot_dimension_numbers<[1], [0], [0], [1], [0, 0, 1, 1], [], []>} : vector<1x324xbf16>, vector<324x32xbf16>, vector<1x32xf32> -> vector<1x32xf32>
    %165 = arith.addf %159, %164 : vector<1x32xf32>
    %c5_152 = arith.constant 5 : index
    %c0_153 = arith.constant 0 : index
    %166 = vector.load %arg9[%c5_152, %c0_153] : memref<8x648xf32, #tpu.memory_space<vmem>>, vector<1x324xf32>
    %167 = arith.truncf %166 : vector<1x324xf32> to vector<1x324xbf16>
    %c5_154 = arith.constant 5 : index
    %c0_155 = arith.constant 0 : index
    %c0_156 = arith.constant 0 : index
    %168 = vector.load %arg4[%c5_154, %c0_155, %c0_156] : memref<8x324x32xbf16, #tpu.memory_space<vmem>>, vector<1x324x32xbf16>
    %169 = vector.shape_cast %168 : vector<1x324x32xbf16> to vector<324x32xbf16>
    %cst_157 = arith.constant dense<0.000000e+00> : vector<1x32xf32>
    %170 = tpu.matmul %167, %169, %cst_157 {dimension_numbers = #tpu.dot_dimension_numbers<[1], [0], [0], [1], [0, 0, 1, 1], [], []>} : vector<1x324xbf16>, vector<324x32xbf16>, vector<1x32xf32> -> vector<1x32xf32>
    %171 = arith.addf %165, %170 : vector<1x32xf32>
    %c6_158 = arith.constant 6 : index
    %c0_159 = arith.constant 0 : index
    %172 = vector.load %arg9[%c6_158, %c0_159] : memref<8x648xf32, #tpu.memory_space<vmem>>, vector<1x324xf32>
    %173 = arith.truncf %172 : vector<1x324xf32> to vector<1x324xbf16>
    %c6_160 = arith.constant 6 : index
    %c0_161 = arith.constant 0 : index
    %c0_162 = arith.constant 0 : index
    %174 = vector.load %arg4[%c6_160, %c0_161, %c0_162] : memref<8x324x32xbf16, #tpu.memory_space<vmem>>, vector<1x324x32xbf16>
    %175 = vector.shape_cast %174 : vector<1x324x32xbf16> to vector<324x32xbf16>
    %cst_163 = arith.constant dense<0.000000e+00> : vector<1x32xf32>
    %176 = tpu.matmul %173, %175, %cst_163 {dimension_numbers = #tpu.dot_dimension_numbers<[1], [0], [0], [1], [0, 0, 1, 1], [], []>} : vector<1x324xbf16>, vector<324x32xbf16>, vector<1x32xf32> -> vector<1x32xf32>
    %177 = arith.addf %171, %176 : vector<1x32xf32>
    %c7_164 = arith.constant 7 : index
    %c0_165 = arith.constant 0 : index
    %178 = vector.load %arg9[%c7_164, %c0_165] : memref<8x648xf32, #tpu.memory_space<vmem>>, vector<1x324xf32>
    %179 = arith.truncf %178 : vector<1x324xf32> to vector<1x324xbf16>
    %c7_166 = arith.constant 7 : index
    %c0_167 = arith.constant 0 : index
    %c0_168 = arith.constant 0 : index
    %180 = vector.load %arg4[%c7_166, %c0_167, %c0_168] : memref<8x324x32xbf16, #tpu.memory_space<vmem>>, vector<1x324x32xbf16>
    %181 = vector.shape_cast %180 : vector<1x324x32xbf16> to vector<324x32xbf16>
    %cst_169 = arith.constant dense<0.000000e+00> : vector<1x32xf32>
    %182 = tpu.matmul %179, %181, %cst_169 {dimension_numbers = #tpu.dot_dimension_numbers<[1], [0], [0], [1], [0, 0, 1, 1], [], []>} : vector<1x324xbf16>, vector<324x32xbf16>, vector<1x32xf32> -> vector<1x32xf32>
    %183 = arith.addf %177, %182 : vector<1x32xf32>
    %184 = arith.addf %183, %132 : vector<1x32xf32>
    %cst_170 = arith.constant 0.000000e+00 : f32
    %185 = vector.broadcast %cst_170 : f32 to vector<1x32xf32>
    %186 = arith.maximumf %184, %185 : vector<1x32xf32>
    %187 = arith.truncf %186 : vector<1x32xf32> to vector<1x32xbf16>
    %cst_171 = arith.constant dense<0.000000e+00> : vector<1x10xf32>
    %188 = tpu.matmul %187, %133, %cst_171 {dimension_numbers = #tpu.dot_dimension_numbers<[1], [0], [0], [1], [0, 0, 1, 1], [], []>} : vector<1x32xbf16>, vector<32x10xbf16>, vector<1x10xf32> -> vector<1x10xf32>
    %189 = arith.addf %188, %134 : vector<1x10xf32>
    %c0_172 = arith.constant 0 : index
    %c0_173 = arith.constant 0 : index
    %190 = vector.load %arg8[%c0_172, %c0_173] : memref<2x10xf32, #tpu.memory_space<vmem>>, vector<1x10xf32>
    tpu.vector_store %arg8[%c0_172, %c0_173], %189 {strides = array<i32>} : memref<2x10xf32, #tpu.memory_space<vmem>>, vector<1x10xf32>,
    %cst_174 = arith.constant 0.000000e+00 : f32
    %191 = vector.broadcast %cst_174 : f32 to vector<1x32xf32>
    %c0_175 = arith.constant 0 : index
    %c324 = arith.constant 324 : index
    %192 = vector.load %arg9[%c0_175, %c324] : memref<8x648xf32, #tpu.memory_space<vmem>>, vector<1x324xf32>
    %193 = arith.truncf %192 : vector<1x324xf32> to vector<1x324xbf16>
    %c0_176 = arith.constant 0 : index
    %c0_177 = arith.constant 0 : index
    %c0_178 = arith.constant 0 : index
    %194 = vector.load %arg4[%c0_176, %c0_177, %c0_178] : memref<8x324x32xbf16, #tpu.memory_space<vmem>>, vector<1x324x32xbf16>
    %195 = vector.shape_cast %194 : vector<1x324x32xbf16> to vector<324x32xbf16>
    %cst_179 = arith.constant dense<0.000000e+00> : vector<1x32xf32>
    %196 = tpu.matmul %193, %195, %cst_179 {dimension_numbers = #tpu.dot_dimension_numbers<[1], [0], [0], [1], [0, 0, 1, 1], [], []>} : vector<1x324xbf16>, vector<324x32xbf16>, vector<1x32xf32> -> vector<1x32xf32>
    %197 = arith.addf %191, %196 : vector<1x32xf32>
    %c1_180 = arith.constant 1 : index
    %c324_181 = arith.constant 324 : index
    %198 = vector.load %arg9[%c1_180, %c324_181] : memref<8x648xf32, #tpu.memory_space<vmem>>, vector<1x324xf32>
    %199 = arith.truncf %198 : vector<1x324xf32> to vector<1x324xbf16>
    %c1_182 = arith.constant 1 : index
    %c0_183 = arith.constant 0 : index
    %c0_184 = arith.constant 0 : index
    %200 = vector.load %arg4[%c1_182, %c0_183, %c0_184] : memref<8x324x32xbf16, #tpu.memory_space<vmem>>, vector<1x324x32xbf16>
    %201 = vector.shape_cast %200 : vector<1x324x32xbf16> to vector<324x32xbf16>
    %cst_185 = arith.constant dense<0.000000e+00> : vector<1x32xf32>
    %202 = tpu.matmul %199, %201, %cst_185 {dimension_numbers = #tpu.dot_dimension_numbers<[1], [0], [0], [1], [0, 0, 1, 1], [], []>} : vector<1x324xbf16>, vector<324x32xbf16>, vector<1x32xf32> -> vector<1x32xf32>
    %203 = arith.addf %197, %202 : vector<1x32xf32>
    %c2_186 = arith.constant 2 : index
    %c324_187 = arith.constant 324 : index
    %204 = vector.load %arg9[%c2_186, %c324_187] : memref<8x648xf32, #tpu.memory_space<vmem>>, vector<1x324xf32>
    %205 = arith.truncf %204 : vector<1x324xf32> to vector<1x324xbf16>
    %c2_188 = arith.constant 2 : index
    %c0_189 = arith.constant 0 : index
    %c0_190 = arith.constant 0 : index
    %206 = vector.load %arg4[%c2_188, %c0_189, %c0_190] : memref<8x324x32xbf16, #tpu.memory_space<vmem>>, vector<1x324x32xbf16>
    %207 = vector.shape_cast %206 : vector<1x324x32xbf16> to vector<324x32xbf16>
    %cst_191 = arith.constant dense<0.000000e+00> : vector<1x32xf32>
    %208 = tpu.matmul %205, %207, %cst_191 {dimension_numbers = #tpu.dot_dimension_numbers<[1], [0], [0], [1], [0, 0, 1, 1], [], []>} : vector<1x324xbf16>, vector<324x32xbf16>, vector<1x32xf32> -> vector<1x32xf32>
    %209 = arith.addf %203, %208 : vector<1x32xf32>
    %c3_192 = arith.constant 3 : index
    %c324_193 = arith.constant 324 : index
    %210 = vector.load %arg9[%c3_192, %c324_193] : memref<8x648xf32, #tpu.memory_space<vmem>>, vector<1x324xf32>
    %211 = arith.truncf %210 : vector<1x324xf32> to vector<1x324xbf16>
    %c3_194 = arith.constant 3 : index
    %c0_195 = arith.constant 0 : index
    %c0_196 = arith.constant 0 : index
    %212 = vector.load %arg4[%c3_194, %c0_195, %c0_196] : memref<8x324x32xbf16, #tpu.memory_space<vmem>>, vector<1x324x32xbf16>
    %213 = vector.shape_cast %212 : vector<1x324x32xbf16> to vector<324x32xbf16>
    %cst_197 = arith.constant dense<0.000000e+00> : vector<1x32xf32>
    %214 = tpu.matmul %211, %213, %cst_197 {dimension_numbers = #tpu.dot_dimension_numbers<[1], [0], [0], [1], [0, 0, 1, 1], [], []>} : vector<1x324xbf16>, vector<324x32xbf16>, vector<1x32xf32> -> vector<1x32xf32>
    %215 = arith.addf %209, %214 : vector<1x32xf32>
    %c4_198 = arith.constant 4 : index
    %c324_199 = arith.constant 324 : index
    %216 = vector.load %arg9[%c4_198, %c324_199] : memref<8x648xf32, #tpu.memory_space<vmem>>, vector<1x324xf32>
    %217 = arith.truncf %216 : vector<1x324xf32> to vector<1x324xbf16>
    %c4_200 = arith.constant 4 : index
    %c0_201 = arith.constant 0 : index
    %c0_202 = arith.constant 0 : index
    %218 = vector.load %arg4[%c4_200, %c0_201, %c0_202] : memref<8x324x32xbf16, #tpu.memory_space<vmem>>, vector<1x324x32xbf16>
    %219 = vector.shape_cast %218 : vector<1x324x32xbf16> to vector<324x32xbf16>
    %cst_203 = arith.constant dense<0.000000e+00> : vector<1x32xf32>
    %220 = tpu.matmul %217, %219, %cst_203 {dimension_numbers = #tpu.dot_dimension_numbers<[1], [0], [0], [1], [0, 0, 1, 1], [], []>} : vector<1x324xbf16>, vector<324x32xbf16>, vector<1x32xf32> -> vector<1x32xf32>
    %221 = arith.addf %215, %220 : vector<1x32xf32>
    %c5_204 = arith.constant 5 : index
    %c324_205 = arith.constant 324 : index
    %222 = vector.load %arg9[%c5_204, %c324_205] : memref<8x648xf32, #tpu.memory_space<vmem>>, vector<1x324xf32>
    %223 = arith.truncf %222 : vector<1x324xf32> to vector<1x324xbf16>
    %c5_206 = arith.constant 5 : index
    %c0_207 = arith.constant 0 : index
    %c0_208 = arith.constant 0 : index
    %224 = vector.load %arg4[%c5_206, %c0_207, %c0_208] : memref<8x324x32xbf16, #tpu.memory_space<vmem>>, vector<1x324x32xbf16>
    %225 = vector.shape_cast %224 : vector<1x324x32xbf16> to vector<324x32xbf16>
    %cst_209 = arith.constant dense<0.000000e+00> : vector<1x32xf32>
    %226 = tpu.matmul %223, %225, %cst_209 {dimension_numbers = #tpu.dot_dimension_numbers<[1], [0], [0], [1], [0, 0, 1, 1], [], []>} : vector<1x324xbf16>, vector<324x32xbf16>, vector<1x32xf32> -> vector<1x32xf32>
    %227 = arith.addf %221, %226 : vector<1x32xf32>
    %c6_210 = arith.constant 6 : index
    %c324_211 = arith.constant 324 : index
    %228 = vector.load %arg9[%c6_210, %c324_211] : memref<8x648xf32, #tpu.memory_space<vmem>>, vector<1x324xf32>
    %229 = arith.truncf %228 : vector<1x324xf32> to vector<1x324xbf16>
    %c6_212 = arith.constant 6 : index
    %c0_213 = arith.constant 0 : index
    %c0_214 = arith.constant 0 : index
    %230 = vector.load %arg4[%c6_212, %c0_213, %c0_214] : memref<8x324x32xbf16, #tpu.memory_space<vmem>>, vector<1x324x32xbf16>
    %231 = vector.shape_cast %230 : vector<1x324x32xbf16> to vector<324x32xbf16>
    %cst_215 = arith.constant dense<0.000000e+00> : vector<1x32xf32>
    %232 = tpu.matmul %229, %231, %cst_215 {dimension_numbers = #tpu.dot_dimension_numbers<[1], [0], [0], [1], [0, 0, 1, 1], [], []>} : vector<1x324xbf16>, vector<324x32xbf16>, vector<1x32xf32> -> vector<1x32xf32>
    %233 = arith.addf %227, %232 : vector<1x32xf32>
    %c7_216 = arith.constant 7 : index
    %c324_217 = arith.constant 324 : index
    %234 = vector.load %arg9[%c7_216, %c324_217] : memref<8x648xf32, #tpu.memory_space<vmem>>, vector<1x324xf32>
    %235 = arith.truncf %234 : vector<1x324xf32> to vector<1x324xbf16>
    %c7_218 = arith.constant 7 : index
    %c0_219 = arith.constant 0 : index
    %c0_220 = arith.constant 0 : index
    %236 = vector.load %arg4[%c7_218, %c0_219, %c0_220] : memref<8x324x32xbf16, #tpu.memory_space<vmem>>, vector<1x324x32xbf16>
    %237 = vector.shape_cast %236 : vector<1x324x32xbf16> to vector<324x32xbf16>
    %cst_221 = arith.constant dense<0.000000e+00> : vector<1x32xf32>
    %238 = tpu.matmul %235, %237, %cst_221 {dimension_numbers = #tpu.dot_dimension_numbers<[1], [0], [0], [1], [0, 0, 1, 1], [], []>} : vector<1x324xbf16>, vector<324x32xbf16>, vector<1x32xf32> -> vector<1x32xf32>
    %239 = arith.addf %233, %238 : vector<1x32xf32>
    %240 = arith.addf %239, %132 : vector<1x32xf32>
    %cst_222 = arith.constant 0.000000e+00 : f32
    %241 = vector.broadcast %cst_222 : f32 to vector<1x32xf32>
    %242 = arith.maximumf %240, %241 : vector<1x32xf32>
    %243 = arith.truncf %242 : vector<1x32xf32> to vector<1x32xbf16>
    %cst_223 = arith.constant dense<0.000000e+00> : vector<1x10xf32>
    %244 = tpu.matmul %243, %133, %cst_223 {dimension_numbers = #tpu.dot_dimension_numbers<[1], [0], [0], [1], [0, 0, 1, 1], [], []>} : vector<1x32xbf16>, vector<32x10xbf16>, vector<1x10xf32> -> vector<1x10xf32>
    %245 = arith.addf %244, %134 : vector<1x10xf32>
    %c1_224 = arith.constant 1 : index
    %c0_225 = arith.constant 0 : index
    %246 = vector.load %arg8[%c1_224, %c0_225] : memref<2x10xf32, #tpu.memory_space<vmem>>, vector<1x10xf32>
    tpu.vector_store %arg8[%c1_224, %c0_225], %245 {strides = array<i32>} : memref<2x10xf32, #tpu.memory_space<vmem>>, vector<1x10xf32>,
    return
  }
  func.func @transform_0(%arg0: i32) -> (i32, i32) {
    %c0_i32 = arith.constant 0 : i32
    %c0_i32_0 = arith.constant 0 : i32
    %c0_i32_1 = arith.constant 0 : i32
    return %c0_i32, %c0_i32_0 : i32, i32
  }
  func.func @transform_1(%arg0: i32) -> (i32, i32, i32) {
    %c0_i32 = arith.constant 0 : i32
    %c0_i32_0 = arith.constant 0 : i32
    %c0_i32_1 = arith.constant 0 : i32
    %c0_i32_2 = arith.constant 0 : i32
    return %c0_i32, %c0_i32_0, %c0_i32_1 : i32, i32, i32
  }
  func.func @transform_2(%arg0: i32) -> (i32, i32) {
    %c0_i32 = arith.constant 0 : i32
    %c0_i32_0 = arith.constant 0 : i32
    %c0_i32_1 = arith.constant 0 : i32
    return %c0_i32, %c0_i32_0 : i32, i32
  }
  func.func @transform_3(%arg0: i32) -> (i32, i32, i32) {
    %c0_i32 = arith.constant 0 : i32
    %c0_i32_0 = arith.constant 0 : i32
    %c0_i32_1 = arith.constant 0 : i32
    %c0_i32_2 = arith.constant 0 : i32
    return %c0_i32, %c0_i32_0, %c0_i32_1 : i32, i32, i32
  }
  func.func @transform_4(%arg0: i32) -> (i32, i32) {
    %c0_i32 = arith.constant 0 : i32
    %c0_i32_0 = arith.constant 0 : i32
    %c0_i32_1 = arith.constant 0 : i32
    return %c0_i32, %c0_i32_0 : i32, i32
  }
  func.func @transform_5(%arg0: i32) -> (i32, i32) {
    %c0_i32 = arith.constant 0 : i32
    %c0_i32_0 = arith.constant 0 : i32
    %c0_i32_1 = arith.constant 0 : i32
    return %c0_i32, %c0_i32_0 : i32, i32
  }
  func.func @transform_6(%arg0: i32) -> (i32, i32) {
    %c0_i32 = arith.constant 0 : i32
    %c0_i32_0 = arith.constant 0 : i32
    %c0_i32_1 = arith.constant 0 : i32
    return %c0_i32, %c0_i32_0 : i32, i32
  }
  func.func @transform_7(%arg0: i32) -> (i32, i32) {
    %c0_i32 = arith.constant 0 : i32
    %c0_i32_0 = arith.constant 0 : i32
    %c0_i32_1 = arith.constant 0 : i32
    return %c0_i32, %c0_i32_0 : i32, i32
  }
}

</mosaic_0001>

<bundles_post_ra>
// kernel: classifier_forward.1
= control target key start
LH: loop header
LB: loop body
LE: loop exit
PB: predicated region body
PF: predicated region fallthrough
CT: control target
= control target key end

     0   :  { %s11160_s28 = smov 127   ;;  %v11161_v7 = vmov 0   ;;  %s11163_s8 = smov 125   ;;  %vm61_vm0 = vcmask 1039360   ;;  %vm71_vm1 = vcmask 1043456   ;;  %vm67_vm2 = vcmask 64512   ;;  %s13440_s0 = inlined_call_operand.vmem [shape: bf16[8,768], index: 0, kind: input, shape index: {}]   ;;  %s13441_s1 = inlined_call_operand.vmem [shape: bf16[25,8,8], index: 1, kind: input, shape index: {}]   ;;  %s13442_s2 = inlined_call_operand.vmem [shape: f32[8,1], index: 2, kind: input, shape index: {}]   ;;  %s13443_s3 = inlined_call_operand.vmem [shape: bf16[8,324,32], index: 3, kind: input, shape index: {}]   ;;  %s13444_s4 = inlined_call_operand.vmem [shape: f32[1,32], index: 4, kind: input, shape index: {}]   ;;  %s13445_s5 = inlined_call_operand.vmem [shape: bf16[32,10], index: 5, kind: input, shape index: {}]   ;;  %s13446_s6 = inlined_call_operand.vmem [shape: f32[1,10], index: 6, kind: input, shape index: {}]   ;;  %s13447_s7 = inlined_call_operand.hbm [shape: f32[2,10], index: 7, kind: output, shape index: {}]  }
   0x1   :  { %v29_v0 = vld [vmem:[%s13440_s0 + $0x8] sm:$0xff]  ;;  %v28_v1 = vld [vmem:[%s13440_s0] sm:$0xff]  ;;  %v30_v6 = vld [vmem:[%s13440_s0 + $0x10] sm:$0xff]  ;;  %122 = vmatprep.mubr.bf16.mxu0 %v11161_v7  ;;  %163 = vmatprep.mubr.bf16.mxu1 %v11161_v7  ;;  %s11162_s0 = smov 126   ;;  %s11164_s9 = smov 124   ;;  %vm371_vm3 = vcmask 1031168  }
   0x2   :  { %v11235_v2 = vcombine.low %v29_v0, %v29_v0  ;;  %v11237_v3 = vcombine.low %v28_v1, %v28_v1  ;;  %v11241_v4 = vcombine.high %v29_v0, %v29_v0  ;;  %v11243_v5 = vcombine.high %v28_v1, %v28_v1  ;;  %10793 = vset.pattern.permute.xlu0 %v11161_v7  ;;  %s11165_s10 = smov 110   ;;  %s11166_s11 = smov 109   ;;  %v8960_v16 = vld [vmem:[%s13441_s1 + $0x4] sm:$0xf]  ;;  %v31_v31 = vld [vmem:[%s13441_s1] sm:$0xf] }
   0x3   :  { %v11253_v8 = vcombine.high %v30_v6, %v30_v6  ;;  %v11255_v9 = vcombine.low %v30_v6, %v30_v6  ;;  %s11167_s12 = smov 108   ;;  %s11168_s13 = smov 107   ;;  %vm541_vm4 = vcmask 1022976   ;;  %v8979_v46 = vld [vmem:[%s13441_s1 + $0x8] sm:$0xf]  ;;  %vm711_vm5 = vcmask 1014784  }
   0x4   :  { %53 = vrot.lane.b32.xlu1 %v11235_v2, %s11160_s28  ;;  %49 = vrot.lane.b32.xlu0 %v11237_v3, %s11160_s28  ;;  %s11169_s14 = smov 106   ;;  %s11170_s15 = smov 92   ;;  %v217_v25 = vsel %vm71_vm1, %v11237_v3, 0  ;;  %v223_v28 = vsel %vm71_vm1, %v11235_v2, 0  ;;  %v8986_v61 = vld [vmem:[%s13441_s1 + $0xc] sm:$0xf] }
   0x5   :  { %s11171_s18 = smov 91   ;;  %v229_v33 = vsel %vm71_vm1, %v11255_v9, 0  ;;  %s11172_s21 = smov 90   ;;  %vm881_vm6 = vcmask 900096   ;;  %vm1051_vm7 = vcmask 891904   ;;  %vm1221_vm8 = vcmask 883712  }
   0x6   :  { %s11173_s24 = smov 89   ;;  %s11174_s27 = smov 88   ;;  %vm1391_vm9 = vcmask 875520   ;;  %vm1561_vm10 = vcmask 867328   ;;  %vm1731_vm11 = vcmask 752640   ;;  %vm1901_vm12 = vcmask 744448  }
   0x7   :  { %s11175_s30 = smov 74   ;;  %vm2071_vm13 = vcmask 736256  }
   0x8   :  { %55 = vrot.lane.b32.xlu1 %v11241_v4, %s11160_s28  ;;  %51 = vrot.lane.b32.xlu0 %v11243_v5, %s11160_s28 }
   0xc   :  { %59 = vrot.lane.b32.xlu1 %v11253_v8, %s11160_s28  ;;  %57 = vrot.lane.b32.xlu0 %v11255_v9, %s11160_s28 }
  0x10   :  { %359 = vrot.lane.b32.xlu0 %v11237_v3, %s11162_s0  ;;  %361 = vrot.lane.b32.xlu1 %v11243_v5, %s11162_s0 }
  0x14   :  { %363 = vrot.lane.b32.xlu0 %v11235_v2, %s11162_s0  ;;  %365 = vrot.lane.b32.xlu1 %v11241_v4, %s11162_s0 }
  0x18   :  { %367 = vrot.lane.b32.xlu0 %v11255_v9, %s11162_s0  ;;  %369 = vrot.lane.b32.xlu1 %v11253_v8, %s11162_s0 }
  0x1c   :  { %529 = vrot.lane.b32.xlu0 %v11237_v3, %s11163_s8  ;;  %531 = vrot.lane.b32.xlu1 %v11243_v5, %s11163_s8 }
  0x20   :  { %533 = vrot.lane.b32.xlu0 %v11235_v2, %s11163_s8  ;;  %535 = vrot.lane.b32.xlu1 %v11241_v4, %s11163_s8 }
  0x24   :  { %537 = vrot.lane.b32.xlu0 %v11255_v9, %s11163_s8  ;;  %539 = vrot.lane.b32.xlu1 %v11253_v8, %s11163_s8 }
  0x28   :  { %699 = vrot.lane.b32.xlu0 %v11237_v3, %s11164_s9  ;;  %701 = vrot.lane.b32.xlu1 %v11243_v5, %s11164_s9 }
  0x2c   :  { %703 = vrot.lane.b32.xlu0 %v11235_v2, %s11164_s9  ;;  %705 = vrot.lane.b32.xlu1 %v11241_v4, %s11164_s9 }
  0x30   :  { %707 = vrot.lane.b32.xlu0 %v11255_v9, %s11164_s9  ;;  %709 = vrot.lane.b32.xlu1 %v11253_v8, %s11164_s9  ;;  %s11176_s9 = smov 73  }
  0x34   :  { %869 = vrot.lane.b32.xlu0 %v11237_v3, %s11165_s10  ;;  %871 = vrot.lane.b32.xlu1 %v11243_v5, %s11165_s10 }
  0x38   :  { %873 = vrot.lane.b32.xlu0 %v11235_v2, %s11165_s10  ;;  %875 = vrot.lane.b32.xlu1 %v11241_v4, %s11165_s10 }
  0x3c   :  { %877 = vrot.lane.b32.xlu0 %v11255_v9, %s11165_s10  ;;  %879 = vrot.lane.b32.xlu1 %v11253_v8, %s11165_s10 }
  0x40   :  { %1039 = vrot.lane.b32.xlu0 %v11237_v3, %s11166_s11  ;;  %1041 = vrot.lane.b32.xlu1 %v11243_v5, %s11166_s11 }
  0x44   :  { %1043 = vrot.lane.b32.xlu0 %v11235_v2, %s11166_s11  ;;  %1045 = vrot.lane.b32.xlu1 %v11241_v4, %s11166_s11 }
  0x48   :  { %1047 = vrot.lane.b32.xlu0 %v11255_v9, %s11166_s11  ;;  %1049 = vrot.lane.b32.xlu1 %v11253_v8, %s11166_s11 }
  0x4c   :  { %1209 = vrot.lane.b32.xlu0 %v11237_v3, %s11167_s12  ;;  %1211 = vrot.lane.b32.xlu1 %v11243_v5, %s11167_s12 }
  0x50   :  { %1213 = vrot.lane.b32.xlu0 %v11235_v2, %s11167_s12  ;;  %1215 = vrot.lane.b32.xlu1 %v11241_v4, %s11167_s12 }
  0x54   :  { %1217 = vrot.lane.b32.xlu0 %v11255_v9, %s11167_s12  ;;  %1219 = vrot.lane.b32.xlu1 %v11253_v8, %s11167_s12  ;;  %s11177_s12 = smov 72  }
  0x58   :  { %1379 = vrot.lane.b32.xlu0 %v11237_v3, %s11168_s13  ;;  %1381 = vrot.lane.b32.xlu1 %v11243_v5, %s11168_s13 }
  0x5c   :  { %1383 = vrot.lane.b32.xlu0 %v11235_v2, %s11168_s13  ;;  %1385 = vrot.lane.b32.xlu1 %v11241_v4, %s11168_s13 }
  0x60   :  { %1387 = vrot.lane.b32.xlu0 %v11255_v9, %s11168_s13  ;;  %1389 = vrot.lane.b32.xlu1 %v11253_v8, %s11168_s13 }
  0x64   :  { %1549 = vrot.lane.b32.xlu0 %v11237_v3, %s11169_s14  ;;  %1551 = vrot.lane.b32.xlu1 %v11243_v5, %s11169_s14 }
  0x68   :  { %1553 = vrot.lane.b32.xlu0 %v11235_v2, %s11169_s14  ;;  %1555 = vrot.lane.b32.xlu1 %v11241_v4, %s11169_s14 }
  0x6c   :  { %1557 = vrot.lane.b32.xlu0 %v11255_v9, %s11169_s14  ;;  %1559 = vrot.lane.b32.xlu1 %v11253_v8, %s11169_s14 }
  0x70   :  { %1719 = vrot.lane.b32.xlu0 %v11237_v3, %s11170_s15  ;;  %1721 = vrot.lane.b32.xlu1 %v11243_v5, %s11170_s15 }
  0x74   :  { %1723 = vrot.lane.b32.xlu0 %v11235_v2, %s11170_s15  ;;  %1725 = vrot.lane.b32.xlu1 %v11241_v4, %s11170_s15 }
  0x76   :  { %v54_v10 = vpop.permute.xlu1 %53  ;;  %v50_v11 = vpop.permute.xlu0 %49 }
  0x78   :  { %1727 = vrot.lane.b32.xlu0 %v11255_v9, %s11170_s15  ;;  %1729 = vrot.lane.b32.xlu1 %v11253_v8, %s11170_s15  ;;  %s11178_s15 = smov 71  }
  0x7a   :  { %v56_v12 = vpop.permute.xlu1 %55  ;;  %v52_v13 = vpop.permute.xlu0 %51 }
  0x7b   :  { %v63_v14 = vsel %vm61_vm0, %v52_v13, %v54_v10  ;;  %v62_v15 = vsel %vm61_vm0, %v50_v11, %v52_v13  ;;  %v64_v18 = vsel %vm61_vm0, %v54_v10, %v56_v12 }
  0x7c   :  { %8967 = vmatprep.subr.msk.bf16.mxu0 %vm71_vm1, %v63_v14  ;;  %v73_v17 = vsel %vm71_vm1, %v62_v15, 0  ;;  %1889 = vrot.lane.b32.xlu0 %v11237_v3, %s11171_s18  ;;  %v79_v23 = vsel %vm71_vm1, %v64_v18, 0 }
  0x7d   :  { %105 = vmatpush1.bf16.msra.mxu0 %v73_v17  ;;  %1891 = vrot.lane.b32.xlu1 %v11243_v5, %s11171_s18 }
  0x7e   :  { %v60_v19 = vpop.permute.xlu1 %59  ;;  %v58_v20 = vpop.permute.xlu0 %57 }
  0x7f   :  { %v66_v21 = vsel %vm61_vm0, %v58_v20, %v60_v19  ;;  %v65_v22 = vsel %vm61_vm0, %v56_v12, %v58_v20  ;;  %8971 = vmatprep.subr.msk.bf16.mxu0 %vm71_vm1, %v60_v19  ;;  %v8993_v19 = vld [vmem:[%s13441_s1 + $0x10] sm:$0xf] }
  0x80   :  { %8968 = vmatmul.mubr.msk.bf16.vlgmr.msra.gmra.mxu0 %vm67_vm2, %v8960_v16  ;;  %8969 = vmatprep.subr.msk.bf16.mxu1 %vm71_vm1, %v65_v22  ;;  %v85_v24 = vsel %vm71_vm1, %v66_v21, 0 }
  0x81   :  { %146 = vmatpush1.bf16.msra.mxu1 %v79_v23  ;;  %187 = vmatpush1.bf16.msra.mxu0 %v85_v24 }
  0x82   :  { %8973 = vmatprep.subr.msk.bf16.mxu1 %vm71_vm1, %v11243_v5  ;;  %1893 = vrot.lane.b32.xlu0 %v11235_v2, %s11171_s18  ;;  %v360_v26 = vpop.permute.xlu0 %359  ;;  %v362_v27 = vpop.permute.xlu1 %361 }
  0x83   :  { %204 = vmatprep.mubr.bf16.mxu0 %v11161_v7  ;;  %1895 = vrot.lane.b32.xlu1 %v11241_v4, %s11171_s18  ;;  %v372_v34 = vsel %vm371_vm3, %v360_v26, %v362_v27 }
  0x84   :  { %8970 = vmatmul.mubr.msk.bf16.vlgmr.msra.gmra.mxu1 %vm67_vm2, %v8960_v16  ;;  %8975 = vmatprep.subr.msk.bf16.mxu0 %vm71_vm1, %v11241_v4  ;;  %v381_v38 = vsel %vm71_vm1, %v372_v34, 0  ;;  %v9000_v34 = vld [vmem:[%s13441_s1 + $0x14] sm:$0xf] }
  0x85   :  { %249 = vmatpush1.bf16.msra.mxu1 %v217_v25  ;;  %266 = vmatprep.mubr.bf16.mxu1 %v11161_v7 }
  0x86   :  { %1897 = vrot.lane.b32.xlu0 %v11255_v9, %s11171_s18  ;;  %8977 = vmatprep.subr.msk.bf16.mxu1 %vm71_vm1, %v11253_v8  ;;  %v364_v29 = vpop.permute.xlu0 %363  ;;  %v366_v30 = vpop.permute.xlu1 %365 }
  0x87   :  { %1899 = vrot.lane.b32.xlu1 %v11253_v8, %s11171_s18  ;;  %v373_v32 = vsel %vm371_vm3, %v362_v27, %v364_v29  ;;  %v374_v39 = vsel %vm371_vm3, %v364_v29, %v366_v30  ;;  %s11179_s18 = smov 70  }
  0x88   :  { %8972 = vmatmul.mubr.msk.bf16.vlgmr.msra.gmra.mxu0 %vm67_vm2, %v8960_v16  ;;  %v387_v43 = vsel %vm71_vm1, %v374_v39, 0 }
  0x89   :  { %290 = vmatpush1.bf16.msra.mxu0 %v223_v28  ;;  %307 = vmatprep.mubr.bf16.mxu0 %v11161_v7 }
  0x8a   :  { %2059 = vrot.lane.b32.xlu0 %v11237_v3, %s11172_s21  ;;  %8980 = vmatprep.subr.msk.bf16.mxu0 %vm71_vm1, %v373_v32  ;;  %v368_v35 = vpop.permute.xlu0 %367  ;;  %v370_v36 = vpop.permute.xlu1 %369 }
  0x8b   :  { %2061 = vrot.lane.b32.xlu1 %v11243_v5, %s11172_s21  ;;  %v375_v37 = vsel %vm371_vm3, %v366_v30, %v368_v35  ;;  %v376_v42 = vsel %vm371_vm3, %v368_v35, %v370_v36 }
  0x8c   :  { %8974 = vmatmul.mubr.msk.bf16.vlgmr.msra.gmra.mxu1 %vm67_vm2, %v31_v31  ;;  %v393_v48 = vsel %vm71_vm1, %v376_v42, 0 }
  0x8d   :  { %331 = vmatpush1.bf16.msra.mxu1 %v229_v33  ;;  %348 = vmatprep.mubr.bf16.mxu1 %v11161_v7 }
  0x8e   :  { %2063 = vrot.lane.b32.xlu0 %v11235_v2, %s11172_s21  ;;  %8982 = vmatprep.subr.msk.bf16.mxu1 %vm71_vm1, %v375_v37  ;;  %v530_v40 = vpop.permute.xlu0 %529  ;;  %v532_v41 = vpop.permute.xlu1 %531 }
  0x8f   :  { %2065 = vrot.lane.b32.xlu1 %v11241_v4, %s11172_s21  ;;  %v542_v49 = vsel %vm541_vm4, %v530_v40, %v532_v41 }
  0x90   :  { %8976 = vmatmul.mubr.msk.bf16.vlgmr.msra.gmra.mxu0 %vm67_vm2, %v31_v31  ;;  %v551_v53 = vsel %vm71_vm1, %v542_v49, 0  ;;  %v9007_v49 = vld [vmem:[%s13441_s1 + $0x18] sm:$0xf] }
  0x91   :  { %413 = vmatpush1.bf16.msra.mxu0 %v381_v38  ;;  %430 = vmatprep.mubr.bf16.mxu0 %v11161_v7 }
  0x92   :  { %2067 = vrot.lane.b32.xlu0 %v11255_v9, %s11172_s21  ;;  %8984 = vmatprep.subr.msk.bf16.mxu0 %vm71_vm1, %v370_v36  ;;  %v534_v44 = vpop.permute.xlu0 %533  ;;  %v536_v45 = vpop.permute.xlu1 %535 }
  0x93   :  { %2069 = vrot.lane.b32.xlu1 %v11253_v8, %s11172_s21  ;;  %v543_v47 = vsel %vm541_vm4, %v532_v41, %v534_v44  ;;  %v544_v54 = vsel %vm541_vm4, %v534_v44, %v536_v45  ;;  %s11180_s21 = smov 56  }
  0x94   :  { %8978 = vmatmul.mubr.msk.bf16.vlgmr.msra.gmra.mxu1 %vm67_vm2, %v31_v31  ;;  %v557_v58 = vsel %vm71_vm1, %v544_v54, 0 }
  0x95   :  { %454 = vmatpush1.bf16.msra.mxu1 %v387_v43  ;;  %471 = vmatprep.mubr.bf16.mxu1 %v11161_v7 }
  0x96   :  { %2229 = vrot.lane.b32.xlu0 %v11237_v3, %s11173_s24  ;;  %8987 = vmatprep.subr.msk.bf16.mxu1 %vm71_vm1, %v543_v47  ;;  %v538_v50 = vpop.permute.xlu0 %537  ;;  %v540_v51 = vpop.permute.xlu1 %539 }
  0x97   :  { %2231 = vrot.lane.b32.xlu1 %v11243_v5, %s11173_s24  ;;  %v545_v52 = vsel %vm541_vm4, %v536_v45, %v538_v50  ;;  %v546_v57 = vsel %vm541_vm4, %v538_v50, %v540_v51 }
  0x98   :  { %8981 = vmatmul.mubr.msk.bf16.vlgmr.msra.gmra.mxu0 %vm67_vm2, %v8979_v46  ;;  %v563_v63 = vsel %vm71_vm1, %v546_v57, 0 }
  0x99   :  { %495 = vmatpush1.bf16.msra.mxu0 %v393_v48  ;;  %512 = vmatprep.mubr.bf16.mxu0 %v11161_v7 }
  0x9a   :  { %2233 = vrot.lane.b32.xlu0 %v11235_v2, %s11173_s24  ;;  %8989 = vmatprep.subr.msk.bf16.mxu0 %vm71_vm1, %v545_v52  ;;  %v700_v55 = vpop.permute.xlu0 %699  ;;  %v702_v56 = vpop.permute.xlu1 %701 }
  0x9b   :  { %2235 = vrot.lane.b32.xlu1 %v11241_v4, %s11173_s24  ;;  %v712_v0 = vsel %vm711_vm5, %v700_v55, %v702_v56 }
  0x9c   :  { %8983 = vmatmul.mubr.msk.bf16.vlgmr.msra.gmra.mxu1 %vm67_vm2, %v8979_v46  ;;  %v721_v12 = vsel %vm71_vm1, %v712_v0, 0  ;;  %v9014_v0 = vld [vmem:[%s13441_s1 + $0x1c] sm:$0xf] }
  0x9d   :  { %583 = vmatpush1.bf16.msra.mxu1 %v551_v53  ;;  %600 = vmatprep.mubr.bf16.mxu1 %v11161_v7 }
  0x9e   :  { %2237 = vrot.lane.b32.xlu0 %v11255_v9, %s11173_s24  ;;  %8991 = vmatprep.subr.msk.bf16.mxu1 %vm71_vm1, %v540_v51  ;;  %v704_v59 = vpop.permute.xlu0 %703  ;;  %v706_v60 = vpop.permute.xlu1 %705 }
  0x9f   :  { %2239 = vrot.lane.b32.xlu1 %v11253_v8, %s11173_s24  ;;  %v713_v62 = vsel %vm711_vm5, %v702_v56, %v704_v59  ;;  %v714_v11 = vsel %vm711_vm5, %v704_v59, %v706_v60  ;;  %s11181_s24 = smov 55  }
  0xa0   :  { %8985 = vmatmul.mubr.msk.bf16.vlgmr.msra.gmra.mxu0 %vm67_vm2, %v8979_v46  ;;  %v727_v15 = vsel %vm71_vm1, %v714_v11, 0 }
  0xa1   :  { %624 = vmatpush1.bf16.msra.mxu0 %v557_v58  ;;  %641 = vmatprep.mubr.bf16.mxu0 %v11161_v7 }
  0xa2   :  { %2399 = vrot.lane.b32.xlu0 %v11237_v3, %s11174_s27  ;;  %8994 = vmatprep.subr.msk.bf16.mxu0 %vm71_vm1, %v713_v62  ;;  %v708_v1 = vpop.permute.xlu0 %707  ;;  %v710_v6 = vpop.permute.xlu1 %709 }
  0xa3   :  { %2401 = vrot.lane.b32.xlu1 %v11243_v5, %s11174_s27  ;;  %v715_v10 = vsel %vm711_vm5, %v706_v60, %v708_v1  ;;  %v716_v16 = vsel %vm711_vm5, %v708_v1, %v710_v6 }
  0xa4   :  { %8988 = vmatmul.mubr.msk.bf16.vlgmr.msra.gmra.mxu1 %vm67_vm2, %v8986_v61  ;;  %v733_v21 = vsel %vm71_vm1, %v716_v16, 0 }
  0xa5   :  { %665 = vmatpush1.bf16.msra.mxu1 %v563_v63  ;;  %682 = vmatprep.mubr.bf16.mxu1 %v11161_v7 }
  0xa6   :  { %2403 = vrot.lane.b32.xlu0 %v11235_v2, %s11174_s27  ;;  %8996 = vmatprep.subr.msk.bf16.mxu1 %vm71_vm1, %v715_v10  ;;  %v870_v13 = vpop.permute.xlu0 %869  ;;  %v872_v14 = vpop.permute.xlu1 %871 }
  0xa7   :  { %2405 = vrot.lane.b32.xlu1 %v11241_v4, %s11174_s27  ;;  %v882_v22 = vsel %vm881_vm6, %v870_v13, %v872_v14 }
  0xa8   :  { %8990 = vmatmul.mubr.msk.bf16.vlgmr.msra.gmra.mxu0 %vm67_vm2, %v8986_v61  ;;  %v891_v27 = vsel %vm71_vm1, %v882_v22, 0  ;;  %v9021_v22 = vld [vmem:[%s13441_s1 + $0x20] sm:$0xf] }
  0xa9   :  { %753 = vmatpush1.bf16.msra.mxu0 %v721_v12  ;;  %770 = vmatprep.mubr.bf16.mxu0 %v11161_v7 }
  0xaa   :  { %2407 = vrot.lane.b32.xlu0 %v11255_v9, %s11174_s27  ;;  %8998 = vmatprep.subr.msk.bf16.mxu0 %vm71_vm1, %v710_v6  ;;  %v874_v17 = vpop.permute.xlu0 %873  ;;  %v876_v18 = vpop.permute.xlu1 %875 }
  0xab   :  { %2409 = vrot.lane.b32.xlu1 %v11253_v8, %s11174_s27  ;;  %v883_v20 = vsel %vm881_vm6, %v872_v14, %v874_v17  ;;  %v884_v26 = vsel %vm881_vm6, %v874_v17, %v876_v18  ;;  %s11182_s27 = smov 54  }
  0xac   :  { %8992 = vmatmul.mubr.msk.bf16.vlgmr.msra.gmra.mxu1 %vm67_vm2, %v8986_v61  ;;  %v897_v30 = vsel %vm71_vm1, %v884_v26, 0 }
  0xad   :  { %794 = vmatpush1.bf16.msra.mxu1 %v727_v15  ;;  %811 = vmatprep.mubr.bf16.mxu1 %v11161_v7 }
  0xae   :  { %2569 = vrot.lane.b32.xlu0 %v11237_v3, %s11175_s30  ;;  %9001 = vmatprep.subr.msk.bf16.mxu1 %vm71_vm1, %v883_v20  ;;  %v878_v23 = vpop.permute.xlu0 %877  ;;  %v880_v24 = vpop.permute.xlu1 %879 }
  0xaf   :  { %2571 = vrot.lane.b32.xlu1 %v11243_v5, %s11175_s30  ;;  %v885_v25 = vsel %vm881_vm6, %v876_v18, %v878_v23  ;;  %v886_v31 = vsel %vm881_vm6, %v878_v23, %v880_v24 }
  0xb0   :  { %8995 = vmatmul.mubr.msk.bf16.vlgmr.msra.gmra.mxu0 %vm67_vm2, %v8993_v19  ;;  %v903_v36 = vsel %vm71_vm1, %v886_v31, 0 }
  0xb1   :  { %835 = vmatpush1.bf16.msra.mxu0 %v733_v21  ;;  %852 = vmatprep.mubr.bf16.mxu0 %v11161_v7 }
  0xb2   :  { %2573 = vrot.lane.b32.xlu0 %v11235_v2, %s11175_s30  ;;  %9003 = vmatprep.subr.msk.bf16.mxu0 %vm71_vm1, %v885_v25  ;;  %v1040_v28 = vpop.permute.xlu0 %1039  ;;  %v1042_v29 = vpop.permute.xlu1 %1041 }
  0xb3   :  { %2575 = vrot.lane.b32.xlu1 %v11241_v4, %s11175_s30  ;;  %v1052_v37 = vsel %vm1051_vm7, %v1040_v28, %v1042_v29 }
  0xb4   :  { %8997 = vmatmul.mubr.msk.bf16.vlgmr.msra.gmra.mxu1 %vm67_vm2, %v8993_v19  ;;  %v1061_v42 = vsel %vm71_vm1, %v1052_v37, 0  ;;  %v9028_v37 = vld [vmem:[%s13441_s1 + $0x24] sm:$0xf] }
  0xb5   :  { %923 = vmatpush1.bf16.msra.mxu1 %v891_v27  ;;  %940 = vmatprep.mubr.bf16.mxu1 %v11161_v7 }
  0xb6   :  { %2577 = vrot.lane.b32.xlu0 %v11255_v9, %s11175_s30  ;;  %9005 = vmatprep.subr.msk.bf16.mxu1 %vm71_vm1, %v880_v24  ;;  %v1044_v32 = vpop.permute.xlu0 %1043  ;;  %v1046_v33 = vpop.permute.xlu1 %1045 }
  0xb7   :  { %2579 = vrot.lane.b32.xlu1 %v11253_v8, %s11175_s30  ;;  %v1053_v35 = vsel %vm1051_vm7, %v1042_v29, %v1044_v32  ;;  %v1054_v41 = vsel %vm1051_vm7, %v1044_v32, %v1046_v33 }
  0xb8   :  { %8999 = vmatmul.mubr.msk.bf16.vlgmr.msra.gmra.mxu0 %vm67_vm2, %v8993_v19  ;;  %v1067_v45 = vsel %vm71_vm1, %v1054_v41, 0 }
  0xb9   :  { %964 = vmatpush1.bf16.msra.mxu0 %v897_v30  ;;  %981 = vmatprep.mubr.bf16.mxu0 %v11161_v7 }
  0xba   :  { %2739 = vrot.lane.b32.xlu0 %v11237_v3, %s11176_s9  ;;  %9008 = vmatprep.subr.msk.bf16.mxu0 %vm71_vm1, %v1053_v35  ;;  %v1048_v38 = vpop.permute.xlu0 %1047  ;;  %v1050_v39 = vpop.permute.xlu1 %1049 }
  0xbb   :  { %2741 = vrot.lane.b32.xlu1 %v11243_v5, %s11176_s9  ;;  %v1055_v40 = vsel %vm1051_vm7, %v1046_v33, %v1048_v38  ;;  %v1056_v46 = vsel %vm1051_vm7, %v1048_v38, %v1050_v39 }
  0xbc   :  { %9002 = vmatmul.mubr.msk.bf16.vlgmr.msra.gmra.mxu1 %vm67_vm2, %v9000_v34  ;;  %v1073_v51 = vsel %vm71_vm1, %v1056_v46, 0 }
  0xbd   :  { %1005 = vmatpush1.bf16.msra.mxu1 %v903_v36  ;;  %1022 = vmatprep.mubr.bf16.mxu1 %v11161_v7 }
  0xbe   :  { %2743 = vrot.lane.b32.xlu0 %v11235_v2, %s11176_s9  ;;  %9010 = vmatprep.subr.msk.bf16.mxu1 %vm71_vm1, %v1055_v40  ;;  %v1210_v43 = vpop.permute.xlu0 %1209  ;;  %v1212_v44 = vpop.permute.xlu1 %1211 }
  0xbf   :  { %2745 = vrot.lane.b32.xlu1 %v11241_v4, %s11176_s9  ;;  %v1222_v52 = vsel %vm1221_vm8, %v1210_v43, %v1212_v44 }
  0xc0   :  { %9004 = vmatmul.mubr.msk.bf16.vlgmr.msra.gmra.mxu0 %vm67_vm2, %v9000_v34  ;;  %v1231_v57 = vsel %vm71_vm1, %v1222_v52, 0 }
  0xc1   :  { %1093 = vmatpush1.bf16.msra.mxu0 %v1061_v42  ;;  %1110 = vmatprep.mubr.bf16.mxu0 %v11161_v7 }
  0xc2   :  { %2747 = vrot.lane.b32.xlu0 %v11255_v9, %s11176_s9  ;;  %9012 = vmatprep.subr.msk.bf16.mxu0 %vm71_vm1, %v1050_v39  ;;  %v1214_v47 = vpop.permute.xlu0 %1213  ;;  %v1216_v48 = vpop.permute.xlu1 %1215 }
  0xc3   :  { %2749 = vrot.lane.b32.xlu1 %v11253_v8, %s11176_s9  ;;  %v1223_v50 = vsel %vm1221_vm8, %v1212_v44, %v1214_v47  ;;  %v1224_v56 = vsel %vm1221_vm8, %v1214_v47, %v1216_v48 }
  0xc4   :  { %9006 = vmatmul.mubr.msk.bf16.vlgmr.msra.gmra.mxu1 %vm67_vm2, %v9000_v34  ;;  %v1237_v60 = vsel %vm71_vm1, %v1224_v56, 0 }
  0xc5   :  { %1134 = vmatpush1.bf16.msra.mxu1 %v1067_v45  ;;  %1151 = vmatprep.mubr.bf16.mxu1 %v11161_v7 }
  0xc6   :  { %2909 = vrot.lane.b32.xlu0 %v11237_v3, %s11177_s12  ;;  %9015 = vmatprep.subr.msk.bf16.mxu1 %vm71_vm1, %v1223_v50  ;;  %v1218_v53 = vpop.permute.xlu0 %1217  ;;  %v1220_v54 = vpop.permute.xlu1 %1219 }
  0xc7   :  { %2911 = vrot.lane.b32.xlu1 %v11243_v5, %s11177_s12  ;;  %v1225_v55 = vsel %vm1221_vm8, %v1216_v48, %v1218_v53  ;;  %v1226_v61 = vsel %vm1221_vm8, %v1218_v53, %v1220_v54 }
  0xc8   :  { %9009 = vmatmul.mubr.msk.bf16.vlgmr.msra.gmra.mxu0 %vm67_vm2, %v9007_v49  ;;  %v1243_v6 = vsel %vm71_vm1, %v1226_v61, 0 }
  0xc9   :  { %1175 = vmatpush1.bf16.msra.mxu0 %v1073_v51  ;;  %1192 = vmatprep.mubr.bf16.mxu0 %v11161_v7  ;;  %v9035_v51 = vld [vmem:[%s13441_s1 + $0x28] sm:$0xf] }
  0xca   :  { %2913 = vrot.lane.b32.xlu0 %v11235_v2, %s11177_s12  ;;  %9017 = vmatprep.subr.msk.bf16.mxu0 %vm71_vm1, %v1225_v55  ;;  %v1380_v58 = vpop.permute.xlu0 %1379  ;;  %v1382_v59 = vpop.permute.xlu1 %1381 }
  0xcb   :  { %2915 = vrot.lane.b32.xlu1 %v11241_v4, %s11177_s12  ;;  %v1392_v10 = vsel %vm1391_vm9, %v1380_v58, %v1382_v59 }
  0xcc   :  { %9011 = vmatmul.mubr.msk.bf16.vlgmr.msra.gmra.mxu1 %vm67_vm2, %v9007_v49  ;;  %v1401_v15 = vsel %vm71_vm1, %v1392_v10, 0 }
  0xcd   :  { %1263 = vmatpush1.bf16.msra.mxu1 %v1231_v57  ;;  %1280 = vmatprep.mubr.bf16.mxu1 %v11161_v7 }
  0xce   :  { %2917 = vrot.lane.b32.xlu0 %v11255_v9, %s11177_s12  ;;  %9019 = vmatprep.subr.msk.bf16.mxu1 %vm71_vm1, %v1220_v54  ;;  %v1384_v62 = vpop.permute.xlu0 %1383  ;;  %v1386_v63 = vpop.permute.xlu1 %1385 }
  0xcf   :  { %2919 = vrot.lane.b32.xlu1 %v11253_v8, %s11177_s12  ;;  %v1393_v1 = vsel %vm1391_vm9, %v1382_v59, %v1384_v62  ;;  %v1394_v14 = vsel %vm1391_vm9, %v1384_v62, %v1386_v63 }
  0xd0   :  { %9013 = vmatmul.mubr.msk.bf16.vlgmr.msra.gmra.mxu0 %vm67_vm2, %v9007_v49  ;;  %v1407_v18 = vsel %vm71_vm1, %v1394_v14, 0 }
  0xd1   :  { %1304 = vmatpush1.bf16.msra.mxu0 %v1237_v60  ;;  %1321 = vmatprep.mubr.bf16.mxu0 %v11161_v7 }
  0xd2   :  { %3079 = vrot.lane.b32.xlu0 %v11237_v3, %s11178_s15  ;;  %9022 = vmatprep.subr.msk.bf16.mxu0 %vm71_vm1, %v1393_v1  ;;  %v1388_v11 = vpop.permute.xlu0 %1387  ;;  %v1390_v12 = vpop.permute.xlu1 %1389  ;;  %v9042_v1 = vld [vmem:[%s13441_s1 + $0x2c] sm:$0xf] }
  0xd3   :  { %3081 = vrot.lane.b32.xlu1 %v11243_v5, %s11178_s15  ;;  %v1395_v13 = vsel %vm1391_vm9, %v1386_v63, %v1388_v11  ;;  %v1396_v19 = vsel %vm1391_vm9, %v1388_v11, %v1390_v12 }
  0xd4   :  { %9016 = vmatmul.mubr.msk.bf16.vlgmr.msra.gmra.mxu1 %vm67_vm2, %v9014_v0  ;;  %v1413_v24 = vsel %vm71_vm1, %v1396_v19, 0 }
  0xd5   :  { %1345 = vmatpush1.bf16.msra.mxu1 %v1243_v6  ;;  %1362 = vmatprep.mubr.bf16.mxu1 %v11161_v7 }
  0xd6   :  { %3083 = vrot.lane.b32.xlu0 %v11235_v2, %s11178_s15  ;;  %9024 = vmatprep.subr.msk.bf16.mxu1 %vm71_vm1, %v1395_v13  ;;  %v1550_v16 = vpop.permute.xlu0 %1549  ;;  %v1552_v17 = vpop.permute.xlu1 %1551 }
  0xd7   :  { %3085 = vrot.lane.b32.xlu1 %v11241_v4, %s11178_s15  ;;  %v1562_v25 = vsel %vm1561_vm10, %v1550_v16, %v1552_v17 }
  0xd8   :  { %9018 = vmatmul.mubr.msk.bf16.vlgmr.msra.gmra.mxu0 %vm67_vm2, %v9014_v0  ;;  %v1571_v30 = vsel %vm71_vm1, %v1562_v25, 0 }
  0xd9   :  { %1433 = vmatpush1.bf16.msra.mxu0 %v1401_v15  ;;  %1450 = vmatprep.mubr.bf16.mxu0 %v11161_v7 }
  0xda   :  { %3087 = vrot.lane.b32.xlu0 %v11255_v9, %s11178_s15  ;;  %9026 = vmatprep.subr.msk.bf16.mxu0 %vm71_vm1, %v1390_v12  ;;  %v1554_v20 = vpop.permute.xlu0 %1553  ;;  %v1556_v21 = vpop.permute.xlu1 %1555 }
  0xdb   :  { %3089 = vrot.lane.b32.xlu1 %v11253_v8, %s11178_s15  ;;  %v1563_v23 = vsel %vm1561_vm10, %v1552_v17, %v1554_v20  ;;  %v1564_v29 = vsel %vm1561_vm10, %v1554_v20, %v1556_v21 }
  0xdc   :  { %9020 = vmatmul.mubr.msk.bf16.vlgmr.msra.gmra.mxu1 %vm67_vm2, %v9014_v0  ;;  %v1577_v33 = vsel %vm71_vm1, %v1564_v29, 0 }
  0xdd   :  { %1474 = vmatpush1.bf16.msra.mxu1 %v1407_v18  ;;  %1491 = vmatprep.mubr.bf16.mxu1 %v11161_v7 }
  0xde   :  { %3249 = vrot.lane.b32.xlu0 %v11237_v3, %s11179_s18  ;;  %9029 = vmatprep.subr.msk.bf16.mxu1 %vm71_vm1, %v1563_v23  ;;  %v1558_v26 = vpop.permute.xlu0 %1557  ;;  %v1560_v27 = vpop.permute.xlu1 %1559 }
  0xdf   :  { %3251 = vrot.lane.b32.xlu1 %v11243_v5, %s11179_s18  ;;  %v1565_v28 = vsel %vm1561_vm10, %v1556_v21, %v1558_v26  ;;  %v1566_v34 = vsel %vm1561_vm10, %v1558_v26, %v1560_v27 }
  0xe0   :  { %9023 = vmatmul.mubr.msk.bf16.vlgmr.msra.gmra.mxu0 %vm67_vm2, %v9021_v22  ;;  %v1583_v39 = vsel %vm71_vm1, %v1566_v34, 0 }
  0xe1   :  { %1515 = vmatpush1.bf16.msra.mxu0 %v1413_v24  ;;  %1532 = vmatprep.mubr.bf16.mxu0 %v11161_v7 }
  0xe2   :  { %3253 = vrot.lane.b32.xlu0 %v11235_v2, %s11179_s18  ;;  %9031 = vmatprep.subr.msk.bf16.mxu0 %vm71_vm1, %v1565_v28  ;;  %v1720_v31 = vpop.permute.xlu0 %1719  ;;  %v1722_v32 = vpop.permute.xlu1 %1721 }
  0xe3   :  { %3255 = vrot.lane.b32.xlu1 %v11241_v4, %s11179_s18  ;;  %v1732_v40 = vsel %vm1731_vm11, %v1720_v31, %v1722_v32 }
  0xe4   :  { %9025 = vmatmul.mubr.msk.bf16.vlgmr.msra.gmra.mxu1 %vm67_vm2, %v9021_v22  ;;  %v1741_v44 = vsel %vm71_vm1, %v1732_v40, 0 }
  0xe5   :  { %1603 = vmatpush1.bf16.msra.mxu1 %v1571_v30  ;;  %1620 = vmatprep.mubr.bf16.mxu1 %v11161_v7 }
  0xe6   :  { %3257 = vrot.lane.b32.xlu0 %v11255_v9, %s11179_s18  ;;  %9033 = vmatprep.subr.msk.bf16.mxu1 %vm71_vm1, %v1560_v27  ;;  %v1724_v35 = vpop.permute.xlu0 %1723  ;;  %v1726_v36 = vpop.permute.xlu1 %1725 }
  0xe7   :  { %3259 = vrot.lane.b32.xlu1 %v11253_v8, %s11179_s18  ;;  %v1733_v38 = vsel %vm1731_vm11, %v1722_v32, %v1724_v35  ;;  %v1734_v45 = vsel %vm1731_vm11, %v1724_v35, %v1726_v36 }
  0xe8   :  { %9027 = vmatmul.mubr.msk.bf16.vlgmr.msra.gmra.mxu0 %vm67_vm2, %v9021_v22  ;;  %v1747_v49 = vsel %vm71_vm1, %v1734_v45, 0 }
  0xe9   :  { %1644 = vmatpush1.bf16.msra.mxu0 %v1577_v33  ;;  %1661 = vmatprep.mubr.bf16.mxu0 %v11161_v7 }
  0xea   :  { %3419 = vrot.lane.b32.xlu0 %v11237_v3, %s11180_s21  ;;  %9036 = vmatprep.subr.msk.bf16.mxu0 %vm71_vm1, %v1733_v38  ;;  %v1728_v41 = vpop.permute.xlu0 %1727  ;;  %v1730_v42 = vpop.permute.xlu1 %1729 }
  0xeb   :  { %3421 = vrot.lane.b32.xlu1 %v11243_v5, %s11180_s21  ;;  %v1735_v43 = vsel %vm1731_vm11, %v1726_v36, %v1728_v41  ;;  %v1736_v46 = vsel %vm1731_vm11, %v1728_v41, %v1730_v42 }
  0xec   :  { %9030 = vmatmul.mubr.msk.bf16.vlgmr.msra.gmra.mxu1 %vm67_vm2, %v9028_v37  ;;  %v1753_v50 = vsel %vm71_vm1, %v1736_v46, 0 }
  0xed   :  { %1685 = vmatpush1.bf16.msra.mxu1 %v1583_v39  ;;  %1702 = vmatprep.mubr.bf16.mxu1 %v11161_v7 }
  0xee   :  { %3423 = vrot.lane.b32.xlu0 %v11235_v2, %s11180_s21  ;;  %9038 = vmatprep.subr.msk.bf16.mxu1 %vm71_vm1, %v1735_v43  ;;  %v1890_v47 = vpop.permute.xlu0 %1889 }
  0xef   :  { %3425 = vrot.lane.b32.xlu1 %v11241_v4, %s11180_s21  ;;  %v1892_v48 = vpop.permute.xlu1 %1891 }
  0xf0   :  { %9032 = vmatmul.mubr.msk.bf16.vlgmr.msra.gmra.mxu0 %vm67_vm2, %v9028_v37  ;;  %v1902_v55 = vsel %vm1901_vm12, %v1890_v47, %v1892_v48 }
  0xf1   :  { %1773 = vmatpush1.bf16.msra.mxu0 %v1741_v44  ;;  %1790 = vmatprep.mubr.bf16.mxu0 %v11161_v7  ;;  %v1911_v58 = vsel %vm71_vm1, %v1902_v55, 0 }
  0xf2   :  { %3427 = vrot.lane.b32.xlu0 %v11255_v9, %s11180_s21  ;;  %9040 = vmatprep.subr.msk.bf16.mxu0 %vm71_vm1, %v1730_v42 }
  0xf3   :  { %3429 = vrot.lane.b32.xlu1 %v11253_v8, %s11180_s21 }
  0xf4   :  { %9034 = vmatmul.mubr.msk.bf16.vlgmr.msra.gmra.mxu1 %vm67_vm2, %v9028_v37  ;;  %v1894_v52 = vpop.permute.xlu0 %1893 }
  0xf5   :  { %1814 = vmatpush1.bf16.msra.mxu1 %v1747_v49  ;;  %v1896_v53 = vpop.permute.xlu1 %1895  ;;  %1831 = vmatprep.mubr.bf16.mxu1 %v11161_v7  ;;  %v1903_v54 = vsel %vm1901_vm12, %v1892_v48, %v1894_v52 }
  0xf6   :  { %3589 = vrot.lane.b32.xlu0 %v11237_v3, %s11181_s24  ;;  %9043 = vmatprep.subr.msk.bf16.mxu1 %vm71_vm1, %v1903_v54  ;;  %v1904_v56 = vsel %vm1901_vm12, %v1894_v52, %v1896_v53 }
  0xf7   :  { %3591 = vrot.lane.b32.xlu1 %v11243_v5, %s11181_s24  ;;  %v1917_v61 = vsel %vm71_vm1, %v1904_v56, 0 }
  0xf8   :  { %9037 = vmatmul.mubr.msk.bf16.vlgmr.msra.gmra.mxu0 %vm67_vm2, %v9035_v51  ;;  %v1898_v57 = vpop.permute.xlu0 %1897 }
  0xf9   :  { %1855 = vmatpush1.bf16.msra.mxu0 %v1753_v50  ;;  %v1900_v59 = vpop.permute.xlu1 %1899  ;;  %1872 = vmatprep.mubr.bf16.mxu0 %v11161_v7  ;;  %v1905_v60 = vsel %vm1901_vm12, %v1896_v53, %v1898_v57 }
  0xfa   :  { %3593 = vrot.lane.b32.xlu0 %v11235_v2, %s11181_s24  ;;  %9045 = vmatprep.subr.msk.bf16.mxu0 %vm71_vm1, %v1905_v60  ;;  %v1906_v62 = vsel %vm1901_vm12, %v1898_v57, %v1900_v59 }
  0xfb   :  { %3595 = vrot.lane.b32.xlu1 %v11241_v4, %s11181_s24  ;;  %v1923_v6 = vsel %vm71_vm1, %v1906_v62, 0 }
  0xfc   :  { %9039 = vmatmul.mubr.msk.bf16.vlgmr.msra.gmra.mxu1 %vm67_vm2, %v9035_v51  ;;  %v2060_v63 = vpop.permute.xlu0 %2059 }
  0xfd   :  { %1943 = vmatpush1.bf16.msra.mxu1 %v1911_v58  ;;  %v2062_v0 = vpop.permute.xlu1 %2061  ;;  %1960 = vmatprep.mubr.bf16.mxu1 %v11161_v7 }
  0xfe   :  { %3597 = vrot.lane.b32.xlu0 %v11255_v9, %s11181_s24  ;;  %9047 = vmatprep.subr.msk.bf16.mxu1 %vm71_vm1, %v1900_v59  ;;  %v2072_v13 = vsel %vm2071_vm13, %v2060_v63, %v2062_v0 }
  0xff   :  { %3599 = vrot.lane.b32.xlu1 %v11253_v8, %s11181_s24  ;;  %v2081_v15 = vsel %vm71_vm1, %v2072_v13, 0 }
 0x100   :  { %9041 = vmatmul.mubr.msk.bf16.vlgmr.msra.gmra.mxu0 %vm67_vm2, %v9035_v51  ;;  %v2064_v10 = vpop.permute.xlu0 %2063 }
 0x101   :  { %1984 = vmatpush1.bf16.msra.mxu0 %v1917_v61  ;;  %v2066_v11 = vpop.permute.xlu1 %2065  ;;  %2001 = vmatprep.mubr.bf16.mxu0 %v11161_v7  ;;  %v2073_v12 = vsel %vm2071_vm13, %v2062_v0, %v2064_v10 }
 0x102   :  { %3759 = vrot.lane.b32.xlu0 %v11237_v3, %s11182_s27  ;;  %9050 = vmatprep.subr.msk.bf16.mxu0 %vm71_vm1, %v2073_v12  ;;  %v2074_v18 = vsel %vm2071_vm13, %v2064_v10, %v2066_v11 }
 0x103   :  { %3761 = vrot.lane.b32.xlu1 %v11243_v5, %s11182_s27 }
 0x104   :  { %9044 = vmatmul.mubr.msk.bf16.vlgmr.msra.gmra.mxu1 %vm67_vm2, %v9042_v1  ;;  %v2068_v14 = vpop.permute.xlu0 %2067 }
 0x105   :  { %2025 = vmatpush1.bf16.msra.mxu1 %v1923_v6  ;;  %v2070_v16 = vpop.permute.xlu1 %2069  ;;  %2042 = vmatprep.mubr.bf16.mxu1 %v11161_v7  ;;  %v2075_v17 = vsel %vm2071_vm13, %v2066_v11, %v2068_v14 }
 0x106   :  { %3763 = vrot.lane.b32.xlu0 %v11235_v2, %s11182_s27  ;;  %9052 = vmatprep.subr.msk.bf16.mxu1 %vm71_vm1, %v2075_v17 }
 0x107   :  { %3765 = vrot.lane.b32.xlu1 %v11241_v4, %s11182_s27 }
 0x108   :  { %9046 = vmatmul.mubr.msk.bf16.vlgmr.msra.gmra.mxu0 %vm67_vm2, %v9042_v1  ;;  %v2230_v19 = vpop.permute.xlu0 %2229 }
 0x109   :  { %12 = vsyncpa [#allocation4], 0  ;;  %2113 = vmatpush1.bf16.msra.mxu0 %v2081_v15  ;;  %v2232_v20 = vpop.permute.xlu1 %2231  ;;  %2130 = vmatprep.mubr.bf16.mxu0 %v11161_v7  ;;  %v2087_v21 = vsel %vm71_vm1, %v2074_v18, 0  ;;  %vm2241_vm14 = vcmask 728064   ;;  %v2076_v22 = vsel %vm2071_vm13, %v2068_v14, %v2070_v16  ;;  %v9049_v24 = vld [vmem:[%s13441_s1 + $0x30] sm:$0xf] }
 0x10a   :  { %3767 = vrot.lane.b32.xlu0 %v11255_v9, %s11182_s27  ;;  %9054 = vmatprep.subr.msk.bf16.mxu0 %vm71_vm1, %v2070_v16  ;;  %v2093_v27 = vsel %vm71_vm1, %v2076_v22, 0  ;;  %s11183_s30 = smov 53   ;;  %v2242_v28 = vsel %vm2241_vm14, %v2230_v19, %v2232_v20  ;;  %vm2411_vm15 = vcmask 719872   ;;  %v9056_v39 = vld [vmem:[%s13441_s1 + $0x34] sm:$0xf]  ;;  %s11184_s9 = smov 52  }
 0x10b   :  { %3769 = vrot.lane.b32.xlu1 %v11253_v8, %s11182_s27  ;;  %v2251_v32 = vsel %vm71_vm1, %v2242_v28, 0  ;;  %vm2581_vm0 = vcmask 605184   ;;  %v9063_v50 = vld [vmem:[%s13441_s1 + $0x38] sm:$0xf]  ;;  %vm2751_vm3 = vcmask 596992   ;;  %vm2921_vm4 = vcmask 588800  }
 0x10c   :  { %9048 = vmatmul.mubr.msk.bf16.vlgmr.msra.gmra.mxu1 %vm67_vm2, %v9042_v1  ;;  %v2234_v23 = vpop.permute.xlu0 %2233  ;;  %v9070_v63 = vld [vmem:[%s13441_s1 + $0x3c] sm:$0xf]  ;;  %vm3091_vm5 = vcmask 580608   ;;  %vm3261_vm6 = vcmask 572416   ;;  %vm3431_vm7 = vcmask 457728   ;;  %vm3601_vm8 = vcmask 449536  }
 0x10d   :  { %2154 = vmatpush1.bf16.msra.mxu1 %v2087_v21  ;;  %v2236_v25 = vpop.permute.xlu1 %2235  ;;  %2171 = vmatprep.mubr.bf16.mxu1 %v11161_v7  ;;  %v2243_v26 = vsel %vm2241_vm14, %v2232_v20, %v2234_v23  ;;  %v9077_v21 = vld [vmem:[%s13441_s1 + $0x40] sm:$0xf]  ;;  %vm3771_vm9 = vcmask 441344   ;;  %vm3941_vm10 = vcmask 433152   ;;  %vm4111_vm11 = vcmask 424960   ;;  %s11187_s14 = smov 60  }
 0x10e   :  { %3929 = vrot.lane.b32.xlu0 %v11237_v3, %s11183_s30  ;;  %9057 = vmatprep.subr.msk.bf16.mxu1 %vm71_vm1, %v2243_v26  ;;  %v2244_v33 = vsel %vm2241_vm14, %v2234_v23, %v2236_v25  ;;  %vm11186_vm12 = vmmov 0   ;;  %vm4544_vm13 = vcmask 556032  }
 0x10f   :  { %3931 = vrot.lane.b32.xlu1 %v11243_v5, %s11183_s30  ;;  %v2257_v36 = vsel %vm71_vm1, %v2244_v33, 0 }
 0x110   :  { %9051 = vmatmul.mubr.msk.bf16.vlgmr.msra.gmra.mxu0 %vm67_vm2, %v9049_v24  ;;  %v2238_v29 = vpop.permute.xlu0 %2237 }
 0x111   :  { %2195 = vmatpush1.bf16.msra.mxu0 %v2093_v27  ;;  %v2240_v30 = vpop.permute.xlu1 %2239  ;;  %2212 = vmatprep.mubr.bf16.mxu0 %v11161_v7  ;;  %v2245_v31 = vsel %vm2241_vm14, %v2236_v25, %v2238_v29 }
 0x112   :  { %3933 = vrot.lane.b32.xlu0 %v11235_v2, %s11183_s30  ;;  %9059 = vmatprep.subr.msk.bf16.mxu0 %vm71_vm1, %v2245_v31  ;;  %v2246_v37 = vsel %vm2241_vm14, %v2238_v29, %v2240_v30  ;;  %vm6494_vm14 = vcmask 261120  }
 0x113   :  { %3935 = vrot.lane.b32.xlu1 %v11241_v4, %s11183_s30  ;;  %v2263_v42 = vsel %vm71_vm1, %v2246_v37, 0 }
 0x114   :  { %9053 = vmatmul.mubr.msk.bf16.vlgmr.msra.gmra.mxu1 %vm67_vm2, %v9049_v24  ;;  %v2400_v34 = vpop.permute.xlu0 %2399 }
 0x115   :  { %2283 = vmatpush1.bf16.msra.mxu1 %v2251_v32  ;;  %v2402_v35 = vpop.permute.xlu1 %2401  ;;  %2300 = vmatprep.mubr.bf16.mxu1 %v11161_v7 }
 0x116   :  { %3937 = vrot.lane.b32.xlu0 %v11255_v9, %s11183_s30  ;;  %9061 = vmatprep.subr.msk.bf16.mxu1 %vm71_vm1, %v2240_v30  ;;  %v2412_v43 = vsel %vm2411_vm15, %v2400_v34, %v2402_v35 }
 0x117   :  { %3939 = vrot.lane.b32.xlu1 %v11253_v8, %s11183_s30  ;;  %v2421_v47 = vsel %vm71_vm1, %v2412_v43, 0  ;;  %v9084_v43 = vld [vmem:[%s13441_s1 + $0x44] sm:$0xf] }
 0x118   :  { %9055 = vmatmul.mubr.msk.bf16.vlgmr.msra.gmra.mxu0 %vm67_vm2, %v9049_v24  ;;  %v2404_v38 = vpop.permute.xlu0 %2403 }
 0x119   :  { %2324 = vmatpush1.bf16.msra.mxu0 %v2257_v36  ;;  %v2413_v40 = vsel %vm2411_vm15, %v2402_v35, %v2404_v38  ;;  %v2406_v41 = vpop.permute.xlu1 %2405  ;;  %2341 = vmatprep.mubr.bf16.mxu0 %v11161_v7 }
 0x11a   :  { %4099 = vrot.lane.b32.xlu0 %v11237_v3, %s11184_s9  ;;  %9064 = vmatprep.subr.msk.bf16.mxu0 %vm71_vm1, %v2413_v40  ;;  %v2414_v3 = vsel %vm2411_vm15, %v2404_v38, %v2406_v41 }
 0x11b   :  { %4101 = vrot.lane.b32.xlu1 %v11243_v5, %s11184_s9  ;;  %v2427_v49 = vsel %vm71_vm1, %v2414_v3, 0 }
 0x11c   :  { %9058 = vmatmul.mubr.msk.bf16.vlgmr.msra.gmra.mxu1 %vm67_vm2, %v9056_v39  ;;  %v2408_v44 = vpop.permute.xlu0 %2407 }
 0x11d   :  { %2365 = vmatpush1.bf16.msra.mxu1 %v2263_v42  ;;  %v2415_v45 = vsel %vm2411_vm15, %v2406_v41, %v2408_v44  ;;  %v2410_v46 = vpop.permute.xlu1 %2409  ;;  %2382 = vmatprep.mubr.bf16.mxu1 %v11161_v7 }
 0x11e   :  { %4103 = vrot.lane.b32.xlu0 %v11235_v2, %s11184_s9  ;;  %9066 = vmatprep.subr.msk.bf16.mxu1 %vm71_vm1, %v2415_v45  ;;  %v2416_v2 = vsel %vm2411_vm15, %v2408_v44, %v2410_v46  ;;  %vm6538_vm15 = vcmask 73728  }
 0x11f   :  { %4105 = vrot.lane.b32.xlu1 %v11241_v4, %s11184_s9 }
 0x120   :  { %9060 = vmatmul.mubr.msk.bf16.vlgmr.msra.gmra.mxu0 %vm67_vm2, %v9056_v39  ;;  %v2570_v5 = vpop.permute.xlu0 %2569 }
 0x121   :  { %2453 = vmatpush1.bf16.msra.mxu0 %v2421_v47  ;;  %v2572_v48 = vpop.permute.xlu1 %2571  ;;  %2470 = vmatprep.mubr.bf16.mxu0 %v11161_v7 }
 0x122   :  { %4107 = vrot.lane.b32.xlu0 %v11255_v9, %s11184_s9  ;;  %9068 = vmatprep.subr.msk.bf16.mxu0 %vm71_vm1, %v2410_v46  ;;  %v2433_v9 = vsel %vm71_vm1, %v2416_v2, 0  ;;  %v2582_v53 = vsel %vm2581_vm0, %v2570_v5, %v2572_v48 }
 0x123   :  { %4109 = vrot.lane.b32.xlu1 %v11253_v8, %s11184_s9  ;;  %v2591_v56 = vsel %vm71_vm1, %v2582_v53, 0 }
 0x124   :  { %9062 = vmatmul.mubr.msk.bf16.vlgmr.msra.gmra.mxu1 %vm67_vm2, %v9056_v39  ;;  %v2574_v4 = vpop.permute.xlu0 %2573 }
 0x125   :  { %2494 = vmatpush1.bf16.msra.mxu1 %v2427_v49  ;;  %v2583_v51 = vsel %vm2581_vm0, %v2572_v48, %v2574_v4  ;;  %v2576_v52 = vpop.permute.xlu1 %2575  ;;  %2511 = vmatprep.mubr.bf16.mxu1 %v11161_v7 }
 0x126   :  { %9071 = vmatprep.subr.msk.bf16.mxu1 %vm71_vm1, %v2583_v51  ;;  %v2584_v57 = vsel %vm2581_vm0, %v2574_v4, %v2576_v52 }
 0x127   :  { %v2597_v60 = vsel %vm71_vm1, %v2584_v57, 0 }
 0x128   :  { %9065 = vmatmul.mubr.msk.bf16.vlgmr.msra.gmra.mxu0 %vm67_vm2, %v9063_v50  ;;  %v2578_v8 = vpop.permute.xlu0 %2577 }
 0x129   :  { %2535 = vmatpush1.bf16.msra.mxu0 %v2433_v9  ;;  %v2585_v54 = vsel %vm2581_vm0, %v2576_v52, %v2578_v8  ;;  %v2580_v55 = vpop.permute.xlu1 %2579  ;;  %2552 = vmatprep.mubr.bf16.mxu0 %v11161_v7 }
 0x12a   :  { %9073 = vmatprep.subr.msk.bf16.mxu0 %vm71_vm1, %v2585_v54  ;;  %v2586_v61 = vsel %vm2581_vm0, %v2578_v8, %v2580_v55 }
 0x12b   :  { %v2603_v6 = vsel %vm71_vm1, %v2586_v61, 0 }
 0x12c   :  { %9067 = vmatmul.mubr.msk.bf16.vlgmr.msra.gmra.mxu1 %vm67_vm2, %v9063_v50  ;;  %v2740_v58 = vpop.permute.xlu0 %2739 }
 0x12d   :  { %2623 = vmatpush1.bf16.msra.mxu1 %v2591_v56  ;;  %v2742_v59 = vpop.permute.xlu1 %2741  ;;  %2640 = vmatprep.mubr.bf16.mxu1 %v11161_v7 }
 0x12e   :  { %9075 = vmatprep.subr.msk.bf16.mxu1 %vm71_vm1, %v2580_v55  ;;  %v2752_v10 = vsel %vm2751_vm3, %v2740_v58, %v2742_v59 }
 0x12f   :  { %v2761_v14 = vsel %vm71_vm1, %v2752_v10, 0 }
 0x130   :  { %9069 = vmatmul.mubr.msk.bf16.vlgmr.msra.gmra.mxu0 %vm67_vm2, %v9063_v50  ;;  %v2744_v62 = vpop.permute.xlu0 %2743 }
 0x131   :  { %2664 = vmatpush1.bf16.msra.mxu0 %v2597_v60  ;;  %v2753_v0 = vsel %vm2751_vm3, %v2742_v59, %v2744_v62  ;;  %v2746_v1 = vpop.permute.xlu1 %2745  ;;  %2681 = vmatprep.mubr.bf16.mxu0 %v11161_v7 }
 0x132   :  { %9078 = vmatprep.subr.msk.bf16.mxu0 %vm71_vm1, %v2753_v0  ;;  %v2754_v15 = vsel %vm2751_vm3, %v2744_v62, %v2746_v1 }
 0x133   :  { %v2767_v18 = vsel %vm71_vm1, %v2754_v15, 0 }
 0x134   :  { %9072 = vmatmul.mubr.msk.bf16.vlgmr.msra.gmra.mxu1 %vm67_vm2, %v9070_v63  ;;  %v2748_v11 = vpop.permute.xlu0 %2747 }
 0x135   :  { %2705 = vmatpush1.bf16.msra.mxu1 %v2603_v6  ;;  %v2755_v12 = vsel %vm2751_vm3, %v2746_v1, %v2748_v11  ;;  %v2750_v13 = vpop.permute.xlu1 %2749  ;;  %2722 = vmatprep.mubr.bf16.mxu1 %v11161_v7 }
 0x136   :  { %9080 = vmatprep.subr.msk.bf16.mxu1 %vm71_vm1, %v2755_v12  ;;  %v2756_v19 = vsel %vm2751_vm3, %v2748_v11, %v2750_v13  ;;  %v9091_v12 = vld [vmem:[%s13441_s1 + $0x48] sm:$0xf] }
 0x137   :  { %v2773_v24 = vsel %vm71_vm1, %v2756_v19, 0 }
 0x138   :  { %9074 = vmatmul.mubr.msk.bf16.vlgmr.msra.gmra.mxu0 %vm67_vm2, %v9070_v63  ;;  %v2910_v16 = vpop.permute.xlu0 %2909 }
 0x139   :  { %2793 = vmatpush1.bf16.msra.mxu0 %v2761_v14  ;;  %v2912_v17 = vpop.permute.xlu1 %2911  ;;  %2810 = vmatprep.mubr.bf16.mxu0 %v11161_v7 }
 0x13a   :  { %9082 = vmatprep.subr.msk.bf16.mxu0 %vm71_vm1, %v2750_v13  ;;  %v2922_v25 = vsel %vm2921_vm4, %v2910_v16, %v2912_v17 }
 0x13b   :  { %v2931_v30 = vsel %vm71_vm1, %v2922_v25, 0 }
 0x13c   :  { %9076 = vmatmul.mubr.msk.bf16.vlgmr.msra.gmra.mxu1 %vm67_vm2, %v9070_v63  ;;  %v2914_v20 = vpop.permute.xlu0 %2913 }
 0x13d   :  { %2834 = vmatpush1.bf16.msra.mxu1 %v2767_v18  ;;  %v2923_v22 = vsel %vm2921_vm4, %v2912_v17, %v2914_v20  ;;  %v2916_v23 = vpop.permute.xlu1 %2915  ;;  %2851 = vmatprep.mubr.bf16.mxu1 %v11161_v7 }
 0x13e   :  { %9085 = vmatprep.subr.msk.bf16.mxu1 %vm71_vm1, %v2923_v22  ;;  %v2924_v32 = vsel %vm2921_vm4, %v2914_v20, %v2916_v23 }
 0x13f   :  { %v2937_v37 = vsel %vm71_vm1, %v2924_v32, 0 }
 0x140   :  { %v124_v26 = vpop.f32.mrf.mxu0  ;;  %9079 = vmatmul.mubr.msk.bf16.vlgmr.msra.gmra.mxu0 %vm67_vm2, %v9077_v21  ;;  %v2918_v27 = vpop.permute.xlu0 %2917 }
 0x141   :  { %2875 = vmatpush1.bf16.msra.mxu0 %v2773_v24  ;;  %v2925_v28 = vsel %vm2921_vm4, %v2916_v23, %v2918_v27  ;;  %v2920_v29 = vpop.permute.xlu1 %2919  ;;  %2892 = vmatprep.mubr.bf16.mxu0 %v11161_v7 }
 0x142   :  { %v126_v31 = vpop.f32.mrf.mxu0  ;;  %9087 = vmatprep.subr.msk.bf16.mxu0 %vm71_vm1, %v2925_v28  ;;  %v2926_v40 = vsel %vm2921_vm4, %v2918_v27, %v2920_v29 }
 0x143   :  { %v2943_v46 = vsel %vm71_vm1, %v2926_v40, 0 }
 0x144   :  { %v128_v33 = vpop.f32.mrf.mxu0  ;;  %v165_v34 = vpop.f32.mrf.mxu1  ;;  %9081 = vmatmul.mubr.msk.bf16.vlgmr.msra.gmra.mxu1 %vm67_vm2, %v9077_v21 }
 0x145   :  { %2963 = vmatpush1.bf16.msra.mxu1 %v2931_v30  ;;  %v3080_v35 = vpop.permute.xlu0 %3079  ;;  %v3082_v36 = vpop.permute.xlu1 %3081  ;;  %2980 = vmatprep.mubr.bf16.mxu1 %v11161_v7 }
 0x146   :  { %v129_v38 = vpop.f32.mrf.mxu0  ;;  %v167_v39 = vpop.f32.mrf.mxu1  ;;  %9089 = vmatprep.subr.msk.bf16.mxu1 %vm71_vm1, %v2920_v29  ;;  %v3092_v48 = vsel %vm3091_vm5, %v3080_v35, %v3082_v36 }
 0x147   :  { %v3101_v52 = vsel %vm71_vm1, %v3092_v48, 0 }
 0x148   :  { %v169_v41 = vpop.f32.mrf.mxu1  ;;  %v206_v42 = vpop.f32.mrf.mxu0  ;;  %9083 = vmatmul.mubr.msk.bf16.vlgmr.msra.gmra.mxu0 %vm67_vm2, %v9077_v21 }
 0x149   :  { %3004 = vmatpush1.bf16.msra.mxu0 %v2937_v37  ;;  %v3084_v44 = vpop.permute.xlu0 %3083  ;;  %v3086_v45 = vpop.permute.xlu1 %3085  ;;  %3021 = vmatprep.mubr.bf16.mxu0 %v11161_v7 }
 0x14a   :  { %v170_v47 = vpop.f32.mrf.mxu1  ;;  %v208_v3 = vpop.f32.mrf.mxu0  ;;  %v3093_v5 = vsel %vm3091_vm5, %v3082_v36, %v3084_v44  ;;  %v3094_v54 = vsel %vm3091_vm5, %v3084_v44, %v3086_v45 }
 0x14b   :  { %9092 = vmatprep.subr.msk.bf16.mxu0 %vm71_vm1, %v3093_v5  ;;  %v3107_v61 = vsel %vm71_vm1, %v3094_v54, 0 }
 0x14c   :  { %v210_v49 = vpop.f32.mrf.mxu0  ;;  %v268_v2 = vpop.f32.mrf.mxu1  ;;  %9086 = vmatmul.mubr.msk.bf16.vlgmr.msra.gmra.mxu1 %vm67_vm2, %v9084_v43 }
 0x14d   :  { %v269_v4 = vadd.f32 %v268_v2, %v124_v26  ;;  %3045 = vmatpush1.bf16.msra.mxu1 %v2943_v46  ;;  %v3088_v50 = vpop.permute.xlu0 %3087  ;;  %v3090_v51 = vpop.permute.xlu1 %3089  ;;  %3062 = vmatprep.mubr.bf16.mxu1 %v11161_v7 }
 0x14e   :  { %v211_v9 = vpop.f32.mrf.mxu0  ;;  %v270_v53 = vpop.f32.mrf.mxu1  ;;  %v3095_v8 = vsel %vm3091_vm5, %v3086_v45, %v3088_v50  ;;  %v3096_v0 = vsel %vm3091_vm5, %v3088_v50, %v3090_v51  ;;  %v9098_v45 = vld [vmem:[%s13441_s1 + $0x4c] sm:$0xf] }
 0x14f   :  { %v271_v55 = vadd.f32 %v270_v53, %v126_v31  ;;  %9094 = vmatprep.subr.msk.bf16.mxu1 %vm71_vm1, %v3095_v8  ;;  %v3113_v15 = vsel %vm71_vm1, %v3096_v0, 0 }
 0x150   :  { %v272_v56 = vpop.f32.mrf.mxu1  ;;  %v309_v57 = vpop.f32.mrf.mxu0  ;;  %9088 = vmatmul.mubr.msk.bf16.vlgmr.msra.gmra.mxu0 %vm67_vm2, %v9084_v43 }
 0x151   :  { %v310_v58 = vadd.f32 %v309_v57, %v165_v34  ;;  %3133 = vmatpush1.bf16.msra.mxu0 %v3101_v52  ;;  %v3250_v59 = vpop.permute.xlu0 %3249  ;;  %v3252_v60 = vpop.permute.xlu1 %3251  ;;  %3150 = vmatprep.mubr.bf16.mxu0 %v11161_v7  ;;  %v4267_v57 = vld [vmem:[%s13442_s2] sm:$0xff] }
 0x152   :  { %v273_v62 = vpop.f32.mrf.mxu1  ;;  %v311_v63 = vpop.f32.mrf.mxu0  ;;  %9096 = vmatprep.subr.msk.bf16.mxu0 %vm71_vm1, %v3090_v51  ;;  %v3262_v19 = vsel %vm3261_vm6, %v3250_v59, %v3252_v60  ;;  %4270 = vperm.xlu0 %10793, %v4267_v57  }
 0x153   :  { %v312_v1 = vadd.f32 %v311_v63, %v167_v39  ;;  %v3271_v26 = vsel %vm71_vm1, %v3262_v19, 0 }
 0x154   :  { %v313_v6 = vpop.f32.mrf.mxu0  ;;  %v350_v10 = vpop.f32.mrf.mxu1  ;;  %9090 = vmatmul.mubr.msk.bf16.vlgmr.msra.gmra.mxu1 %vm67_vm2, %v9084_v43 }
 0x155   :  { %v351_v11 = vadd.f32 %v350_v10, %v206_v42  ;;  %3174 = vmatpush1.bf16.msra.mxu1 %v3107_v61  ;;  %v3254_v13 = vpop.permute.xlu0 %3253  ;;  %v3256_v14 = vpop.permute.xlu1 %3255  ;;  %3191 = vmatprep.mubr.bf16.mxu1 %v11161_v7 }
 0x156   :  { %v314_v16 = vpop.f32.mrf.mxu0  ;;  %v352_v17 = vpop.f32.mrf.mxu1  ;;  %v3263_v18 = vsel %vm3261_vm6, %v3252_v60, %v3254_v13  ;;  %v3264_v30 = vsel %vm3261_vm6, %v3254_v13, %v3256_v14 }
 0x157   :  { %v353_v20 = vadd.f32 %v352_v17, %v208_v3  ;;  %9099 = vmatprep.subr.msk.bf16.mxu1 %vm71_vm1, %v3263_v18  ;;  %v3277_v37 = vsel %vm71_vm1, %v3264_v30, 0  ;;  %v9105_v16 = vld [vmem:[%s13441_s1 + $0x50] sm:$0xf] }
 0x158   :  { %v354_v21 = vpop.f32.mrf.mxu1  ;;  %v432_v22 = vpop.f32.mrf.mxu0  ;;  %9093 = vmatmul.mubr.msk.bf16.vlgmr.msra.gmra.mxu0 %vm67_vm2, %v9091_v12 }
 0x159   :  { %v521_v23 = vadd.f32 %v432_v22, %v269_v4  ;;  %3215 = vmatpush1.bf16.msra.mxu0 %v3113_v15  ;;  %v3258_v24 = vpop.permute.xlu0 %3257  ;;  %v3260_v25 = vpop.permute.xlu1 %3259  ;;  %3232 = vmatprep.mubr.bf16.mxu0 %v11161_v7 }
 0x15a   :  { %v355_v27 = vpop.f32.mrf.mxu1  ;;  %v434_v28 = vpop.f32.mrf.mxu0  ;;  %v3265_v29 = vsel %vm3261_vm6, %v3256_v14, %v3258_v24  ;;  %v3266_v40 = vsel %vm3261_vm6, %v3258_v24, %v3260_v25 }
 0x15b   :  { %v522_v31 = vadd.f32 %v434_v28, %v271_v55  ;;  %9101 = vmatprep.subr.msk.bf16.mxu0 %vm71_vm1, %v3265_v29  ;;  %v3283_v3 = vsel %vm71_vm1, %v3266_v40, 0 }
 0x15c   :  { %v436_v32 = vpop.f32.mrf.mxu0  ;;  %v473_v33 = vpop.f32.mrf.mxu1  ;;  %9095 = vmatmul.mubr.msk.bf16.vlgmr.msra.gmra.mxu1 %vm67_vm2, %v9091_v12 }
 0x15d   :  { %v523_v34 = vadd.f32 %v473_v33, %v310_v58  ;;  %3303 = vmatpush1.bf16.msra.mxu1 %v3271_v26  ;;  %v3420_v35 = vpop.permute.xlu0 %3419  ;;  %v3422_v36 = vpop.permute.xlu1 %3421  ;;  %3320 = vmatprep.mubr.bf16.mxu1 %v11161_v7 }
 0x15e   :  { %v437_v38 = vpop.f32.mrf.mxu0  ;;  %v475_v39 = vpop.f32.mrf.mxu1  ;;  %9103 = vmatprep.subr.msk.bf16.mxu1 %vm71_vm1, %v3260_v25  ;;  %v3432_v2 = vsel %vm3431_vm7, %v3420_v35, %v3422_v36 }
 0x15f   :  { %v524_v41 = vadd.f32 %v475_v39, %v312_v1  ;;  %v3441_v8 = vsel %vm71_vm1, %v3432_v2, 0 }
 0x160   :  { %v477_v42 = vpop.f32.mrf.mxu1  ;;  %v514_v43 = vpop.f32.mrf.mxu0  ;;  %9097 = vmatmul.mubr.msk.bf16.vlgmr.msra.gmra.mxu0 %vm67_vm2, %v9091_v12 }
 0x161   :  { %v525_v44 = vadd.f32 %v514_v43, %v351_v11  ;;  %3344 = vmatpush1.bf16.msra.mxu0 %v3277_v37  ;;  %v3424_v46 = vpop.permute.xlu0 %3423  ;;  %v3426_v47 = vpop.permute.xlu1 %3425  ;;  %3361 = vmatprep.mubr.bf16.mxu0 %v11161_v7 }
 0x162   :  { %v478_v5 = vpop.f32.mrf.mxu1  ;;  %v516_v48 = vpop.f32.mrf.mxu0  ;;  %v3433_v49 = vsel %vm3431_vm7, %v3422_v36, %v3424_v46  ;;  %v3434_v58 = vsel %vm3431_vm7, %v3424_v46, %v3426_v47 }
 0x163   :  { %v526_v4 = vadd.f32 %v516_v48, %v353_v20  ;;  %9106 = vmatprep.subr.msk.bf16.mxu0 %vm71_vm1, %v3433_v49  ;;  %v3447_v1 = vsel %vm71_vm1, %v3434_v58, 0  ;;  %v9112_v5 = vld [vmem:[%s13441_s1 + $0x54] sm:$0xf] }
 0x164   :  { %v518_v50 = vpop.f32.mrf.mxu0  ;;  %v602_v51 = vpop.f32.mrf.mxu1  ;;  %9100 = vmatmul.mubr.msk.bf16.vlgmr.msra.gmra.mxu1 %vm67_vm2, %v9098_v45 }
 0x165   :  { %v691_v52 = vadd.f32 %v602_v51, %v521_v23  ;;  %3385 = vmatpush1.bf16.msra.mxu1 %v3283_v3  ;;  %v3428_v9 = vpop.permute.xlu0 %3427  ;;  %v3430_v53 = vpop.permute.xlu1 %3429  ;;  %3402 = vmatprep.mubr.bf16.mxu1 %v11161_v7 }
 0x166   :  { %v519_v54 = vpop.f32.mrf.mxu0  ;;  %v604_v55 = vpop.f32.mrf.mxu1  ;;  %v3435_v56 = vsel %vm3431_vm7, %v3426_v47, %v3428_v9  ;;  %v3436_v11 = vsel %vm3431_vm7, %v3428_v9, %v3430_v53 }
 0x167   :  { %v692_v59 = vadd.f32 %v604_v55, %v522_v31  ;;  %9108 = vmatprep.subr.msk.bf16.mxu1 %vm71_vm1, %v3435_v56  ;;  %v3453_v19 = vsel %vm71_vm1, %v3436_v11, 0 }
 0x168   :  { %v606_v60 = vpop.f32.mrf.mxu1  ;;  %v643_v61 = vpop.f32.mrf.mxu0  ;;  %9102 = vmatmul.mubr.msk.bf16.vlgmr.msra.gmra.mxu0 %vm67_vm2, %v9098_v45 }
 0x169   :  { %v693_v62 = vadd.f32 %v643_v61, %v523_v34  ;;  %3473 = vmatpush1.bf16.msra.mxu0 %v3441_v8  ;;  %v3590_v63 = vpop.permute.xlu0 %3589  ;;  %v3592_v0 = vpop.permute.xlu1 %3591  ;;  %3490 = vmatprep.mubr.bf16.mxu0 %v11161_v7 }
 0x16a   :  { %v607_v6 = vpop.f32.mrf.mxu1  ;;  %v645_v10 = vpop.f32.mrf.mxu0  ;;  %9110 = vmatprep.subr.msk.bf16.mxu0 %vm71_vm1, %v3430_v53  ;;  %v3602_v23 = vsel %vm3601_vm8, %v3590_v63, %v3592_v0 }
 0x16b   :  { %v694_v12 = vadd.f32 %v645_v10, %v524_v41  ;;  %v3611_v30 = vsel %vm71_vm1, %v3602_v23, 0 }
 0x16c   :  { %v647_v13 = vpop.f32.mrf.mxu0  ;;  %v684_v14 = vpop.f32.mrf.mxu1  ;;  %9104 = vmatmul.mubr.msk.bf16.vlgmr.msra.gmra.mxu1 %vm67_vm2, %v9098_v45 }
 0x16d   :  { %v695_v15 = vadd.f32 %v684_v14, %v525_v44  ;;  %3514 = vmatpush1.bf16.msra.mxu1 %v3447_v1  ;;  %v3594_v17 = vpop.permute.xlu0 %3593  ;;  %v3596_v18 = vpop.permute.xlu1 %3595  ;;  %3531 = vmatprep.mubr.bf16.mxu1 %v11161_v7 }
 0x16e   :  { %v648_v20 = vpop.f32.mrf.mxu0  ;;  %v686_v21 = vpop.f32.mrf.mxu1  ;;  %v3603_v22 = vsel %vm3601_vm8, %v3592_v0, %v3594_v17  ;;  %v3604_v34 = vsel %vm3601_vm8, %v3594_v17, %v3596_v18 }
 0x16f   :  { %v696_v24 = vadd.f32 %v686_v21, %v526_v4  ;;  %9113 = vmatprep.subr.msk.bf16.mxu1 %vm71_vm1, %v3603_v22  ;;  %v3617_v41 = vsel %vm71_vm1, %v3604_v34, 0 }
 0x170   :  { %v688_v25 = vpop.f32.mrf.mxu1  ;;  %v772_v26 = vpop.f32.mrf.mxu0  ;;  %9107 = vmatmul.mubr.msk.bf16.vlgmr.msra.gmra.mxu0 %vm67_vm2, %v9105_v16 }
 0x171   :  { %v861_v27 = vadd.f32 %v772_v26, %v691_v52  ;;  %3555 = vmatpush1.bf16.msra.mxu0 %v3453_v19  ;;  %v3598_v28 = vpop.permute.xlu0 %3597  ;;  %v3600_v29 = vpop.permute.xlu1 %3599  ;;  %3572 = vmatprep.mubr.bf16.mxu0 %v11161_v7  ;;  %v9119_v19 = vld [vmem:[%s13441_s1 + $0x58] sm:$0xf] }
 0x172   :  { %v689_v31 = vpop.f32.mrf.mxu1  ;;  %v774_v32 = vpop.f32.mrf.mxu0  ;;  %v3605_v33 = vsel %vm3601_vm8, %v3596_v18, %v3598_v28  ;;  %v3606_v44 = vsel %vm3601_vm8, %v3598_v28, %v3600_v29 }
 0x173   :  { %v862_v35 = vadd.f32 %v774_v32, %v692_v59  ;;  %9115 = vmatprep.subr.msk.bf16.mxu0 %vm71_vm1, %v3605_v33  ;;  %v3623_v2 = vsel %vm71_vm1, %v3606_v44, 0 }
 0x174   :  { %v776_v36 = vpop.f32.mrf.mxu0  ;;  %v813_v37 = vpop.f32.mrf.mxu1  ;;  %9109 = vmatmul.mubr.msk.bf16.vlgmr.msra.gmra.mxu1 %vm67_vm2, %v9105_v16 }
 0x175   :  { %v863_v38 = vadd.f32 %v813_v37, %v693_v62  ;;  %3643 = vmatpush1.bf16.msra.mxu1 %v3611_v30  ;;  %v3760_v39 = vpop.permute.xlu0 %3759  ;;  %v3762_v40 = vpop.permute.xlu1 %3761  ;;  %3660 = vmatprep.mubr.bf16.mxu1 %v11161_v7 }
 0x176   :  { %v777_v42 = vpop.f32.mrf.mxu0  ;;  %v815_v43 = vpop.f32.mrf.mxu1  ;;  %9117 = vmatprep.subr.msk.bf16.mxu1 %vm71_vm1, %v3600_v29  ;;  %v3772_v52 = vsel %vm3771_vm9, %v3760_v39, %v3762_v40 }
 0x177   :  { %v864_v45 = vadd.f32 %v815_v43, %v694_v12  ;;  %v3781_v57 = vsel %vm71_vm1, %v3772_v52, 0 }
 0x178   :  { %v817_v46 = vpop.f32.mrf.mxu1  ;;  %v854_v47 = vpop.f32.mrf.mxu0  ;;  %9111 = vmatmul.mubr.msk.bf16.vlgmr.msra.gmra.mxu0 %vm67_vm2, %v9105_v16 }
 0x179   :  { %v865_v3 = vadd.f32 %v854_v47, %v695_v15  ;;  %3684 = vmatpush1.bf16.msra.mxu0 %v3617_v41  ;;  %v3764_v48 = vpop.permute.xlu0 %3763  ;;  %v3766_v49 = vpop.permute.xlu1 %3765  ;;  %3701 = vmatprep.mubr.bf16.mxu0 %v11161_v7 }
 0x17a   :  { %v818_v4 = vpop.f32.mrf.mxu1  ;;  %v856_v50 = vpop.f32.mrf.mxu0  ;;  %v3773_v51 = vsel %vm3771_vm9, %v3762_v40, %v3764_v48  ;;  %v3774_v61 = vsel %vm3771_vm9, %v3764_v48, %v3766_v49 }
 0x17b   :  { %v866_v9 = vadd.f32 %v856_v50, %v696_v24  ;;  %9120 = vmatprep.subr.msk.bf16.mxu0 %vm71_vm1, %v3773_v51  ;;  %v3787_v11 = vsel %vm71_vm1, %v3774_v61, 0 }
 0x17c   :  { %v858_v53 = vpop.f32.mrf.mxu0  ;;  %v942_v8 = vpop.f32.mrf.mxu1  ;;  %9114 = vmatmul.mubr.msk.bf16.vlgmr.msra.gmra.mxu1 %vm67_vm2, %v9112_v5 }
 0x17d   :  { %v1031_v54 = vadd.f32 %v942_v8, %v861_v27  ;;  %3725 = vmatpush1.bf16.msra.mxu1 %v3623_v2  ;;  %v3768_v55 = vpop.permute.xlu0 %3767  ;;  %v3770_v56 = vpop.permute.xlu1 %3769  ;;  %3742 = vmatprep.mubr.bf16.mxu1 %v11161_v7  ;;  %v9126_v2 = vld [vmem:[%s13441_s1 + $0x5c] sm:$0xf] }
 0x17e   :  { %v859_v58 = vpop.f32.mrf.mxu0  ;;  %v944_v59 = vpop.f32.mrf.mxu1  ;;  %v3775_v60 = vsel %vm3771_vm9, %v3766_v49, %v3768_v55  ;;  %v3776_v14 = vsel %vm3771_vm9, %v3768_v55, %v3770_v56 }
 0x17f   :  { %v1032_v62 = vadd.f32 %v944_v59, %v862_v35  ;;  %9122 = vmatprep.subr.msk.bf16.mxu1 %vm71_vm1, %v3775_v60  ;;  %v3793_v22 = vsel %vm71_vm1, %v3776_v14, 0 }
 0x180   :  { %v946_v63 = vpop.f32.mrf.mxu1  ;;  %v983_v0 = vpop.f32.mrf.mxu0  ;;  %9116 = vmatmul.mubr.msk.bf16.vlgmr.msra.gmra.mxu0 %vm67_vm2, %v9112_v5 }
 0x181   :  { %v1033_v1 = vadd.f32 %v983_v0, %v863_v38  ;;  %3813 = vmatpush1.bf16.msra.mxu0 %v3781_v57  ;;  %v3930_v6 = vpop.permute.xlu0 %3929  ;;  %v3932_v10 = vpop.permute.xlu1 %3931  ;;  %3830 = vmatprep.mubr.bf16.mxu0 %v11161_v7 }
 0x182   :  { %v947_v12 = vpop.f32.mrf.mxu1  ;;  %v985_v13 = vpop.f32.mrf.mxu0  ;;  %9124 = vmatprep.subr.msk.bf16.mxu0 %vm71_vm1, %v3770_v56  ;;  %v3942_v26 = vsel %vm3941_vm10, %v3930_v6, %v3932_v10 }
 0x183   :  { %v1034_v15 = vadd.f32 %v985_v13, %v864_v45  ;;  %v3951_v33 = vsel %vm71_vm1, %v3942_v26, 0 }
 0x184   :  { %v987_v16 = vpop.f32.mrf.mxu0  ;;  %v1024_v17 = vpop.f32.mrf.mxu1  ;;  %9118 = vmatmul.mubr.msk.bf16.vlgmr.msra.gmra.mxu1 %vm67_vm2, %v9112_v5 }
 0x185   :  { %v1035_v18 = vadd.f32 %v1024_v17, %v865_v3  ;;  %3854 = vmatpush1.bf16.msra.mxu1 %v3787_v11  ;;  %v3934_v20 = vpop.permute.xlu0 %3933  ;;  %v3936_v21 = vpop.permute.xlu1 %3935  ;;  %3871 = vmatprep.mubr.bf16.mxu1 %v11161_v7 }
 0x186   :  { %v988_v23 = vpop.f32.mrf.mxu0  ;;  %v1026_v24 = vpop.f32.mrf.mxu1  ;;  %v3943_v25 = vsel %vm3941_vm10, %v3932_v10, %v3934_v20  ;;  %v3944_v37 = vsel %vm3941_vm10, %v3934_v20, %v3936_v21  ;;  %v9133_v20 = vld [vmem:[%s13441_s1 + $0x60] sm:$0xf] }
 0x187   :  { %v1036_v27 = vadd.f32 %v1026_v24, %v866_v9  ;;  %9127 = vmatprep.subr.msk.bf16.mxu1 %vm71_vm1, %v3943_v25  ;;  %v3957_v44 = vsel %vm71_vm1, %v3944_v37, 0 }
 0x188   :  { %v1028_v28 = vpop.f32.mrf.mxu1  ;;  %v1112_v29 = vpop.f32.mrf.mxu0  ;;  %9121 = vmatmul.mubr.msk.bf16.vlgmr.msra.gmra.mxu0 %vm67_vm2, %v9119_v19 }
 0x189   :  { %v1201_v30 = vadd.f32 %v1112_v29, %v1031_v54  ;;  %3895 = vmatpush1.bf16.msra.mxu0 %v3793_v22  ;;  %v3938_v31 = vpop.permute.xlu0 %3937  ;;  %v3940_v32 = vpop.permute.xlu1 %3939  ;;  %3912 = vmatprep.mubr.bf16.mxu0 %v11161_v7 }
 0x18a   :  { %v1029_v34 = vpop.f32.mrf.mxu1  ;;  %v1114_v35 = vpop.f32.mrf.mxu0  ;;  %v3945_v36 = vsel %vm3941_vm10, %v3936_v21, %v3938_v31  ;;  %v3946_v47 = vsel %vm3941_vm10, %v3938_v31, %v3940_v32 }
 0x18b   :  { %v1202_v38 = vadd.f32 %v1114_v35, %v1032_v62  ;;  %9129 = vmatprep.subr.msk.bf16.mxu0 %vm71_vm1, %v3945_v36  ;;  %v3963_v51 = vsel %vm71_vm1, %v3946_v47, 0 }
 0x18c   :  { %v1116_v39 = vpop.f32.mrf.mxu0  ;;  %v1153_v40 = vpop.f32.mrf.mxu1  ;;  %9123 = vmatmul.mubr.msk.bf16.vlgmr.msra.gmra.mxu1 %vm67_vm2, %v9119_v19 }
 0x18d   :  { %v1203_v41 = vadd.f32 %v1153_v40, %v1033_v1  ;;  %3983 = vmatpush1.bf16.msra.mxu1 %v3951_v33  ;;  %v4100_v42 = vpop.permute.xlu0 %4099  ;;  %v4102_v43 = vpop.permute.xlu1 %4101  ;;  %4000 = vmatprep.mubr.bf16.mxu1 %v11161_v7 }
 0x18e   :  { %v1117_v45 = vpop.f32.mrf.mxu0  ;;  %v1155_v46 = vpop.f32.mrf.mxu1  ;;  %9131 = vmatprep.subr.msk.bf16.mxu1 %vm71_vm1, %v3940_v32  ;;  %v4112_v8 = vsel %vm4111_vm11, %v4100_v42, %v4102_v43 }
 0x18f   :  { %v1204_v3 = vadd.f32 %v1155_v46, %v1034_v15  ;;  %v4121_v59 = vsel %vm71_vm1, %v4112_v8, 0 }
 0x190   :  { %v1157_v5 = vpop.f32.mrf.mxu1  ;;  %v1194_v48 = vpop.f32.mrf.mxu0  ;;  %9125 = vmatmul.mubr.msk.bf16.vlgmr.msra.gmra.mxu0 %vm67_vm2, %v9119_v19 }
 0x191   :  { %v1205_v49 = vadd.f32 %v1194_v48, %v1035_v18  ;;  %4024 = vmatpush1.bf16.msra.mxu0 %v3957_v44  ;;  %v4104_v4 = vpop.permute.xlu0 %4103  ;;  %v4106_v50 = vpop.permute.xlu1 %4105  ;;  %4041 = vmatprep.mubr.bf16.mxu0 %v11161_v7 }
 0x192   :  { %v1158_v52 = vpop.f32.mrf.mxu1  ;;  %v1196_v9 = vpop.f32.mrf.mxu0  ;;  %v4113_v53 = vsel %vm4111_vm11, %v4102_v43, %v4104_v4  ;;  %v4114_v63 = vsel %vm4111_vm11, %v4104_v4, %v4106_v50 }
 0x193   :  { %v1206_v54 = vadd.f32 %v1196_v9, %v1036_v27  ;;  %9134 = vmatprep.subr.msk.bf16.mxu0 %vm71_vm1, %v4113_v53  ;;  %v4127_v12 = vsel %vm71_vm1, %v4114_v63, 0 }
 0x194   :  { %v1198_v55 = vpop.f32.mrf.mxu0  ;;  %v1282_v56 = vpop.f32.mrf.mxu1  ;;  %9128 = vmatmul.mubr.msk.bf16.vlgmr.msra.gmra.mxu1 %vm67_vm2, %v9126_v2 }
 0x195   :  { %v1371_v57 = vadd.f32 %v1282_v56, %v1201_v30  ;;  %4065 = vmatpush1.bf16.msra.mxu1 %v3963_v51  ;;  %v4108_v58 = vpop.permute.xlu0 %4107  ;;  %4082 = vmatprep.mubr.bf16.mxu1 %v11161_v7  ;;  %v4110_v1 = vpop.permute.xlu1 %4109 }
 0x196   :  { %v1199_v60 = vpop.f32.mrf.mxu0  ;;  %v1284_v61 = vpop.f32.mrf.mxu1  ;;  %v4115_v62 = vsel %vm4111_vm11, %v4106_v50, %v4108_v58  ;;  %v4116_v15 = vsel %vm4111_vm11, %v4108_v58, %v4110_v1 }
 0x197   :  { %v1372_v0 = vadd.f32 %v1284_v61, %v1202_v38  ;;  %9136 = vmatprep.subr.msk.bf16.mxu1 %vm71_vm1, %v4115_v62  ;;  %v4133_v21 = vsel %vm71_vm1, %v4116_v15, 0 }
 0x198   :  { %v1286_v6 = vpop.f32.mrf.mxu1  ;;  %v1323_v10 = vpop.f32.mrf.mxu0  ;;  %9130 = vmatmul.mubr.msk.bf16.vlgmr.msra.gmra.mxu0 %vm67_vm2, %v9126_v2 }
 0x199   :  { %v1373_v11 = vadd.f32 %v1323_v10, %v1203_v41  ;;  %4153 = vmatpush1.bf16.msra.mxu0 %v4121_v59  ;;  %4170 = vmatprep.mubr.bf16.mxu0 %v11161_v7 }
 0x19a   :  { %v1287_v13 = vpop.f32.mrf.mxu1  ;;  %v1325_v14 = vpop.f32.mrf.mxu0  ;;  %9138 = vmatprep.subr.msk.bf16.mxu0 %vm71_vm1, %v4110_v1  ;;  %vm4548_vm1 = vcmask 1041408  }
 0x19b   :  { %v1374_v16 = vadd.f32 %v1325_v14, %v1204_v3 }
 0x19c   :  { %v1327_v17 = vpop.f32.mrf.mxu0  ;;  %v1364_v18 = vpop.f32.mrf.mxu1  ;;  %9132 = vmatmul.mubr.msk.bf16.vlgmr.msra.gmra.mxu1 %vm67_vm2, %v9126_v2 }
 0x19d   :  { %v1375_v19 = vadd.f32 %v1364_v18, %v1205_v49  ;;  %4194 = vmatpush1.bf16.msra.mxu1 %v4127_v12  ;;  %4211 = vmatprep.mubr.bf16.mxu1 %v11161_v7 }
 0x19e   :  { %v1328_v22 = vpop.f32.mrf.mxu0  ;;  %v1366_v23 = vpop.f32.mrf.mxu1 }
 0x19f   :  { %v1376_v24 = vadd.f32 %v1366_v23, %v1206_v54 }
 0x1a0   :  { %v1368_v25 = vpop.f32.mrf.mxu1  ;;  %v1452_v26 = vpop.f32.mrf.mxu0  ;;  %9135 = vmatmul.mubr.msk.bf16.vlgmr.msra.gmra.mxu0 %vm67_vm2, %v9133_v20 }
 0x1a1   :  { %v1541_v27 = vadd.f32 %v1452_v26, %v1371_v57  ;;  %4235 = vmatpush1.bf16.msra.mxu0 %v4133_v21  ;;  %4252 = vmatprep.mubr.bf16.mxu0 %v11161_v7 }
 0x1a2   :  { %v1369_v28 = vpop.f32.mrf.mxu1  ;;  %v1454_v29 = vpop.f32.mrf.mxu0 }
 0x1a3   :  { %v1542_v30 = vadd.f32 %v1454_v29, %v1372_v0 }
 0x1a4   :  { %v1456_v31 = vpop.f32.mrf.mxu0  ;;  %v1493_v32 = vpop.f32.mrf.mxu1  ;;  %9137 = vmatmul.mubr.msk.bf16.vlgmr.msra.gmra.mxu1 %vm67_vm2, %v9133_v20 }
 0x1a5   :  { %v1543_v33 = vadd.f32 %v1493_v32, %v1373_v11 }
 0x1a6   :  { %v1457_v34 = vpop.f32.mrf.mxu0  ;;  %v1495_v35 = vpop.f32.mrf.mxu1 }
 0x1a7   :  { %v1544_v36 = vadd.f32 %v1495_v35, %v1374_v16 }
 0x1a8   :  { %v1497_v37 = vpop.f32.mrf.mxu1  ;;  %v1534_v38 = vpop.f32.mrf.mxu0  ;;  %9139 = vmatmul.mubr.msk.bf16.vlgmr.msra.gmra.mxu0 %vm67_vm2, %v9133_v20 }
 0x1a9   :  { %v1545_v39 = vadd.f32 %v1534_v38, %v1375_v19 }
 0x1aa   :  { %v1498_v40 = vpop.f32.mrf.mxu1  ;;  %v1536_v41 = vpop.f32.mrf.mxu0 }
 0x1ab   :  { %v1546_v42 = vadd.f32 %v1536_v41, %v1376_v24 }
 0x1ac   :  { %v1538_v7 = vpop.f32.mrf.mxu0  ;;  %v1622_v43 = vpop.f32.mrf.mxu1 }
 0x1ad   :  { %v1711_v44 = vadd.f32 %v1622_v43, %v1541_v27 }
 0x1ae   :  { %v1539_v45 = vpop.f32.mrf.mxu0  ;;  %v1624_v46 = vpop.f32.mrf.mxu1 }
 0x1af   :  { %v1712_v47 = vadd.f32 %v1624_v46, %v1542_v30 }
 0x1b0   :  { %v1626_v3 = vpop.f32.mrf.mxu1  ;;  %v1663_v5 = vpop.f32.mrf.mxu0 }
 0x1b1   :  { %v1713_v48 = vadd.f32 %v1663_v5, %v1543_v33  ;;  %v10802_v5 = vld [vmem:[%s13443_s3 + $0x114] sm:$0xff]  }
 0x1b2   :  { %v1627_v49 = vpop.f32.mrf.mxu1  ;;  %v1665_v2 = vpop.f32.mrf.mxu0 }
 0x1b3   :  { %v1714_v4 = vadd.f32 %v1665_v2, %v1544_v36  ;;  %v10803_v2 = vld [vmem:[%s13443_s3 + $0xd4] sm:$0xff]  }
 0x1b4   :  { %v1667_v50 = vpop.f32.mrf.mxu0  ;;  %v1704_v51 = vpop.f32.mrf.mxu1 }
 0x1b5   :  { %v1715_v52 = vadd.f32 %v1704_v51, %v1545_v39 }
 0x1b6   :  { %v1668_v9 = vpop.f32.mrf.mxu0  ;;  %v1706_v53 = vpop.f32.mrf.mxu1 }
 0x1b7   :  { %v1716_v8 = vadd.f32 %v1706_v53, %v1546_v42  ;;  %v10800_v42 = vld [vmem:[%s13443_s3 + $0x11c] sm:$0xff]   ;;  %v10804_v9 = vld [vmem:[%s13443_s3 + $0x10c] sm:$0xff]  }
 0x1b8   :  { %v1708_v54 = vpop.f32.mrf.mxu1  ;;  %v1792_v55 = vpop.f32.mrf.mxu0  ;;  %10070 = vmatprep.subr.bf16.mxu1 %v10800_v42  ;;  %v10820_v42 = vld [vmem:[%s13443_s3 + $0xa4] sm:$0xff]  }
 0x1b9   :  { %v1881_v56 = vadd.f32 %v1792_v55, %v1711_v44  ;;  %v10801_v44 = vld [vmem:[%s13443_s3 + $0xdc] sm:$0xff]   ;;  %v10805_v54 = vld [vmem:[%s13443_s3 + $0xcc] sm:$0xff]  }
 0x1ba   :  { %v1709_v57 = vpop.f32.mrf.mxu1  ;;  %v1794_v58 = vpop.f32.mrf.mxu0  ;;  %10071 = vmatpush3.bf16.msra.mxu1 %v10801_v44  ;;  %v10821_v44 = vld [vmem:[%s13443_s3 + $0x78] sm:$0xff]  }
 0x1bb   :  { %v1882_v59 = vadd.f32 %v1794_v58, %v1712_v47  ;;  %10072 = vmatprep.subr.bf16.mxu1 %v10802_v5  ;;  %v10807_v58 = vld [vmem:[%s13443_s3 + $0x144] ss:$0 sps:$4 sm:$0x33]  }
 0x1bc   :  { %v1796_v60 = vpop.f32.mrf.mxu0  ;;  %v1833_v61 = vpop.f32.mrf.mxu1 }
 0x1bd   :  { %v1883_v62 = vadd.f32 %v1833_v61, %v1713_v48  ;;  %v10806_v60 = vld [vmem:[%s13443_s3 + $0x104] sm:$0xff]  }
 0x1be   :  { %v1797_v63 = vpop.f32.mrf.mxu0  ;;  %v1835_v0 = vpop.f32.mrf.mxu1  ;;  %10073 = vmatpush3.bf16.msra.mxu1 %v10803_v2 }
 0x1bf   :  { %v1884_v1 = vadd.f32 %v1835_v0, %v1714_v4  ;;  %10074 = vmatprep.subr.bf16.mxu1 %v10804_v9  ;;  %v11185_v63 = vmov 0.0   ;;  %v4550_v0 = vsel %vm4548_vm1, %v10807_v58, 0 }
 0x1c0   :  { %v1837_v6 = vpop.f32.mrf.mxu1  ;;  %v1874_v10 = vpop.f32.mrf.mxu0  ;;  %10524 = vmatprep.subr.bf16.mxu0 %v11185_v63  ;;  %10534 = vmatprep.mubr.msk.bf16.mxu0 %vm11186_vm12, %v11185_v63 }
 0x1c1   :  { %v1885_v11 = vadd.f32 %v1874_v10, %v1715_v52  ;;  %10525 = vmatpush3.bf16.msra.mxu0 %v4550_v0 }
 0x1c2   :  { %v1838_v12 = vpop.f32.mrf.mxu1  ;;  %v1876_v13 = vpop.f32.mrf.mxu0  ;;  %10075 = vmatpush3.bf16.msra.mxu1 %v10805_v54  ;;  %10526 = vmatprep.subr.bf16.mxu0 %v11185_v63 }
 0x1c3   :  { %v1886_v14 = vadd.f32 %v1876_v13, %v1716_v8  ;;  %10076 = vmatprep.subr.bf16.mxu1 %v10806_v60  ;;  %v10809_v13 = vld [vmem:[%s13443_s3 + $0xfc] sm:$0xff]  }
 0x1c4   :  { %v1878_v15 = vpop.f32.mrf.mxu0  ;;  %v1962_v16 = vpop.f32.mrf.mxu1 }
 0x1c5   :  { %v2051_v17 = vadd.f32 %v1962_v16, %v1881_v56 }
 0x1c6   :  { %v1879_v18 = vpop.f32.mrf.mxu0  ;;  %v1964_v19 = vpop.f32.mrf.mxu1 }
 0x1c7   :  { %v2052_v20 = vadd.f32 %v1964_v19, %v1882_v59 }
 0x1c8   :  { %v1966_v21 = vpop.f32.mrf.mxu1  ;;  %v2003_v22 = vpop.f32.mrf.mxu0 }
 0x1c9   :  { %v2053_v23 = vadd.f32 %v2003_v22, %v1883_v62  ;;  %v10812_v22 = vld [vmem:[%s13443_s3 + $0xf4] sm:$0xff]  }
 0x1ca   :  { %v1967_v24 = vpop.f32.mrf.mxu1  ;;  %v2005_v25 = vpop.f32.mrf.mxu0 }
 0x1cb   :  { %v2054_v26 = vadd.f32 %v2005_v25, %v1884_v1  ;;  %v10808_v1 = vld [vmem:[%s13443_s3 + $0xc4] sm:$0xff]  }
 0x1cc   :  { %v2007_v27 = vpop.f32.mrf.mxu0  ;;  %v2044_v28 = vpop.f32.mrf.mxu1  ;;  %10077 = vmatpush3.bf16.msra.mxu1 %v10808_v1 }
 0x1cd   :  { %v2055_v29 = vadd.f32 %v2044_v28, %v1885_v11  ;;  %10078 = vmatprep.subr.bf16.mxu1 %v10809_v13 }
 0x1ce   :  { %v2008_v30 = vpop.f32.mrf.mxu0  ;;  %v2046_v31 = vpop.f32.mrf.mxu1 }
 0x1cf   :  { %v2056_v32 = vadd.f32 %v2046_v31, %v1886_v14  ;;  %v10810_v14 = vld [vmem:[%s13443_s3 + $0x13c] sm:$0xff]   ;;  %v10815_v31 = vld [vmem:[%s13443_s3 + $0xec] sm:$0xff]  }
 0x1d0   :  { %v2048_v33 = vpop.f32.mrf.mxu1  ;;  %v2132_v34 = vpop.f32.mrf.mxu0  ;;  %10527 = vmatpush3.bf16.msra.mxu0 %v10810_v14 }
 0x1d1   :  { %v2221_v35 = vadd.f32 %v2132_v34, %v2051_v17  ;;  %v10811_v17 = vld [vmem:[%s13443_s3 + $0xbc] sm:$0xff]   ;;  %10528 = vmatprep.subr.bf16.mxu0 %v11185_v63 }
 0x1d2   :  { %v2049_v36 = vpop.f32.mrf.mxu1  ;;  %v2134_v37 = vpop.f32.mrf.mxu0  ;;  %10079 = vmatpush3.bf16.msra.mxu1 %v10811_v17 }
 0x1d3   :  { %v2222_v38 = vadd.f32 %v2134_v37, %v2052_v20  ;;  %10080 = vmatprep.subr.bf16.mxu1 %v10812_v22 }
 0x1d4   :  { %v2136_v39 = vpop.f32.mrf.mxu0  ;;  %v2173_v40 = vpop.f32.mrf.mxu1 }
 0x1d5   :  { %v2223_v41 = vadd.f32 %v2173_v40, %v2053_v23  ;;  %v10813_v23 = vld [vmem:[%s13443_s3 + $0x134] sm:$0xff]   ;;  %v10818_v40 = vld [vmem:[%s13443_s3 + $0xe4] sm:$0xff]  }
 0x1d6   :  { %v2137_v7 = vpop.f32.mrf.mxu0  ;;  %v2175_v43 = vpop.f32.mrf.mxu1  ;;  %10529 = vmatpush3.bf16.msra.mxu0 %v10813_v23 }
 0x1d7   :  { %v2224_v45 = vadd.f32 %v2175_v43, %v2054_v26  ;;  %v10814_v26 = vld [vmem:[%s13443_s3 + $0xb4] sm:$0xff]   ;;  %10530 = vmatprep.subr.bf16.mxu0 %v11185_v63 }
 0x1d8   :  { %v2177_v46 = vpop.f32.mrf.mxu1  ;;  %v2214_v47 = vpop.f32.mrf.mxu0  ;;  %10081 = vmatpush3.bf16.msra.mxu1 %v10814_v26 }
 0x1d9   :  { %v2225_v3 = vadd.f32 %v2214_v47, %v2055_v29  ;;  %10082 = vmatprep.subr.bf16.mxu1 %v10815_v31 }
 0x1da   :  { %v2178_v48 = vpop.f32.mrf.mxu1  ;;  %v2216_v49 = vpop.f32.mrf.mxu0 }
 0x1db   :  { %v2226_v4 = vadd.f32 %v2216_v49, %v2056_v32  ;;  %v10816_v32 = vld [vmem:[%s13443_s3 + $0x12c] sm:$0xff]  }
 0x1dc   :  { %v2218_v50 = vpop.f32.mrf.mxu0  ;;  %v2302_v51 = vpop.f32.mrf.mxu1  ;;  %10531 = vmatpush3.bf16.msra.mxu0 %v10816_v32 }
 0x1dd   :  { %v2391_v52 = vadd.f32 %v2302_v51, %v2221_v35  ;;  %v10817_v35 = vld [vmem:[%s13443_s3 + $0xac] sm:$0xff]   ;;  %10532 = vmatprep.subr.bf16.mxu0 %v11185_v63 }
 0x1de   :  { %v2219_v53 = vpop.f32.mrf.mxu0  ;;  %v2304_v8 = vpop.f32.mrf.mxu1  ;;  %10083 = vmatpush3.bf16.msra.mxu1 %v10817_v35 }
 0x1df   :  { %v2392_v55 = vadd.f32 %v2304_v8, %v2222_v38  ;;  %10084 = vmatprep.subr.bf16.mxu1 %v10818_v40 }
 0x1e0   :  { %v2306_v56 = vpop.f32.mrf.mxu1  ;;  %v2343_v57 = vpop.f32.mrf.mxu0 }
 0x1e1   :  { %v2393_v59 = vadd.f32 %v2343_v57, %v2223_v41  ;;  %v10819_v41 = vld [vmem:[%s13443_s3 + $0x124] sm:$0xff]  }
 0x1e2   :  { %v2307_v61 = vpop.f32.mrf.mxu1  ;;  %v2345_v62 = vpop.f32.mrf.mxu0  ;;  %10533 = vmatpush3.bf16.msra.mxu0 %v10819_v41  ;;  %10085 = vmatpush3.bf16.msra.mxu1 %v10820_v42 }
 0x1e3   :  { %v2394_v6 = vadd.f32 %v2345_v62, %v2224_v45  ;;  %10098 = vmatprep.subr.bf16.mxu0 %v10821_v44  ;;  %10538 = vmatprep.subr.bf16.mxu1 %v11185_v63 }
 0x1e4   :  { %v2347_v10 = vpop.f32.mrf.mxu0  ;;  %v2384_v11 = vpop.f32.mrf.mxu1 }
 0x1e5   :  { %v2395_v12 = vadd.f32 %v2384_v11, %v2225_v3 }
 0x1e6   :  { %v2348_v15 = vpop.f32.mrf.mxu0  ;;  %v2386_v16 = vpop.f32.mrf.mxu1 }
 0x1e7   :  { %v2396_v18 = vadd.f32 %v2386_v16, %v2226_v4 }
 0x1e8   :  { %v2388_v19 = vpop.f32.mrf.mxu1  ;;  %v2472_v20 = vpop.f32.mrf.mxu0 }
 0x1e9   :  { %v2561_v21 = vadd.f32 %v2472_v20, %v2391_v52 }
 0x1ea   :  { %v2389_v24 = vpop.f32.mrf.mxu1  ;;  %v2474_v25 = vpop.f32.mrf.mxu0 }
 0x1eb   :  { %v2562_v27 = vadd.f32 %v2474_v25, %v2392_v55 }
 0x1ec   :  { %v2476_v28 = vpop.f32.mrf.mxu0  ;;  %v2513_v29 = vpop.f32.mrf.mxu1 }
 0x1ed   :  { %v2563_v30 = vadd.f32 %v2513_v29, %v2393_v59 }
 0x1ee   :  { %v2477_v33 = vpop.f32.mrf.mxu0  ;;  %v2515_v34 = vpop.f32.mrf.mxu1 }
 0x1ef   :  { %v2564_v36 = vadd.f32 %v2515_v34, %v2394_v6 }
 0x1f0   :  { %v2517_v37 = vpop.f32.mrf.mxu1  ;;  %v2554_v38 = vpop.f32.mrf.mxu0 }
 0x1f1   :  { %v2565_v39 = vadd.f32 %v2554_v38, %v2395_v12 }
 0x1f2   :  { %v2518_v7 = vpop.f32.mrf.mxu1  ;;  %v2556_v43 = vpop.f32.mrf.mxu0 }
 0x1f3   :  { %v2566_v45 = vadd.f32 %v2556_v43, %v2396_v18 }
 0x1f4   :  { %v2558_v46 = vpop.f32.mrf.mxu0  ;;  %v2642_v47 = vpop.f32.mrf.mxu1 }
 0x1f5   :  { %v2731_v3 = vadd.f32 %v2642_v47, %v2561_v21 }
 0x1f6   :  { %v2559_v5 = vpop.f32.mrf.mxu0  ;;  %v2644_v48 = vpop.f32.mrf.mxu1 }
 0x1f7   :  { %v2732_v49 = vadd.f32 %v2644_v48, %v2562_v27 }
 0x1f8   :  { %v2646_v2 = vpop.f32.mrf.mxu1  ;;  %v2683_v4 = vpop.f32.mrf.mxu0 }
 0x1f9   :  { %v2733_v50 = vadd.f32 %v2683_v4, %v2563_v30 }
 0x1fa   :  { %v2647_v51 = vpop.f32.mrf.mxu1  ;;  %v2685_v52 = vpop.f32.mrf.mxu0 }
 0x1fb   :  { %v2734_v9 = vadd.f32 %v2685_v52, %v2564_v36 }
 0x1fc   :  { %v2687_v53 = vpop.f32.mrf.mxu0  ;;  %v2724_v8 = vpop.f32.mrf.mxu1 }
 0x1fd   :  { %v2735_v54 = vadd.f32 %v2724_v8, %v2565_v39 }
 0x1fe   :  { %v2688_v55 = vpop.f32.mrf.mxu0  ;;  %v2726_v56 = vpop.f32.mrf.mxu1 }
 0x1ff   :  { %v2736_v57 = vadd.f32 %v2726_v56, %v2566_v45 }
 0x200   :  { %v2728_v58 = vpop.f32.mrf.mxu1  ;;  %v2812_v59 = vpop.f32.mrf.mxu0 }
 0x201   :  { %v2901_v60 = vadd.f32 %v2812_v59, %v2731_v3 }
 0x202   :  { %v2729_v61 = vpop.f32.mrf.mxu1  ;;  %v2814_v62 = vpop.f32.mrf.mxu0 }
 0x203   :  { %v2902_v0 = vadd.f32 %v2814_v62, %v2732_v49 }
 0x204   :  { %v2816_v1 = vpop.f32.mrf.mxu0  ;;  %v2853_v6 = vpop.f32.mrf.mxu1 }
 0x205   :  { %v2903_v10 = vadd.f32 %v2853_v6, %v2733_v50 }
 0x206   :  { %v2817_v11 = vpop.f32.mrf.mxu0  ;;  %v2855_v12 = vpop.f32.mrf.mxu1 }
 0x207   :  { %v2904_v13 = vadd.f32 %v2855_v12, %v2734_v9 }
 0x208   :  { %v2857_v14 = vpop.f32.mrf.mxu1  ;;  %v2894_v15 = vpop.f32.mrf.mxu0 }
 0x209   :  { %v2905_v16 = vadd.f32 %v2894_v15, %v2735_v54 }
 0x20a   :  { %v2858_v17 = vpop.f32.mrf.mxu1  ;;  %v2896_v18 = vpop.f32.mrf.mxu0 }
 0x20b   :  { %v2906_v19 = vadd.f32 %v2896_v18, %v2736_v57 }
 0x20c   :  { %v2898_v20 = vpop.f32.mrf.mxu0  ;;  %v2982_v21 = vpop.f32.mrf.mxu1 }
 0x20d   :  { %v11980_v22 = vadd.f32 %v2982_v21, %v2901_v60 }
 0x20e   :  { %v2899_v23 = vpop.f32.mrf.mxu0  ;;  %v2984_v24 = vpop.f32.mrf.mxu1 }
 0x20f   :  { %v11982_v25 = vadd.f32 %v2984_v24, %v2902_v0 }
 0x210   :  { %v2986_v26 = vpop.f32.mrf.mxu1  ;;  %v3023_v27 = vpop.f32.mrf.mxu0 }
 0x211   :  { %v11984_v28 = vadd.f32 %v3023_v27, %v2903_v10 }
 0x212   :  { %v2987_v29 = vpop.f32.mrf.mxu1  ;;  %v3025_v30 = vpop.f32.mrf.mxu0 }
 0x213   :  { %v11986_v31 = vadd.f32 %v3025_v30, %v2904_v13 }
 0x214   :  { %v3027_v32 = vpop.f32.mrf.mxu0  ;;  %v3064_v33 = vpop.f32.mrf.mxu1 }
 0x215   :  { %v11988_v34 = vadd.f32 %v3064_v33, %v2905_v16 }
 0x216   :  { %v3028_v35 = vpop.f32.mrf.mxu0  ;;  %v3066_v36 = vpop.f32.mrf.mxu1 }
 0x217   :  { %v11990_v37 = vadd.f32 %v3066_v36, %v2906_v19 }
 0x218   :  { %v3068_v38 = vpop.f32.mrf.mxu1  ;;  %v3152_v39 = vpop.f32.mrf.mxu0 }
 0x21a   :  { %v3069_v40 = vpop.f32.mrf.mxu1  ;;  %v3154_v41 = vpop.f32.mrf.mxu0 }
 0x21c   :  { %v3156_v42 = vpop.f32.mrf.mxu0  ;;  %v11992_v7 = vpop.f32.mrf.mxu1 }
 0x21e   :  { %v3157_v43 = vpop.f32.mrf.mxu0  ;;  %v11994_v44 = vpop.f32.mrf.mxu1 }
 0x220   :  { %v3197_v45 = vpop.f32.mrf.mxu1  ;;  %v11996_v46 = vpop.f32.mrf.mxu0 }
 0x222   :  { %v3198_v47 = vpop.f32.mrf.mxu1  ;;  %v11998_v3 = vpop.f32.mrf.mxu0 }
 0x223   :  { %v3241_v47 = vadd.f32 %v3152_v39, %v11980_v22  ;;  %v3245_v39 = vadd.f32 %v11996_v46, %v11988_v34 }
 0x224   :  { %v3238_v5 = vpop.f32.mrf.mxu0  ;;  %v3322_v48 = vpop.f32.mrf.mxu1 }
 0x226   :  { %v3239_v49 = vpop.f32.mrf.mxu0  ;;  %v3324_v2 = vpop.f32.mrf.mxu1 }
 0x228   :  { %v3326_v4 = vpop.f32.mrf.mxu1  ;;  %v3363_v50 = vpop.f32.mrf.mxu0 }
 0x229   :  { %v3242_v4 = vadd.f32 %v3154_v41, %v11982_v25 }
 0x22a   :  { %v3327_v51 = vpop.f32.mrf.mxu1  ;;  %v3365_v52 = vpop.f32.mrf.mxu0 }
 0x22b   :  { %v3411_v51 = vadd.f32 %v3322_v48, %v3241_v47 }
 0x22c   :  { %v3367_v9 = vpop.f32.mrf.mxu0  ;;  %v12000_v53 = vpop.f32.mrf.mxu1 }
 0x22e   :  { %v3368_v8 = vpop.f32.mrf.mxu0  ;;  %v12002_v54 = vpop.f32.mrf.mxu1 }
 0x230   :  { %v3408_v55 = vpop.f32.mrf.mxu1  ;;  %v3492_v56 = vpop.f32.mrf.mxu0 }
 0x231   :  { %v3243_v55 = vadd.f32 %v11992_v7, %v11984_v28  ;;  %v3246_v28 = vadd.f32 %v11998_v3, %v11990_v37  ;;  %v3415_v7 = vadd.f32 %v12000_v53, %v3245_v39 }
 0x232   :  { %v3409_v57 = vpop.f32.mrf.mxu1  ;;  %v3494_v58 = vpop.f32.mrf.mxu0 }
 0x233   :  { %v3412_v57 = vadd.f32 %v3324_v2, %v3242_v4  ;;  %v3416_v34 = vadd.f32 %v12002_v54, %v3246_v28 }
 0x234   :  { %v3496_v59 = vpop.f32.mrf.mxu0  ;;  %v3533_v60 = vpop.f32.mrf.mxu1 }
 0x235   :  { %v3581_v59 = vadd.f32 %v3492_v56, %v3411_v51 }
 0x236   :  { %v3497_v61 = vpop.f32.mrf.mxu0  ;;  %v3535_v62 = vpop.f32.mrf.mxu1 }
 0x238   :  { %v3537_v0 = vpop.f32.mrf.mxu1  ;;  %v3574_v1 = vpop.f32.mrf.mxu0 }
 0x239   :  { %v3585_v46 = vadd.f32 %v3574_v1, %v3415_v7 }
 0x23a   :  { %v3538_v6 = vpop.f32.mrf.mxu1  ;;  %v12004_v10 = vpop.f32.mrf.mxu0 }
 0x23b   :  { %v3244_v6 = vadd.f32 %v11994_v44, %v11986_v31  ;;  %v3586_v37 = vadd.f32 %v12004_v10, %v3416_v34  ;;  %v4299_v10 = vlaneseq }
 0x23c   :  { %v3578_v11 = vpop.f32.mrf.mxu0  ;;  %v3662_v12 = vpop.f32.mrf.mxu1 }
 0x23d   :  { %v3413_v11 = vadd.f32 %v3363_v50, %v3243_v55  ;;  %v3751_v22 = vadd.f32 %v3662_v12, %v3581_v59  ;;  %v3414_v48 = vadd.f32 %v3365_v52, %v3244_v6  ;;  %v4271_v12 = vpop.permute.xlu0 %4270  ;;  %v4300_v6 = vshrl.u32 %v4299_v10, 7 }
 0x23e   :  { %v3579_v13 = vpop.f32.mrf.mxu0  ;;  %v3664_v14 = vpop.f32.mrf.mxu1 }
 0x23f   :  { %v3582_v13 = vadd.f32 %v3494_v58, %v3412_v57  ;;  %v3584_v31 = vadd.f32 %v3535_v62, %v3414_v48  ;;  %v12024_v48 = vsub.s32 1, %v4300_v6 }
 0x240   :  { %v3666_v15 = vpop.f32.mrf.mxu1  ;;  %v3703_v16 = vpop.f32.mrf.mxu0 }
 0x241   :  { %v3583_v15 = vadd.f32 %v3533_v60, %v3413_v11 }
 0x242   :  { %v3667_v17 = vpop.f32.mrf.mxu1  ;;  %v3705_v18 = vpop.f32.mrf.mxu0 }
 0x243   :  { %v3752_v17 = vadd.f32 %v3664_v14, %v3582_v13  ;;  %v3753_v44 = vadd.f32 %v3703_v16, %v3583_v15  ;;  %v3754_v60 = vadd.f32 %v3705_v18, %v3584_v31  ;;  %v12026_v15 = vsub.s32 2, %v4300_v6  ;;  %v10822_v31 = vld [vmem:[%s13443_s3 + $0x38] sm:$0xff]  }
 0x244   :  { %v3707_v19 = vpop.f32.mrf.mxu0  ;;  %v3744_v20 = vpop.f32.mrf.mxu1 }
 0x245   :  { %v3755_v3 = vadd.f32 %v3744_v20, %v3585_v46 }
 0x246   :  { %v3708_v21 = vpop.f32.mrf.mxu0  ;;  %v12006_v23 = vpop.f32.mrf.mxu1 }
 0x248   :  { %v3748_v24 = vpop.f32.mrf.mxu1  ;;  %v3832_v26 = vpop.f32.mrf.mxu0 }
 0x249   :  { %v3921_v19 = vadd.f32 %v3832_v26, %v3751_v22 }
 0x24a   :  { %v3749_v27 = vpop.f32.mrf.mxu1  ;;  %v3834_v29 = vpop.f32.mrf.mxu0 }
 0x24b   :  { %v3922_v50 = vadd.f32 %v3834_v29, %v3752_v17  ;;  %v10823_v17 = vld [vmem:[%s13443_s3 + $0xa0] ss:$0 sps:$4 sm:$0x33]  }
 0x24c   :  { %v3836_v30 = vpop.f32.mrf.mxu0  ;;  %v3873_v32 = vpop.f32.mrf.mxu1  ;;  %v4759_v46 = vsel %vm4548_vm1, %v10823_v17, 0 }
 0x24d   :  { %v3923_v14 = vadd.f32 %v3873_v32, %v3753_v44 }
 0x24e   :  { %v3837_v33 = vpop.f32.mrf.mxu0  ;;  %v3875_v35 = vpop.f32.mrf.mxu1 }
 0x24f   :  { %v3924_v30 = vadd.f32 %v3875_v35, %v3754_v60  ;;  %v3756_v33 = vadd.f32 %v12006_v23, %v3586_v37  ;;  %v10825_v60 = vld [vmem:[%s13443_s3 + $0x30] sm:$0xff]  }
 0x250   :  { %v3877_v36 = vpop.f32.mrf.mxu1  ;;  %v3914_v38 = vpop.f32.mrf.mxu0 }
 0x251   :  { %v3925_v36 = vadd.f32 %v3914_v38, %v3755_v3 }
 0x252   :  { %v3878_v40 = vpop.f32.mrf.mxu1  ;;  %v3916_v42 = vpop.f32.mrf.mxu0 }
 0x254   :  { %v3918_v43 = vpop.f32.mrf.mxu0  ;;  %v4002_v45 = vpop.f32.mrf.mxu1 }
 0x255   :  { %v4091_v58 = vadd.f32 %v4002_v45, %v3921_v19  ;;  %v3926_v45 = vadd.f32 %v3916_v42, %v3756_v33  ;;  %v10829_v33 = vld [vmem:[%s13443_s3 + $0x90] sm:$0xff]  }
 0x256   :  { %v3919_v5 = vpop.f32.mrf.mxu0  ;;  %v4004_v49 = vpop.f32.mrf.mxu1 }
 0x257   :  { %v4092_v24 = vadd.f32 %v4004_v49, %v3922_v50 }
 0x258   :  { %v4006_v9 = vpop.f32.mrf.mxu1  ;;  %v4043_v8 = vpop.f32.mrf.mxu0 }
 0x259   :  { %v4093_v62 = vadd.f32 %v4043_v8, %v3923_v14 }
 0x25a   :  { %v4007_v61 = vpop.f32.mrf.mxu1  ;;  %v4045_v0 = vpop.f32.mrf.mxu0 }
 0x25b   :  { %v4094_v40 = vadd.f32 %v4045_v0, %v3924_v30 }
 0x25c   :  { %v4047_v25 = vpop.f32.mrf.mxu0  ;;  %v4084_v41 = vpop.f32.mrf.mxu1 }
 0x25d   :  { %v4095_v20 = vadd.f32 %v4084_v41, %v3925_v36  ;;  %v12022_v41 = vsub.s32 0, %v4300_v6  ;;  %v10830_v36 = vld [vmem:[%s13443_s3 + $0x60] sm:$0xff]  }
 0x25e   :  { %v4048_v2 = vpop.f32.mrf.mxu0  ;;  %v4086_v56 = vpop.f32.mrf.mxu1 }
 0x25f   :  { %v4096_v8 = vadd.f32 %v4086_v56, %v3926_v45 }
 0x260   :  { %v4088_v21 = vpop.f32.mrf.mxu1  ;;  %v4172_v52 = vpop.f32.mrf.mxu0 }
 0x261   :  { %v4261_v26 = vadd.f32 %v4172_v52, %v4091_v58  ;;  %v10824_v21 = vld [vmem:[%s13443_s3 + $0x70] sm:$0xff]   ;;  %v12047_v52 = vsub.s32 3, %v4300_v6 }
 0x262   :  { %v4174_v53 = vpop.f32.mrf.mxu0  ;;  %v4089_v27 = vpop.f32.mrf.mxu1 }
 0x263   :  { %v4262_v16 = vadd.f32 %v4174_v53, %v4092_v24  ;;  %v4273_v29 = vadd.f32 %v4271_v12, %v4261_v26  ;;  %v10826_v24 = vld [vmem:[%s13443_s3 + $0x98] sm:$0xff]   ;;  %v10827_v53 = vld [vmem:[%s13443_s3 + $0x68] sm:$0xff]  }
 0x264   :  { %v4176_v54 = vpop.f32.mrf.mxu0  ;;  %v4213_v1 = vpop.f32.mrf.mxu1 }
 0x265   :  { %v4274_v43 = vadd.f32 %v4271_v12, %v4262_v16  ;;  %v4279_v18 = vmax.f32 %v4273_v29, 0.0  ;;  %v4263_v32 = vadd.f32 %v4213_v1, %v4093_v62  ;;  %v10828_v16 = vld [vmem:[%s13443_s3 + $0x28] sm:$0xff]  }
 0x266   :  { %v4177_v47 = vpop.f32.mrf.mxu0  ;;  %v4215_v5 = vpop.f32.mrf.mxu1 }
 0x267   :  { %v4280_v49 = vmax.f32 %v4274_v43, 0.0  ;;  %4285 = vst [vmem:[#allocation2] sm:$0xff] %v4279_v18  ;;  %v4275_v35 = vadd.f32 %v4271_v12, %v4263_v32  ;;  %v4264_v4 = vadd.f32 %v4215_v5, %v4094_v40  ;;  %v10831_v43 = vld [vmem:[%s13443_s3 + $0x20] sm:$0xff]   ;;  %v10832_v32 = vld [vmem:[%s13443_s3 + $0x88] sm:$0xff]   ;;  %v10833_v47 = vld [vmem:[%s13443_s3 + $0x58] sm:$0xff]  }
 0x268   :  { %v4217_v51 = vpop.f32.mrf.mxu1  ;;  %v4254_v9 = vpop.f32.mrf.mxu0 }
 0x269   :  { %4286 = vst [vmem:[#allocation2 + $0x8] sm:$0xff] %v4280_v49  ;;  %v4281_v23 = vmax.f32 %v4275_v35, 0.0  ;;  %v4276_v38 = vadd.f32 %v4271_v12, %v4264_v4  ;;  %v4265_v55 = vadd.f32 %v4254_v9, %v4095_v20  ;;  %v10834_v49 = vld [vmem:[%s13443_s3 + $0x18] sm:$0xff]   ;;  %v10835_v51 = vld [vmem:[%s13443_s3 + $0x80] sm:$0xff]  }
 0x26a   :  { %v4218_v57 = vpop.f32.mrf.mxu1  ;;  %v4256_v59 = vpop.f32.mrf.mxu0 }
 0x26b   :  { %4287 = vst [vmem:[#allocation2 + $0x10] sm:$0xff] %v4281_v23  ;;  %v4282_v61 = vmax.f32 %v4276_v38, 0.0  ;;  %v4277_v42 = vadd.f32 %v4271_v12, %v4265_v55  ;;  %v4266_v0 = vadd.f32 %v4256_v59, %v4096_v8  ;;  %v10836_v8 = vld [vmem:[%s13443_s3 + $0x50] sm:$0xff]   ;;  %v10838_v38 = vld [vmem:[%s13443_s3 + $0x1c0] sm:$0xff]  }
 0x26c   :  { %v4258_v11 = vpop.f32.mrf.mxu0  ;;  %v10837_v59 = vld [vmem:[%s13443_s3 + $0x10] sm:$0xff]  }
 0x26d   :  { %4288 = vst [vmem:[#allocation2 + $0x18] sm:$0xff] %v4282_v61  ;;  %v4283_v13 = vmax.f32 %v4277_v42, 0.0  ;;  %v4278_v22 = vadd.f32 %v4271_v12, %v4266_v0  ;;  %v10839_v0 = vld [vmem:[%s13443_s3 + $0x180] sm:$0xff]  }
 0x26e   :  { %v4259_v39 = vpop.f32.mrf.mxu0 }
 0x26f   :  { %4289 = vst [vmem:[#allocation2 + $0x20] sm:$0xff] %v4283_v13  ;;  %v4284_v25 = vmax.f32 %v4278_v22, 0.0  ;;  %v10840_v22 = vld [vmem:[%s13443_s3 + $0x48] sm:$0xff]   ;;  %v10842_v39 = vld [vmem:[%s13443_s3 + $0x1b8] sm:$0xff]  }
 0x271   :  { %4290 = vst.msk [vmem:[#allocation2 + $0x28] sm:$0xff] %vm67_vm2, %v4284_v25  ;;  %vm6688_vm2 = vcmask 490496  }
 0x272   :  { %v4359_v19 = vld [vmem:[#allocation2 + $0x1] ss:$8 sm:$0x7]  ;;  %v12032_v28 = vld [vmem:[#allocation2] ss:$8 sm:$0x7] }
 0x273   :  { %v4364_v7 = vrot.slane %v4359_v19, %v12022_v41  ;;  %v4368_v2 = vrot.slane %v4359_v19, %v12024_v48  ;;  %v4372_v56 = vrot.slane %v4359_v19, %v12026_v15  ;;  %v4306_v44 = vrot.slane %v12032_v28, %v12024_v48  ;;  %v12096_v4 = vld [vmem:[#allocation2 + $0x2] ss:$8 sm:$0x7] }
 0x274   :  { %v4310_v9 = vrot.slane %v12032_v28, %v12026_v15  ;;  %v4851_v55 = vrot.slane %v12096_v4, %v12024_v48 }
 0x275   :  { %v4376_v50 = vpack.c.bf16 %v4364_v7, %v4364_v7  ;;  %v4377_v58 = vpack.c.bf16 %v4368_v2, %v4368_v2  ;;  %v4378_v12 = vpack.c.bf16 %v4372_v56, %v4372_v56  ;;  %v4315_v34 = vpack.c.bf16 %v4306_v44, %v4306_v44  ;;  %v10841_v7 = vld [vmem:[%s13443_s3 + $0x8] sm:$0xff]   ;;  %v10843_v56 = vld [vmem:[%s13443_s3 + $0x178] sm:$0xff]   ;;  %v10846_v44 = vld [vmem:[%s13443_s3 + $0x1b0] sm:$0xff]  }
 0x276   :  { %v4316_v11 = vpack.c.bf16 %v4310_v9, %v4310_v9  ;;  %v4860_v13 = vpack.c.bf16 %v4851_v55, %v4851_v55  ;;  %v10858_v9 = vld [vmem:[%s13443_s3 + $0x1d0] sm:$0xff]  }
 0x277   :  { %4584 = vmatprep.mubr.bf16.mxu1 %v4377_v58  ;;  %10535 = vmatmul.mubr.msk.bf16.vlgmr.msra.gmra.mxu0 %vm4544_vm13, %v4378_v12  ;;  %v10845_v12 = vld [vmem:[%s13443_s3] sm:$0xff]  }
 0x278   :  { %10099 = vmatpush3.bf16.msra.mxu0 %v10822_v31  ;;  %4585 = vmatmul.mubr.bf16.vlgmr.msra.gmra.mxu1 %v4376_v50  ;;  %v6609_v14 = vld [vmem:[#allocation2 + $0x11] ss:$8 sm:$0xf]  ;;  %v6541_v3 = vld [vmem:[#allocation2 + $0x10] ss:$8 sm:$0xf] }
 0x279   :  { %4793 = vmatprep.mubr.bf16.mxu0 %v4315_v34  ;;  %10539 = vmatpush3.bf16.msra.mxu1 %v4759_v46  ;;  %v6622_v26 = vrot.slane %v6609_v14, %v12026_v15  ;;  %v6618_v37 = vrot.slane %v6609_v14, %v12024_v48  ;;  %v6626_v62 = vrot.slane %v6609_v14, %v12047_v52  ;;  %v7130_v45 = vld [vmem:[#allocation2 + $0x12] ss:$8 sm:$0xf]  ;;  %v7425_v6 = vld [vmem:[#allocation2 + $0x13] ss:$8 sm:$0xf] }
 0x27a   :  { %10100 = vmatprep.subr.bf16.mxu0 %v10824_v21  ;;  %10540 = vmatprep.subr.bf16.mxu1 %v11185_v63  ;;  %v6550_v29 = vrot.slane %v6541_v3, %v12024_v48  ;;  %v6614_v1 = vrot.slane %v6609_v14, %v12022_v41  ;;  %v6546_v18 = vrot.slane %v6541_v3, %v12022_v41  ;;  %v10844_v31 = vld [vmem:[%s13443_s3 + $0x40] sm:$0xff]   ;;  %v10847_v34 = vld [vmem:[%s13443_s3 + $0x170] sm:$0xff]   ;;  %v10849_v14 = vld [vmem:[%s13443_s3 + $0x1e8] ss:$0 sps:$4 sm:$0x33]  }
 0x27b   :  { %v6633_v27 = vpack.c.bf16 %v6622_v26, %v6622_v26  ;;  %v6632_v30 = vpack.c.bf16 %v6618_v37, %v6618_v37  ;;  %10548 = vmatprep.mubr.msk.bf16.mxu1 %vm11186_vm12, %v11185_v63  ;;  %v6634_v54 = vpack.c.bf16 %v6626_v62, %v6626_v62  ;;  %v6554_v10 = vrot.slane %v6541_v3, %v12026_v15  ;;  %v10848_v26 = vld [vmem:[%s13443_s3 + $0x1a8] sm:$0xff]  }
 0x27c   :  { %10101 = vmatpush3.bf16.msra.mxu0 %v10825_v60  ;;  %v6564_v40 = vpack.c.bf16 %v6550_v29, %v6550_v29  ;;  %v6631_v5 = vpack.c.bf16 %v6614_v1, %v6614_v1  ;;  %v6563_v20 = vpack.c.bf16 %v6546_v18, %v6546_v18  ;;  %v7143_v35 = vrot.slane %v7130_v45, %v12026_v15  ;;  %v10850_v62 = vld [vmem:[%s13443_s3 + $0x168] sm:$0xff]   ;;  %v10854_v18 = vld [vmem:[%s13443_s3 + $0x198] sm:$0xff]  }
 0x27d   :  { %10541 = vmatpush3.bf16.msra.mxu1 %v10826_v24  ;;  %6684 = vrot.lane.b32.xlu1 %v6633_v27, %s11187_s14  ;;  %v6565_v23 = vpack.c.bf16 %v6554_v10, %v6554_v10  ;;  %v6558_v61 = vrot.slane %v6541_v3, %v12047_v52  ;;  %v7139_v42 = vrot.slane %v7130_v45, %v12024_v48  ;;  %v7720_v24 = vld [vmem:[#allocation2 + $0x14] ss:$8 sm:$0xf]  ;;  %v8310_v55 = vld [vmem:[#allocation2 + $0x16] ss:$8 sm:$0xf] }
 0x27e   :  { %6682 = vrot.lane.b32.xlu0 %v6632_v30, %s11187_s14  ;;  %10102 = vmatprep.subr.bf16.mxu0 %v10827_v53  ;;  %v7154_v57 = vpack.c.bf16 %v7143_v35, %v7143_v35  ;;  %v7147_v25 = vrot.slane %v7130_v45, %v12047_v52  ;;  %v7434_v2 = vrot.slane %v7425_v6, %v12024_v48  ;;  %v5031_v30 = vsel %vm4548_vm1, %v10849_v14, 0 }
 0x27f   :  { %10542 = vmatprep.subr.bf16.mxu1 %v11185_v63  ;;  %v6566_v17 = vpack.c.bf16 %v6558_v61, %v6558_v61  ;;  %v7153_v19 = vpack.c.bf16 %v7139_v42, %v7139_v42  ;;  %v7135_v46 = vrot.slane %v7130_v45, %v12022_v41  ;;  %v7430_v21 = vrot.slane %v7425_v6, %v12022_v41  ;;  %v10861_v42 = vld [vmem:[%s13443_s3 + $0x1c8] sm:$0xff]  }
 0x280   :  { %10103 = vmatpush3.bf16.msra.mxu0 %v10828_v16  ;;  %v7155_v50 = vpack.c.bf16 %v7147_v25, %v7147_v25  ;;  %v7448_v58 = vpack.c.bf16 %v7434_v2, %v7434_v2  ;;  %v4302_v60 = vrot.slane %v12032_v28, %v12022_v41  ;;  %v7438_v28 = vrot.slane %v7425_v6, %v12026_v15  ;;  %v10851_v16 = vld [vmem:[%s13443_s3 + $0x1a0] sm:$0xff]  }
 0x281   :  { %10543 = vmatpush3.bf16.msra.mxu1 %v10829_v33  ;;  %6686 = vrot.lane.b32.xlu1 %v6634_v54, %s11187_s14  ;;  %v7152_v37 = vpack.c.bf16 %v7135_v46, %v7135_v46  ;;  %v7447_v3 = vpack.c.bf16 %v7430_v21, %v7430_v21  ;;  %v7733_v53 = vrot.slane %v7720_v24, %v12026_v15  ;;  %v10852_v54 = vld [vmem:[%s13443_s3 + $0x1e0] sm:$0xff]  }
 0x282   :  { %6909 = vrot.lane.b32.xlu0 %v6564_v40, %s11187_s14  ;;  %10104 = vmatprep.subr.bf16.mxu0 %v10830_v36  ;;  %v4314_v27 = vpack.c.bf16 %v4302_v60, %v4302_v60  ;;  %v7442_v29 = vrot.slane %v7425_v6, %v12047_v52  ;;  %v7449_v33 = vpack.c.bf16 %v7438_v28, %v7438_v28  ;;  %v10853_v40 = vld [vmem:[%s13443_s3 + $0x160] sm:$0xff]  }
 0x283   :  { %10544 = vmatprep.subr.bf16.mxu1 %v11185_v63  ;;  %v7744_v36 = vpack.c.bf16 %v7733_v53, %v7733_v53  ;;  %v7729_v1 = vrot.slane %v7720_v24, %v12024_v48  ;;  %v8323_v6 = vrot.slane %v8310_v55, %v12026_v15  ;;  %v4847_v25 = vrot.slane %v12096_v4, %v12022_v41  ;;  %v10866_v46 = vld [vmem:[%s13443_s3 + $0x25c] sm:$0xff]  }
 0x284   :  { %10105 = vmatpush3.bf16.msra.mxu0 %v10831_v43  ;;  %v8015_v43 = vld [vmem:[#allocation2 + $0x15] ss:$8 sm:$0xf]  ;;  %v8327_v21 = vrot.slane %v8310_v55, %v12047_v52  ;;  %v8315_v28 = vrot.slane %v8310_v55, %v12022_v41 }
 0x285   :  { %10545 = vmatpush3.bf16.msra.mxu1 %v10832_v32  ;;  %6680 = vrot.lane.b32.xlu1 %v6631_v5, %s11187_s14  ;;  %v7450_v32 = vpack.c.bf16 %v7442_v29, %v7442_v29  ;;  %v7743_v45 = vpack.c.bf16 %v7729_v1, %v7729_v1  ;;  %v7737_v5 = vrot.slane %v7720_v24, %v12047_v52  ;;  %v10872_v29 = vld [vmem:[%s13443_s3 + $0x24c] sm:$0xff]  }
 0x286   :  { %6907 = vrot.lane.b32.xlu0 %v6563_v20, %s11187_s14  ;;  %10106 = vmatprep.subr.bf16.mxu0 %v10833_v47  ;;  %v10855_v47 = vld [vmem:[%s13443_s3 + $0x1d8] sm:$0xff]   ;;  %v8024_v10 = vrot.slane %v8015_v43, %v12024_v48  ;;  %v8334_v2 = vpack.c.bf16 %v8323_v6, %v8323_v6  ;;  %v8335_v53 = vpack.c.bf16 %v8327_v21, %v8327_v21 }
 0x287   :  { %10546 = vmatprep.subr.bf16.mxu1 %v11185_v63  ;;  %v10856_v20 = vld [vmem:[%s13443_s3 + $0x158] sm:$0xff]   ;;  %v7745_v35 = vpack.c.bf16 %v7737_v5, %v7737_v5  ;;  %v10877_v5 = vld [vmem:[%s13443_s3 + $0x26c] sm:$0xff]  }
 0x288   :  { %10107 = vmatpush3.bf16.msra.mxu0 %v10834_v49  ;;  %v10857_v49 = vld [vmem:[%s13443_s3 + $0x190] sm:$0xff]  }
 0x289   :  { %10547 = vmatpush3.bf16.msra.mxu1 %v10835_v51  ;;  %6911 = vrot.lane.b32.xlu1 %v6565_v23, %s11187_s14  ;;  %v8038_v51 = vpack.c.bf16 %v8024_v10, %v8024_v10  ;;  %v8020_v23 = vrot.slane %v8015_v43, %v12022_v41  ;;  %v10878_v10 = vld [vmem:[%s13443_s3 + $0x23c] sm:$0xff]  }
 0x28a   :  { %7205 = vrot.lane.b32.xlu0 %v7154_v57, %s11187_s14  ;;  %10108 = vmatprep.subr.bf16.mxu0 %v10836_v8  ;;  %v7725_v8 = vrot.slane %v7720_v24, %v12022_v41  ;;  %v10860_v57 = vld [vmem:[%s13443_s3 + $0x188] sm:$0xff]   ;;  %v10867_v24 = vld [vmem:[%s13443_s3 + $0x21c] sm:$0xff]  }
 0x28b   :  { %10126 = vmatprep.subr.bf16.mxu1 %v10838_v38  ;;  %v10859_v38 = vld [vmem:[%s13443_s3 + $0x150] sm:$0xff]   ;;  %v8037_v61 = vpack.c.bf16 %v8020_v23, %v8020_v23 }
 0x28c   :  { %10109 = vmatpush3.bf16.msra.mxu0 %v10837_v59  ;;  %10549 = vmatmul.mubr.msk.bf16.vlgmr.msra.gmra.mxu1 %vm4544_vm13, %v4316_v11  ;;  %v7742_v59 = vpack.c.bf16 %v7725_v8, %v7725_v8  ;;  %v12226_v11 = vld [vmem:[#allocation2 + $0x3] ss:$8 sm:$0x7]  ;;  %v10882_v23 = vld [vmem:[%s13443_s3 + $0x234] sm:$0xff]  }
 0x28d   :  { %10127 = vmatpush3.bf16.msra.mxu1 %v10839_v0  ;;  %5065 = vmatprep.mubr.bf16.mxu1 %v4860_v13  ;;  %v8028_v0 = vrot.slane %v8015_v43, %v12026_v15  ;;  %v4855_v13 = vrot.slane %v12096_v4, %v12026_v15  ;;  %v8032_v4 = vrot.slane %v8015_v43, %v12047_v52  ;;  %v10875_v43 = vld [vmem:[%s13443_s3 + $0x244] sm:$0xff]  }
 0x28e   :  { %6913 = vrot.lane.b32.xlu1 %v6566_v17, %s11187_s14  ;;  %7203 = vrot.lane.b32.xlu0 %v7153_v19, %s11187_s14  ;;  %v10865_v17 = vld [vmem:[%s13443_s3 + $0x28c] ss:$0 sps:$4 sm:$0x33]   ;;  %v5124_v19 = vrot.slane %v12226_v11, %v12024_v48  ;;  %v5120_v6 = vrot.slane %v12226_v11, %v12022_v41 }
 0x28f   :  { %10110 = vmatprep.subr.bf16.mxu0 %v10840_v22  ;;  %10128 = vmatprep.subr.bf16.mxu1 %v10842_v39  ;;  %v10862_v22 = vld [vmem:[%s13443_s3 + $0x148] sm:$0xff]   ;;  %v8040_v60 = vpack.c.bf16 %v8032_v4, %v8032_v4  ;;  %v10897_v4 = vld [vmem:[%s13443_s3 + $0x320] sm:$0xff]  }
 0x290   :  { %10111 = vmatpush3.bf16.msra.mxu0 %v10841_v7  ;;  %v10863_v39 = vld [vmem:[%s13443_s3 + $0x264] sm:$0xff]   ;;  %v8039_v7 = vpack.c.bf16 %v8028_v0, %v8028_v0  ;;  %v10887_v0 = vld [vmem:[%s13443_s3 + $0x1ec] sm:$0xff]  }
 0x291   :  { %10129 = vmatpush3.bf16.msra.mxu1 %v10843_v56  ;;  %10112 = vmatprep.subr.bf16.mxu0 %v10844_v31  ;;  %v10864_v56 = vld [vmem:[%s13443_s3 + $0x224] sm:$0xff]   ;;  %v8319_v31 = vrot.slane %v8310_v55, %v12024_v48 }
 0x292   :  { %7207 = vrot.lane.b32.xlu1 %v7155_v50, %s11187_s14  ;;  %7498 = vrot.lane.b32.xlu0 %v7448_v58, %s11187_s14  ;;  %v8605_v50 = vld [vmem:[#allocation2 + $0x17] ss:$8 sm:$0xf]  ;;  %v4859_v58 = vpack.c.bf16 %v4847_v25, %v4847_v25  ;;  %v5132_v25 = vpack.c.bf16 %v5120_v6, %v5120_v6 }
 0x293   :  { %10130 = vmatprep.subr.bf16.mxu1 %v10846_v44  ;;  %v4861_v44 = vpack.c.bf16 %v4855_v13, %v4855_v13  ;;  %v8333_v14 = vpack.c.bf16 %v8319_v31, %v8319_v31  ;;  %v8618_v1 = vrot.slane %v8605_v50, %v12026_v15  ;;  %v10889_v13 = vld [vmem:[%s13443_s3 + $0x2b8] sm:$0xff]   ;;  %v10898_v31 = vld [vmem:[%s13443_s3 + $0x2a0] sm:$0xff]  }
 0x294   :  { %10113 = vmatpush3.bf16.msra.mxu0 %v10845_v12  ;;  %v5304_v12 = vsel %vm4548_vm1, %v10865_v17, 0  ;;  %v10892_v17 = vld [vmem:[%s13443_s3 + $0x2b0] sm:$0xff]  }
 0x295   :  { %10131 = vmatpush3.bf16.msra.mxu1 %v10847_v34  ;;  %10552 = vmatprep.subr.bf16.mxu0 %v11185_v63  ;;  %v5133_v34 = vpack.c.bf16 %v5124_v19, %v5124_v19  ;;  %v10893_v19 = vld [vmem:[%s13443_s3 + $0x2e8] sm:$0xff]   ;;  %v10928_v6 = vld [vmem:[%s13443_s3 + $0x374] sm:$0xff]  }
 0x296   :  { %7201 = vrot.lane.b32.xlu1 %v7152_v37, %s11187_s14  ;;  %7496 = vrot.lane.b32.xlu0 %v7447_v3, %s11187_s14  ;;  %v10868_v37 = vld [vmem:[%s13443_s3 + $0x284] sm:$0xff]   ;;  %v10869_v3 = vld [vmem:[%s13443_s3 + $0x254] sm:$0xff]  }
 0x297   :  { %4794 = vmatmul.mubr.bf16.vlgmr.msra.gmra.mxu0 %v4314_v27  ;;  %10132 = vmatprep.subr.bf16.mxu1 %v10848_v26  ;;  %v8614_v26 = vrot.slane %v8605_v50, %v12024_v48 }
 0x298   :  { %10553 = vmatpush3.bf16.msra.mxu0 %v5031_v30  ;;  %10562 = vmatprep.mubr.msk.bf16.mxu0 %vm11186_vm12, %v11185_v63  ;;  %v10870_v30 = vld [vmem:[%s13443_s3 + $0x214] sm:$0xff]  }
 0x299   :  { %10133 = vmatpush3.bf16.msra.mxu1 %v10850_v62  ;;  %10554 = vmatprep.subr.bf16.mxu0 %v11185_v63  ;;  %v8628_v27 = vpack.c.bf16 %v8614_v26, %v8614_v26  ;;  %v8610_v62 = vrot.slane %v8605_v50, %v12022_v41  ;;  %v10907_v26 = vld [vmem:[%s13443_s3 + $0x3d4] ss:$0 sps:$4 sm:$0x33]  }
 0x29a   :  { %7500 = vrot.lane.b32.xlu1 %v7449_v33, %s11187_s14  ;;  %7795 = vrot.lane.b32.xlu0 %v7744_v36, %s11187_s14  ;;  %v8332_v33 = vpack.c.bf16 %v8315_v28, %v8315_v28 }
 0x29b   :  { %10134 = vmatprep.subr.bf16.mxu1 %v10851_v16  ;;  %v10871_v16 = vld [vmem:[%s13443_s3 + $0x27c] sm:$0xff]   ;;  %v8627_v36 = vpack.c.bf16 %v8610_v62, %v8610_v62 }
 0x29c   :  { %10555 = vmatpush3.bf16.msra.mxu0 %v10852_v54  ;;  %v10873_v54 = vld [vmem:[%s13443_s3 + $0x20c] sm:$0xff]  }
 0x29d   :  { %10135 = vmatpush3.bf16.msra.mxu1 %v10853_v40  ;;  %10556 = vmatprep.subr.bf16.mxu0 %v11185_v63  ;;  %v10874_v40 = vld [vmem:[%s13443_s3 + $0x274] sm:$0xff]  }
 0x29e   :  { %7502 = vrot.lane.b32.xlu1 %v7450_v32, %s11187_s14  ;;  %7793 = vrot.lane.b32.xlu0 %v7743_v45, %s11187_s14  ;;  %v10876_v32 = vld [vmem:[%s13443_s3 + $0x204] sm:$0xff]   ;;  %v8622_v45 = vrot.slane %v8605_v50, %v12047_v52  ;;  %v10900_v50 = vld [vmem:[%s13443_s3 + $0x318] sm:$0xff]  }
 0x29f   :  { %10136 = vmatprep.subr.bf16.mxu1 %v10854_v18  ;;  %v8629_v18 = vpack.c.bf16 %v8618_v1, %v8618_v1  ;;  %v10880_v52 = vld [vmem:[%s13443_s3 + $0x308] sm:$0xff]   ;;  %v10914_v1 = vld [vmem:[%s13443_s3 + $0x394] sm:$0xff]  }
 0x2a0   :  { %10557 = vmatpush3.bf16.msra.mxu0 %v10855_v47  ;;  %v12306_v47 = vld [vmem:[#allocation2 + $0x4] ss:$8 sm:$0x7] }
 0x2a1   :  { %10137 = vmatpush3.bf16.msra.mxu1 %v10856_v20  ;;  %10558 = vmatprep.subr.bf16.mxu0 %v11185_v63  ;;  %v5128_v20 = vrot.slane %v12226_v11, %v12026_v15  ;;  %v5401_v21 = vrot.slane %v12306_v47, %v12026_v15 }
 0x2a2   :  { %7797 = vrot.lane.b32.xlu1 %v7745_v35, %s11187_s14  ;;  %8088 = vrot.lane.b32.xlu0 %v8038_v51, %s11187_s14  ;;  %v8630_v35 = vpack.c.bf16 %v8622_v45, %v8622_v45  ;;  %v10879_v51 = vld [vmem:[%s13443_s3 + $0x1fc] sm:$0xff]   ;;  %v12468_v45 = vld [vmem:[#allocation2 + $0x6] ss:$8 sm:$0x7] }
 0x2a3   :  { %10138 = vmatprep.subr.bf16.mxu1 %v10857_v49  ;;  %v5397_v49 = vrot.slane %v12306_v47, %v12024_v48  ;;  %v5134_v8 = vpack.c.bf16 %v5128_v20, %v5128_v20  ;;  %v5407_v28 = vpack.c.bf16 %v5401_v21, %v5401_v21  ;;  %v10922_v20 = vld [vmem:[%s13443_s3 + $0x450] sm:$0xff]  }
 0x2a4   :  { %10559 = vmatpush3.bf16.msra.mxu0 %v10858_v9  ;;  %v10881_v9 = vld [vmem:[%s13443_s3 + $0x2c8] sm:$0xff]   ;;  %v10936_v21 = vld [vmem:[%s13443_s3 + $0x470] sm:$0xff]  }
 0x2a5   :  { %10139 = vmatpush3.bf16.msra.mxu1 %v10859_v38  ;;  %10560 = vmatprep.subr.bf16.mxu0 %v11185_v63  ;;  %v10884_v38 = vld [vmem:[%s13443_s3 + $0x300] sm:$0xff]   ;;  %v5406_v55 = vpack.c.bf16 %v5397_v49, %v5397_v49  ;;  %v5943_v49 = vrot.slane %v12468_v45, %v12024_v48 }
 0x2a6   :  { %7791 = vrot.lane.b32.xlu1 %v7742_v59, %s11187_s14  ;;  %8086 = vrot.lane.b32.xlu0 %v8037_v61, %s11187_s14  ;;  %v10885_v59 = vld [vmem:[%s13443_s3 + $0x2c0] sm:$0xff]   ;;  %v10886_v61 = vld [vmem:[%s13443_s3 + $0x22c] sm:$0xff]  }
 0x2a7   :  { %10140 = vmatprep.subr.bf16.mxu1 %v10860_v57  ;;  %v10883_v57 = vld [vmem:[%s13443_s3 + $0x1f4] sm:$0xff]  }
 0x2a8   :  { %10561 = vmatpush3.bf16.msra.mxu0 %v10861_v42  ;;  %v10888_v42 = vld [vmem:[%s13443_s3 + $0x2f8] sm:$0xff]  }
 0x2a9   :  { %10141 = vmatpush3.bf16.msra.mxu1 %v10862_v22  ;;  %10154 = vmatprep.subr.bf16.mxu0 %v10863_v39  ;;  %v10891_v22 = vld [vmem:[%s13443_s3 + $0x330] ss:$0 sps:$4 sm:$0x33]  }
 0x2aa   :  { %8090 = vrot.lane.b32.xlu1 %v8039_v7, %s11187_s14  ;;  %8385 = vrot.lane.b32.xlu0 %v8334_v2, %s11187_s14  ;;  %v10890_v39 = vld [vmem:[%s13443_s3 + $0x2f0] sm:$0xff]   ;;  %v5577_v11 = vsel %vm4548_vm1, %v10891_v22, 0  ;;  %v10894_v7 = vld [vmem:[%s13443_s3 + $0x328] sm:$0xff]  }
 0x2ab   :  { %10563 = vmatmul.mubr.msk.bf16.vlgmr.msra.gmra.mxu0 %vm4544_vm13, %v4861_v44  ;;  %10566 = vmatprep.subr.bf16.mxu1 %v11185_v63  ;;  %v10895_v2 = vld [vmem:[%s13443_s3 + $0x2a8] sm:$0xff]   ;;  %v10899_v44 = vld [vmem:[%s13443_s3 + $0x2d8] sm:$0xff]  }
 0x2ac   :  { %5066 = vmatmul.mubr.bf16.vlgmr.msra.gmra.mxu1 %v4859_v58  ;;  %10155 = vmatpush3.bf16.msra.mxu0 %v10864_v56  ;;  %v10896_v56 = vld [vmem:[%s13443_s3 + $0x2e0] sm:$0xff]   ;;  %v10901_v58 = vld [vmem:[%s13443_s3 + $0x298] sm:$0xff]  }
 0x2ad   :  { %5338 = vmatprep.mubr.bf16.mxu0 %v5133_v34  ;;  %10567 = vmatpush3.bf16.msra.mxu1 %v5304_v12  ;;  %v10902_v12 = vld [vmem:[%s13443_s3 + $0x2d0] sm:$0xff]  }
 0x2ae   :  { %8092 = vrot.lane.b32.xlu1 %v8040_v60, %s11187_s14  ;;  %8383 = vrot.lane.b32.xlu0 %v8333_v14, %s11187_s14  ;;  %v10903_v34 = vld [vmem:[%s13443_s3 + $0x310] sm:$0xff]  }
 0x2af   :  { %10156 = vmatprep.subr.bf16.mxu0 %v10866_v46  ;;  %10568 = vmatprep.subr.bf16.mxu1 %v11185_v63  ;;  %v12406_v46 = vld [vmem:[#allocation2 + $0x5] ss:$8 sm:$0x7] }
 0x2b0   :  { %10157 = vmatpush3.bf16.msra.mxu0 %v10867_v24  ;;  %10576 = vmatprep.mubr.msk.bf16.mxu1 %vm11186_vm12, %v11185_v63  ;;  %v10904_v60 = vld [vmem:[%s13443_s3 + $0x290] sm:$0xff]   ;;  %v5393_v24 = vrot.slane %v12306_v47, %v12022_v41 }
 0x2b1   :  { %10569 = vmatpush3.bf16.msra.mxu1 %v10868_v37  ;;  %10158 = vmatprep.subr.bf16.mxu0 %v10869_v3  ;;  %v10905_v14 = vld [vmem:[%s13443_s3 + $0x3ac] sm:$0xff]   ;;  %v5670_v37 = vrot.slane %v12406_v46, %v12024_v48  ;;  %v10919_v47 = vld [vmem:[%s13443_s3 + $0x3b4] sm:$0xff]  }
 0x2b2   :  { %8387 = vrot.lane.b32.xlu1 %v8335_v53, %s11187_s14  ;;  %8678 = vrot.lane.b32.xlu0 %v8628_v27, %s11187_s14  ;;  %v10906_v3 = vld [vmem:[%s13443_s3 + $0x36c] sm:$0xff]   ;;  %v5405_v53 = vpack.c.bf16 %v5393_v24, %v5393_v24  ;;  %v5850_v27 = vsel %vm4548_vm1, %v10907_v26, 0 }
 0x2b3   :  { %10570 = vmatprep.subr.bf16.mxu1 %v11185_v63  ;;  %v5679_v62 = vpack.c.bf16 %v5670_v37, %v5670_v37  ;;  %v10939_v37 = vld [vmem:[%s13443_s3 + $0x468] sm:$0xff]  }
 0x2b4   :  { %10159 = vmatpush3.bf16.msra.mxu0 %v10870_v30  ;;  %v10908_v30 = vld [vmem:[%s13443_s3 + $0x3a4] sm:$0xff]  }
 0x2b5   :  { %10571 = vmatpush3.bf16.msra.mxu1 %v10871_v16  ;;  %10160 = vmatprep.subr.bf16.mxu0 %v10872_v29  ;;  %v10909_v16 = vld [vmem:[%s13443_s3 + $0x364] sm:$0xff]   ;;  %v10910_v29 = vld [vmem:[%s13443_s3 + $0x3cc] sm:$0xff]  }
 0x2b6   :  { %8381 = vrot.lane.b32.xlu1 %v8332_v33, %s11187_s14  ;;  %8676 = vrot.lane.b32.xlu0 %v8627_v36, %s11187_s14  ;;  %v10911_v33 = vld [vmem:[%s13443_s3 + $0x39c] sm:$0xff]  }
 0x2b7   :  { %10572 = vmatprep.subr.bf16.mxu1 %v11185_v63  ;;  %v10912_v36 = vld [vmem:[%s13443_s3 + $0x35c] sm:$0xff]  }
 0x2b8   :  { %10161 = vmatpush3.bf16.msra.mxu0 %v10873_v54  ;;  %v10913_v54 = vld [vmem:[%s13443_s3 + $0x3c4] sm:$0xff]  }
 0x2b9   :  { %10573 = vmatpush3.bf16.msra.mxu1 %v10874_v40  ;;  %10162 = vmatprep.subr.bf16.mxu0 %v10875_v43  ;;  %v10915_v40 = vld [vmem:[%s13443_s3 + $0x354] sm:$0xff]   ;;  %v10916_v43 = vld [vmem:[%s13443_s3 + $0x3bc] sm:$0xff]  }
 0x2ba   :  { %8680 = vrot.lane.b32.xlu1 %v8629_v18, %s11187_s14  ;;  %10574 = vmatprep.subr.bf16.mxu1 %v11185_v63  ;;  %v10917_v18 = vld [vmem:[%s13443_s3 + $0x38c] sm:$0xff]  }
 0x2bc   :  { %10163 = vmatpush3.bf16.msra.mxu0 %v10876_v32  ;;  %v10918_v32 = vld [vmem:[%s13443_s3 + $0x34c] sm:$0xff]  }
 0x2bd   :  { %10575 = vmatpush3.bf16.msra.mxu1 %v10877_v5  ;;  %10164 = vmatprep.subr.bf16.mxu0 %v10878_v10  ;;  %v10920_v5 = vld [vmem:[%s13443_s3 + $0x384] sm:$0xff]   ;;  %v5674_v10 = vrot.slane %v12406_v46, %v12026_v15 }
 0x2be   :  { %8682 = vrot.lane.b32.xlu1 %v8630_v35, %s11187_s14  ;;  %10182 = vmatprep.subr.bf16.mxu1 %v10880_v52 }
 0x2c0   :  { %10165 = vmatpush3.bf16.msra.mxu0 %v10879_v51  ;;  %10577 = vmatmul.mubr.msk.bf16.vlgmr.msra.gmra.mxu1 %vm4544_vm13, %v5134_v8  ;;  %v10921_v51 = vld [vmem:[%s13443_s3 + $0x344] sm:$0xff]   ;;  %v5680_v8 = vpack.c.bf16 %v5674_v10, %v5674_v10  ;;  %v10949_v10 = vld [vmem:[%s13443_s3 + $0x51c] ss:$0 sps:$4 sm:$0x33]  }
 0x2c1   :  { %10183 = vmatpush3.bf16.msra.mxu1 %v10881_v9  ;;  %5611 = vmatprep.mubr.bf16.mxu1 %v5406_v55  ;;  %v10923_v9 = vld [vmem:[%s13443_s3 + $0x410] sm:$0xff]  }
 0x2c2   :  { %10166 = vmatprep.subr.bf16.mxu0 %v10882_v23  ;;  %10184 = vmatprep.subr.bf16.mxu1 %v10884_v38  ;;  %v10924_v23 = vld [vmem:[%s13443_s3 + $0x37c] sm:$0xff]   ;;  %v10926_v38 = vld [vmem:[%s13443_s3 + $0x448] sm:$0xff]  }
 0x2c4   :  { %10167 = vmatpush3.bf16.msra.mxu0 %v10883_v57  ;;  %v5952_v57 = vpack.c.bf16 %v5943_v49, %v5943_v49 }
 0x2c5   :  { %10185 = vmatpush3.bf16.msra.mxu1 %v10885_v59  ;;  %10168 = vmatprep.subr.bf16.mxu0 %v10886_v61 }
 0x2c6   :  { %10186 = vmatprep.subr.bf16.mxu1 %v10888_v42  ;;  %v10925_v42 = vld [vmem:[%s13443_s3 + $0x33c] sm:$0xff]  }
 0x2c8   :  { %10169 = vmatpush3.bf16.msra.mxu0 %v10887_v0  ;;  %v10927_v0 = vld [vmem:[%s13443_s3 + $0x408] sm:$0xff]  }
 0x2c9   :  { %10187 = vmatpush3.bf16.msra.mxu1 %v10889_v13  ;;  %10580 = vmatprep.subr.bf16.mxu0 %v11185_v63  ;;  %v10930_v13 = vld [vmem:[%s13443_s3 + $0x440] sm:$0xff]  }
 0x2ca   :  { %10188 = vmatprep.subr.bf16.mxu1 %v10890_v39 }
 0x2cb   :  { %5339 = vmatmul.mubr.bf16.vlgmr.msra.gmra.mxu0 %v5132_v25  ;;  %v10929_v25 = vld [vmem:[%s13443_s3 + $0x334] sm:$0xff]  }
 0x2cc   :  { %10581 = vmatpush3.bf16.msra.mxu0 %v5577_v11  ;;  %10590 = vmatprep.mubr.msk.bf16.mxu0 %vm11186_vm12, %v11185_v63  ;;  %v5666_v11 = vrot.slane %v12406_v46, %v12022_v41 }
 0x2cd   :  { %10189 = vmatpush3.bf16.msra.mxu1 %v10892_v17  ;;  %10582 = vmatprep.subr.bf16.mxu0 %v11185_v63 }
 0x2ce   :  { %10190 = vmatprep.subr.bf16.mxu1 %v10893_v19  ;;  %v10931_v19 = vld [vmem:[%s13443_s3 + $0x400] sm:$0xff]  }
 0x2d0   :  { %10583 = vmatpush3.bf16.msra.mxu0 %v10894_v7  ;;  %v10933_v7 = vld [vmem:[%s13443_s3 + $0x478] ss:$0 sps:$4 sm:$0x33]  }
 0x2d1   :  { %10191 = vmatpush3.bf16.msra.mxu1 %v10895_v2  ;;  %10584 = vmatprep.subr.bf16.mxu0 %v11185_v63  ;;  %v10932_v2 = vld [vmem:[%s13443_s3 + $0x438] sm:$0xff]  }
 0x2d2   :  { %10192 = vmatprep.subr.bf16.mxu1 %v10896_v56 }
 0x2d4   :  { %10585 = vmatpush3.bf16.msra.mxu0 %v10897_v4 }
 0x2d5   :  { %10193 = vmatpush3.bf16.msra.mxu1 %v10898_v31  ;;  %10586 = vmatprep.subr.bf16.mxu0 %v11185_v63 }
 0x2d6   :  { %10194 = vmatprep.subr.bf16.mxu1 %v10899_v44  ;;  %v5678_v44 = vpack.c.bf16 %v5666_v11, %v5666_v11 }
 0x2d8   :  { %10587 = vmatpush3.bf16.msra.mxu0 %v10900_v50  ;;  %v6123_v50 = vsel %vm4548_vm1, %v10933_v7, 0  ;;  %v10956_v7 = vld [vmem:[%s13443_s3 + $0x4dc] sm:$0xff]  }
 0x2d9   :  { %10195 = vmatpush3.bf16.msra.mxu1 %v10901_v58  ;;  %10588 = vmatprep.subr.bf16.mxu0 %v11185_v63  ;;  %v10934_v58 = vld [vmem:[%s13443_s3 + $0x3f8] sm:$0xff]  }
 0x2da   :  { %10196 = vmatprep.subr.bf16.mxu1 %v10902_v12  ;;  %v10935_v12 = vld [vmem:[%s13443_s3 + $0x430] sm:$0xff]  }
 0x2dc   :  { %10589 = vmatpush3.bf16.msra.mxu0 %v10903_v34 }
 0x2dd   :  { %10197 = vmatpush3.bf16.msra.mxu1 %v10904_v60  ;;  %10210 = vmatprep.subr.bf16.mxu0 %v10905_v14  ;;  %v10937_v60 = vld [vmem:[%s13443_s3 + $0x3f0] sm:$0xff]   ;;  %v10938_v14 = vld [vmem:[%s13443_s3 + $0x428] sm:$0xff]  }
 0x2de   :  { %10594 = vmatprep.subr.bf16.mxu1 %v11185_v63 }
 0x2df   :  { %10591 = vmatmul.mubr.msk.bf16.vlgmr.msra.gmra.mxu0 %vm4544_vm13, %v5407_v28  ;;  %v10940_v28 = vld [vmem:[%s13443_s3 + $0x3e8] sm:$0xff]  }
 0x2e0   :  { %5612 = vmatmul.mubr.bf16.vlgmr.msra.gmra.mxu1 %v5405_v53  ;;  %10211 = vmatpush3.bf16.msra.mxu0 %v10906_v3  ;;  %v10941_v53 = vld [vmem:[%s13443_s3 + $0x420] sm:$0xff]  }
 0x2e1   :  { %5884 = vmatprep.mubr.bf16.mxu0 %v5679_v62  ;;  %10595 = vmatpush3.bf16.msra.mxu1 %v5850_v27  ;;  %v10942_v62 = vld [vmem:[%s13443_s3 + $0x460] sm:$0xff]  }
 0x2e2   :  { %10212 = vmatprep.subr.bf16.mxu0 %v10908_v30  ;;  %10596 = vmatprep.subr.bf16.mxu1 %v11185_v63 }
 0x2e3   :  { %10604 = vmatprep.mubr.msk.bf16.mxu1 %vm11186_vm12, %v11185_v63 }
 0x2e4   :  { %10213 = vmatpush3.bf16.msra.mxu0 %v10909_v16 }
 0x2e5   :  { %10597 = vmatpush3.bf16.msra.mxu1 %v10910_v29  ;;  %10214 = vmatprep.subr.bf16.mxu0 %v10911_v33  ;;  %v10943_v29 = vld [vmem:[%s13443_s3 + $0x3e0] sm:$0xff]   ;;  %v10944_v33 = vld [vmem:[%s13443_s3 + $0x418] sm:$0xff]  }
 0x2e6   :  { %10598 = vmatprep.subr.bf16.mxu1 %v11185_v63 }
 0x2e8   :  { %10215 = vmatpush3.bf16.msra.mxu0 %v10912_v36 }
 0x2e9   :  { %10599 = vmatpush3.bf16.msra.mxu1 %v10913_v54  ;;  %10216 = vmatprep.subr.bf16.mxu0 %v10914_v1  ;;  %v10945_v1 = vld [vmem:[%s13443_s3 + $0x458] sm:$0xff]  }
 0x2ea   :  { %10600 = vmatprep.subr.bf16.mxu1 %v11185_v63 }
 0x2ec   :  { %10217 = vmatpush3.bf16.msra.mxu0 %v10915_v40  ;;  %v12604_v40 = vld [vmem:[#allocation2 + $0x7] ss:$8 sm:$0x7] }
 0x2ed   :  { %10601 = vmatpush3.bf16.msra.mxu1 %v10916_v43  ;;  %10218 = vmatprep.subr.bf16.mxu0 %v10917_v18  ;;  %v5947_v43 = vrot.slane %v12468_v45, %v12026_v15  ;;  %v10946_v18 = vld [vmem:[%s13443_s3 + $0x3d8] sm:$0xff]  }
 0x2ee   :  { %10602 = vmatprep.subr.bf16.mxu1 %v11185_v63 }
 0x2ef   :  { %v12482_v52 = vpop.permute.xlu1 %6684 }
 0x2f0   :  { %v12486_v35 = vpop.permute.xlu0 %6682  ;;  %10219 = vmatpush3.bf16.msra.mxu0 %v10918_v32  ;;  %v10947_v32 = vld [vmem:[%s13443_s3 + $0x4f4] sm:$0xff]  }
 0x2f1   :  { %10603 = vmatpush3.bf16.msra.mxu1 %v10919_v47  ;;  %10220 = vmatprep.subr.bf16.mxu0 %v10920_v5  ;;  %v5939_v5 = vrot.slane %v12468_v45, %v12022_v41 }
 0x2f2   :  { %10238 = vmatprep.subr.bf16.mxu1 %v10922_v20  ;;  %v6216_v20 = vrot.slane %v12604_v40, %v12024_v48  ;;  %v10950_v48 = vld [vmem:[%s13443_s3 + $0x4ec] sm:$0xff]  }
 0x2f3   :  { %v6687_v55 = vpop.permute.xlu1 %6686  ;;  %v5951_v45 = vpack.c.bf16 %v5939_v5, %v5939_v5  ;;  %v10967_v5 = vld [vmem:[%s13443_s3 + $0x47c] sm:$0xff]  }
 0x2f4   :  { %v12502_v59 = vsel %vm6688_vm2, %v12482_v52, %v6687_v55  ;;  %v6910_v61 = vpop.permute.xlu0 %6909  ;;  %10221 = vmatpush3.bf16.msra.mxu0 %v10921_v51  ;;  %10605 = vmatmul.mubr.msk.bf16.vlgmr.msra.gmra.mxu1 %vm4544_vm13, %v5680_v8  ;;  %v5953_v8 = vpack.c.bf16 %v5947_v43, %v5947_v43  ;;  %v10966_v43 = vld [vmem:[%s13443_s3 + $0x4bc] sm:$0xff]  }
 0x2f5   :  { %10239 = vmatpush3.bf16.msra.mxu1 %v10923_v9  ;;  %6157 = vmatprep.mubr.bf16.mxu1 %v5952_v57  ;;  %v10948_v9 = vld [vmem:[%s13443_s3 + $0x4b4] sm:$0xff]  }
 0x2f6   :  { %10222 = vmatprep.subr.bf16.mxu0 %v10924_v23  ;;  %10240 = vmatprep.subr.bf16.mxu1 %v10926_v38  ;;  %v6396_v23 = vsel %vm4548_vm1, %v10949_v10, 0  ;;  %v6225_v38 = vpack.c.bf16 %v6216_v20, %v6216_v20  ;;  %v6212_v10 = vrot.slane %v12604_v40, %v12022_v41  ;;  %v10968_v20 = vld [vmem:[%s13443_s3 + $0x11c] sm:$0xff]   ;;  %v10970_v41 = vld [vmem:[%s13443_s3 + $0x114] sm:$0xff]  }
 0x2f7   :  { %v12517_v22 = vpop.permute.xlu1 %6680 }
 0x2f8   :  { %v6908_v39 = vpop.permute.xlu0 %6907  ;;  %10223 = vmatpush3.bf16.msra.mxu0 %v10925_v42 }
 0x2f9   :  { %v12525_v17 = vsel %vm6688_vm2, %v6908_v39, %v6910_v61  ;;  %10241 = vmatpush3.bf16.msra.mxu1 %v10927_v0  ;;  %10224 = vmatprep.subr.bf16.mxu0 %v10928_v6  ;;  %v10952_v0 = vld [vmem:[%s13443_s3 + $0x514] sm:$0xff]   ;;  %v10953_v6 = vld [vmem:[%s13443_s3 + $0x4e4] sm:$0xff]  }
 0x2fa   :  { %10242 = vmatprep.subr.bf16.mxu1 %v10930_v13 }
 0x2fb   :  { %v12536_v56 = vpop.permute.xlu1 %6911 }
 0x2fc   :  { %v12538_v4 = vpop.permute.xlu0 %7205  ;;  %10225 = vmatpush3.bf16.msra.mxu0 %v10929_v25  ;;  %v12542_v31 = vsel %vm6688_vm2, %v6910_v61, %v12536_v56  ;;  %v10951_v61 = vld [vmem:[%s13443_s3 + $0x4ac] sm:$0xff]   ;;  %v10954_v25 = vld [vmem:[%s13443_s3 + $0x4a4] sm:$0xff]  }
 0x2fd   :  { %10243 = vmatpush3.bf16.msra.mxu1 %v10931_v19  ;;  %10608 = vmatprep.subr.bf16.mxu0 %v11185_v63  ;;  %v10955_v19 = vld [vmem:[%s13443_s3 + $0x50c] sm:$0xff]  }
 0x2fe   :  { %10244 = vmatprep.subr.bf16.mxu1 %v10932_v2 }
 0x2ff   :  { %5885 = vmatmul.mubr.bf16.vlgmr.msra.gmra.mxu0 %v5678_v44  ;;  %v10957_v44 = vld [vmem:[%s13443_s3 + $0x49c] sm:$0xff]  }
 0x300   :  { %v12552_v34 = vpop.permute.xlu1 %6913  ;;  %v12554_v46 = vpop.permute.xlu0 %7203  ;;  %10609 = vmatpush3.bf16.msra.mxu0 %v6123_v50  ;;  %10618 = vmatprep.mubr.msk.bf16.mxu0 %vm11186_vm12, %v11185_v63  ;;  %v10958_v50 = vld [vmem:[%s13443_s3 + $0x504] sm:$0xff]  }
 0x301   :  { %10245 = vmatpush3.bf16.msra.mxu1 %v10934_v58  ;;  %10610 = vmatprep.subr.bf16.mxu0 %v11185_v63  ;;  %v10959_v58 = vld [vmem:[%s13443_s3 + $0x4d4] sm:$0xff]  }
 0x302   :  { %10246 = vmatprep.subr.bf16.mxu1 %v10935_v12 }
 0x304   :  { %v7208_v24 = vpop.permute.xlu1 %7207  ;;  %v7499_v26 = vpop.permute.xlu0 %7498  ;;  %10611 = vmatpush3.bf16.msra.mxu0 %v10936_v21 }
 0x305   :  { %v12573_v3 = vsel %vm6688_vm2, %v12538_v4, %v7208_v24  ;;  %10247 = vmatpush3.bf16.msra.mxu1 %v10937_v60  ;;  %10612 = vmatprep.subr.bf16.mxu0 %v11185_v63  ;;  %v10961_v24 = vld [vmem:[%s13443_s3 + $0x4fc] sm:$0xff]  }
 0x306   :  { %10248 = vmatprep.subr.bf16.mxu1 %v10938_v14  ;;  %v10960_v14 = vld [vmem:[%s13443_s3 + $0x494] sm:$0xff]  }
 0x308   :  { %v12582_v27 = vpop.permute.xlu1 %7201  ;;  %v7497_v30 = vpop.permute.xlu0 %7496  ;;  %10613 = vmatpush3.bf16.msra.mxu0 %v10939_v37  ;;  %v6220_v37 = vrot.slane %v12604_v40, %v12026_v15  ;;  %v6690_v40 = vsel %vm6688_vm2, %v12486_v35, %v12482_v52  ;;  %v10974_v52 = vld [vmem:[%s13443_s3 + $0x104] sm:$0xff]  }
 0x309   :  { %v12588_v16 = vsel %vm6688_vm2, %v7497_v30, %v7499_v26  ;;  %10249 = vmatpush3.bf16.msra.mxu1 %v10940_v28  ;;  %10614 = vmatprep.subr.bf16.mxu0 %v11185_v63 }
 0x30a   :  { %10250 = vmatprep.subr.bf16.mxu1 %v10941_v53  ;;  %v10963_v53 = vld [vmem:[%s13443_s3 + $0x48c] sm:$0xff]  }
 0x30c   :  { %v12597_v36 = vpop.permute.xlu1 %7500  ;;  %v12599_v54 = vpop.permute.xlu0 %7795  ;;  %10615 = vmatpush3.bf16.msra.mxu0 %v10942_v62  ;;  %v10964_v62 = vld [vmem:[%s13443_s3 + $0x4c4] sm:$0xff]  }
 0x30d   :  { %10251 = vmatpush3.bf16.msra.mxu1 %v10943_v29  ;;  %10616 = vmatprep.subr.bf16.mxu0 %v11185_v63  ;;  %v12617_v47 = vsel %vm6688_vm2, %v7499_v26, %v12597_v36  ;;  %v10962_v26 = vld [vmem:[%s13443_s3 + $0x4cc] sm:$0xff]   ;;  %v6226_v29 = vpack.c.bf16 %v6220_v37, %v6220_v37 }
 0x30e   :  { %10252 = vmatprep.subr.bf16.mxu1 %v10944_v33  ;;  %v10980_v37 = vld [vmem:[%s13443_s3 + $0xec] sm:$0xff]  }
 0x310   :  { %v12626_v49 = vpop.permute.xlu1 %7502  ;;  %v12628_v51 = vpop.permute.xlu0 %7793  ;;  %10617 = vmatpush3.bf16.msra.mxu0 %v10945_v1  ;;  %v10965_v1 = vld [vmem:[%s13443_s3 + $0x484] sm:$0xff]  }
 0x311   :  { %10253 = vmatpush3.bf16.msra.mxu1 %v10946_v18  ;;  %10266 = vmatprep.subr.bf16.mxu0 %v10947_v32 }
 0x312   :  { %10622 = vmatprep.subr.bf16.mxu1 %v11185_v63 }
 0x313   :  { %10619 = vmatmul.mubr.msk.bf16.vlgmr.msra.gmra.mxu0 %vm4544_vm13, %v5953_v8  ;;  %v10969_v8 = vld [vmem:[%s13443_s3 + $0xdc] sm:$0xff]  }
 0x314   :  { %v7798_v55 = vpop.permute.xlu1 %7797  ;;  %v8089_v57 = vpop.permute.xlu0 %8088  ;;  %6158 = vmatmul.mubr.bf16.vlgmr.msra.gmra.mxu1 %v5951_v45  ;;  %10267 = vmatpush3.bf16.msra.mxu0 %v10948_v9  ;;  %v6224_v45 = vpack.c.bf16 %v6212_v10, %v6212_v10 }
 0x315   :  { %v12644_v42 = vsel %vm6688_vm2, %v12599_v54, %v7798_v55  ;;  %6430 = vmatprep.mubr.bf16.mxu0 %v6225_v38  ;;  %10623 = vmatpush3.bf16.msra.mxu1 %v6396_v23  ;;  %v10971_v23 = vld [vmem:[%s13443_s3 + $0xd4] sm:$0xff]  }
 0x316   :  { %10268 = vmatprep.subr.bf16.mxu0 %v10950_v48  ;;  %10624 = vmatprep.subr.bf16.mxu1 %v11185_v63  ;;  %v10972_v48 = vld [vmem:[%s13443_s3 + $0x10c] sm:$0xff]  }
 0x317   :  { %10632 = vmatprep.mubr.msk.bf16.mxu1 %vm11186_vm12, %v11185_v63 }
 0x318   :  { %v12655_v13 = vpop.permute.xlu1 %7791  ;;  %v8087_v39 = vpop.permute.xlu0 %8086  ;;  %10269 = vmatpush3.bf16.msra.mxu0 %v10951_v61 }
 0x319   :  { %v12661_v11 = vsel %vm6688_vm2, %v8087_v39, %v8089_v57  ;;  %10625 = vmatpush3.bf16.msra.mxu1 %v10952_v0  ;;  %10270 = vmatprep.subr.bf16.mxu0 %v10953_v6 }
 0x31a   :  { %10626 = vmatprep.subr.bf16.mxu1 %v11185_v63 }
 0x31c   :  { %v12670_v2 = vpop.permute.xlu1 %8090  ;;  %10271 = vmatpush3.bf16.msra.mxu0 %v10954_v25  ;;  %v12686_v21 = vpop.permute.xlu0 %8385 }
 0x31d   :  { %10627 = vmatpush3.bf16.msra.mxu1 %v10955_v19  ;;  %10272 = vmatprep.subr.bf16.mxu0 %v10956_v7  ;;  %v12683_v12 = vsel %vm6688_vm2, %v8089_v57, %v12670_v2  ;;  %v10973_v57 = vld [vmem:[%s13443_s3 + $0xcc] sm:$0xff]   ;;  %v10975_v19 = vld [vmem:[%s13443_s3 + $0xc4] sm:$0xff]  }
 0x31e   :  { %10628 = vmatprep.subr.bf16.mxu1 %v11185_v63 }
 0x320   :  { %v12688_v60 = vpop.permute.xlu1 %8092  ;;  %10273 = vmatpush3.bf16.msra.mxu0 %v10957_v44  ;;  %v12712_v15 = vpop.permute.xlu0 %8383 }
 0x321   :  { %10629 = vmatpush3.bf16.msra.mxu1 %v10958_v50  ;;  %10274 = vmatprep.subr.bf16.mxu0 %v10959_v58  ;;  %v10976_v50 = vld [vmem:[%s13443_s3 + $0xfc] sm:$0xff]  }
 0x322   :  { %10630 = vmatprep.subr.bf16.mxu1 %v11185_v63 }
 0x324   :  { %v8388_v28 = vpop.permute.xlu1 %8387  ;;  %10275 = vmatpush3.bf16.msra.mxu0 %v10960_v14  ;;  %v12726_v18 = vpop.permute.xlu0 %8678  ;;  %v10977_v14 = vld [vmem:[%s13443_s3 + $0xbc] sm:$0xff]  }
 0x325   :  { %v12707_v30 = vsel %vm6688_vm2, %v12686_v21, %v8388_v28  ;;  %10631 = vmatpush3.bf16.msra.mxu1 %v10961_v24  ;;  %10276 = vmatprep.subr.bf16.mxu0 %v10962_v26  ;;  %v10978_v24 = vld [vmem:[%s13443_s3 + $0xf4] sm:$0xff]   ;;  %v10981_v28 = vld [vmem:[%s13443_s3 + $0xac] sm:$0xff]  }
 0x326   :  { %10636 = vmatprep.subr.bf16.mxu1 %v11185_v63  ;;  %v10979_v26 = vld [vmem:[%s13443_s3 + $0xb4] sm:$0xff]  }
 0x328   :  { %v12715_v33 = vpop.permute.xlu1 %8381  ;;  %10277 = vmatpush3.bf16.msra.mxu0 %v10963_v53  ;;  %10633 = vmatmul.mubr.msk.bf16.vlgmr.msra.gmra.mxu1 %vm4544_vm13, %v6226_v29  ;;  %v10982_v53 = vld [vmem:[%s13443_s3 + $0xe4] sm:$0xff]  }
 0x329   :  { %10278 = vmatprep.subr.bf16.mxu0 %v10964_v62  ;;  %10640 = vmatprep.mubr.msk.bf16.mxu1 %vm11186_vm12, %v11185_v63  ;;  %v10983_v29 = vld [vmem:[%s13443_s3 + $0xa4] sm:$0xff]  }
 0x32c   :  { %v12728_v32 = vpop.permute.xlu1 %8680  ;;  %10279 = vmatpush3.bf16.msra.mxu0 %v10965_v1  ;;  %v10984_v1 = vld [vmem:[%s13443_s3 + $0xa0] ss:$0 sps:$4 sm:$0x33]  }
 0x32d   :  { %10280 = vmatprep.subr.bf16.mxu0 %v10966_v43  ;;  %v12741_v9 = vsel %vm6688_vm2, %v12726_v18, %v12728_v32  ;;  %v7047_v10 = vsel %vm4548_vm1, %v10984_v1, 0 }
 0x330   :  { %10281 = vmatpush3.bf16.msra.mxu0 %v10967_v5 }
 0x331   :  { %10297 = vmatprep.subr.bf16.mxu0 %v10968_v20  ;;  %v6689_v20 = vsel %vm6688_vm2, %v12517_v22, %v12486_v35 }
 0x333   :  { %6431 = vmatmul.mubr.bf16.vlgmr.msra.gmra.mxu0 %v6224_v45  ;;  %v10985_v45 = vld [vmem:[%s13443_s3 + $0x98] sm:$0xff]  }
 0x334   :  { %10298 = vmatpush3.bf16.msra.mxu0 %v10969_v8  ;;  %6855 = vmatprep.mubr.bf16.mxu0 %v6690_v40  ;;  %v10986_v40 = vld [vmem:[%s13443_s3 + $0x90] sm:$0xff]  }
 0x335   :  { %10299 = vmatprep.subr.bf16.mxu0 %v10970_v41 }
 0x337   :  { %v4626_v38 = vpop.f32.mrf.mxu0 }
 0x338   :  { %10300 = vmatpush3.bf16.msra.mxu0 %v10971_v23  ;;  %v10086_v55 = vpop.f32.mrf.mxu1 }
 0x339   :  { %v10536_v61 = vpop.f32.mrf.mxu0  ;;  %10301 = vmatprep.subr.bf16.mxu0 %v10972_v48 }
 0x33a   :  { %v10087_v0 = vpop.f32.mrf.mxu1  ;;  %v10988_v61 = vld [vmem:[%s13443_s3 + $0x80] sm:$0xff]  }
 0x33b   :  { %v10088_v6 = vadd.f32 %v10087_v0, %v10086_v55  ;;  %v4629_v39 = vpop.f32.mrf.mxu0  ;;  %v10990_v0 = vld [vmem:[%s13443_s3 + $0x180] sm:$0xff]  }
 0x33c   :  { %10302 = vmatpush3.bf16.msra.mxu0 %v10973_v57  ;;  %v10089_v25 = vpop.f32.mrf.mxu1  ;;  %v6917_v39 = vsel %vm6688_vm2, %v12536_v56, %v12552_v34  ;;  %v10994_v56 = vld [vmem:[%s13443_s3 + $0x170] sm:$0xff]  }
 0x33d   :  { %v4627_v7 = vadd.f32 %v10088_v6, %v4626_v38  ;;  %v10537_v44 = vpop.f32.mrf.mxu0  ;;  %10303 = vmatprep.subr.bf16.mxu0 %v10974_v52  ;;  %v10987_v38 = vld [vmem:[%s13443_s3 + $0x88] sm:$0xff]   ;;  %v10989_v52 = vld [vmem:[%s13443_s3 + $0x1c0] sm:$0xff]   ;;  %v10991_v6 = vld [vmem:[%s13443_s3 + $0x1b8] sm:$0xff]   ;;  %v7210_v25 = vsel %vm6688_vm2, %v12554_v46, %v12538_v4 }
 0x33e   :  { %v10090_v58 = vpop.f32.mrf.mxu1  ;;  %v10995_v4 = vld [vmem:[%s13443_s3 + $0x1a8] sm:$0xff]  }
 0x340   :  { %10304 = vmatpush3.bf16.msra.mxu0 %v10975_v19  ;;  %v10992_v19 = vld [vmem:[%s13443_s3 + $0x178] sm:$0xff]  }
 0x341   :  { %10305 = vmatprep.subr.bf16.mxu0 %v10976_v50 }
 0x344   :  { %10306 = vmatpush3.bf16.msra.mxu0 %v10977_v14 }
 0x345   :  { %10307 = vmatprep.subr.bf16.mxu0 %v10978_v24 }
 0x348   :  { %10308 = vmatpush3.bf16.msra.mxu0 %v10979_v26 }
 0x349   :  { %10309 = vmatprep.subr.bf16.mxu0 %v10980_v37  ;;  %v10996_v37 = vld [vmem:[%s13443_s3 + $0x168] sm:$0xff]  }
 0x34c   :  { %v4835_v62 = vpop.f32.mrf.mxu1  ;;  %10310 = vmatpush3.bf16.msra.mxu0 %v10981_v28 }
 0x34d   :  { %10311 = vmatprep.subr.bf16.mxu0 %v10982_v53 }
 0x34e   :  { %v10550_v43 = vpop.f32.mrf.mxu1 }
 0x34f   :  { %v10998_v43 = vld [vmem:[%s13443_s3 + $0x160] sm:$0xff]  }
 0x350   :  { %v4838_v5 = vpop.f32.mrf.mxu1  ;;  %10312 = vmatpush3.bf16.msra.mxu0 %v10983_v29 }
 0x351   :  { %10658 = vmatprep.subr.bf16.mxu0 %v11185_v63  ;;  %v10999_v5 = vld [vmem:[%s13443_s3 + $0x198] sm:$0xff]  }
 0x352   :  { %v10551_v8 = vpop.f32.mrf.mxu1 }
 0x353   :  { %6856 = vmatmul.mubr.bf16.vlgmr.msra.gmra.mxu0 %v6689_v20  ;;  %v11001_v20 = vld [vmem:[%s13443_s3 + $0x190] sm:$0xff]  }
 0x354   :  { %10659 = vmatpush3.bf16.msra.mxu0 %v7047_v10  ;;  %10668 = vmatprep.mubr.msk.bf16.mxu0 %vm11186_vm12, %v11185_v63  ;;  %v11000_v10 = vld [vmem:[%s13443_s3 + $0x158] sm:$0xff]   ;;  %v11002_v8 = vld [vmem:[%s13443_s3 + $0x150] sm:$0xff]  }
 0x355   :  { %10660 = vmatprep.subr.bf16.mxu0 %v11185_v63 }
 0x357   :  { %v10114_v41 = vpop.f32.mrf.mxu0 }
 0x358   :  { %10661 = vmatpush3.bf16.msra.mxu0 %v10985_v45  ;;  %v11003_v45 = vld [vmem:[%s13443_s3 + $0x188] sm:$0xff]  }
 0x359   :  { %v10115_v23 = vpop.f32.mrf.mxu0  ;;  %10662 = vmatprep.subr.bf16.mxu0 %v11185_v63 }
 0x35a   :  { %v10116_v35 = vadd.f32 %v10115_v23, %v10114_v41  ;;  %v12875_v23 = vld [vmem:[%s13445_s5 + $0x8] sm:$0xff]  }
 0x35b   :  { %v10117_v22 = vpop.f32.mrf.mxu0  ;;  %10637 = vmatpush3.bf16.msra.mxu1 %v12875_v23 }
 0x35c   :  { %v4796_v48 = vadd.f32 %v10116_v35, %v4627_v7  ;;  %10663 = vmatpush3.bf16.msra.mxu0 %v10986_v40  ;;  %v10993_v7 = vld [vmem:[%s13443_s3 + $0x1b0] sm:$0xff]   ;;  %v11004_v40 = vld [vmem:[%s13443_s3 + $0x148] sm:$0xff]   ;;  %10638 = vmatprep.subr.bf16.mxu1 %v11185_v63 }
 0x35d   :  { %v10118_v55 = vpop.f32.mrf.mxu0  ;;  %10664 = vmatprep.subr.bf16.mxu0 %v11185_v63  ;;  %v11005_v35 = vld [vmem:[%s13443_s3 + $0x28c] ss:$0 sps:$4 sm:$0x33]  }
 0x35e   :  { %v4836_v57 = vadd.f32 %v4835_v62, %v4796_v48  ;;  %v10997_v62 = vld [vmem:[%s13443_s3 + $0x1a0] sm:$0xff]   ;;  %v7636_v55 = vsel %vm4548_vm1, %v11005_v35, 0 }
 0x35f   :  { %v12884_v48 = vld [vmem:[%s13445_s5] sm:$0xff]  }
 0x360   :  { %10665 = vmatpush3.bf16.msra.mxu0 %v10987_v38  ;;  %10639 = vmatpush3.bf16.msra.mxu1 %v12884_v48  ;;  %v11021_v35 = vld [vmem:[%s13443_s3 + $0x2a0] sm:$0xff]  }
 0x361   :  { %10666 = vmatprep.subr.bf16.mxu0 %v11185_v63  ;;  %10644 = vmatprep.subr.bf16.mxu1 %v11185_v63 }
 0x364   :  { %10667 = vmatpush3.bf16.msra.mxu0 %v10988_v61 }
 0x365   :  { %10353 = vmatprep.subr.bf16.mxu0 %v10989_v52  ;;  %v11006_v52 = vld [vmem:[%s13443_s3 + $0x284] sm:$0xff]  }
 0x367   :  { %10669 = vmatmul.mubr.msk.bf16.vlgmr.msra.gmra.mxu0 %vm4544_vm13, %v6917_v39 }
 0x368   :  { %10354 = vmatpush3.bf16.msra.mxu0 %v10990_v0  ;;  %7375 = vmatprep.mubr.bf16.mxu0 %v7210_v25 }
 0x369   :  { %10355 = vmatprep.subr.bf16.mxu0 %v10991_v6 }
 0x36b   :  { %v5107_v44 = vpop.f32.mrf.mxu0 }
 0x36c   :  { %v10142_v50 = vpop.f32.mrf.mxu1  ;;  %10356 = vmatpush3.bf16.msra.mxu0 %v10992_v19  ;;  %v11008_v19 = vld [vmem:[%s13443_s3 + $0x274] sm:$0xff]  }
 0x36d   :  { %v10564_v34 = vpop.f32.mrf.mxu0  ;;  %10357 = vmatprep.subr.bf16.mxu0 %v10993_v7 }
 0x36e   :  { %v10143_v58 = vpop.f32.mrf.mxu1  ;;  %v11011_v34 = vld [vmem:[%s13443_s3 + $0x2c8] sm:$0xff]  }
 0x36f   :  { %v10144_v14 = vadd.f32 %v10143_v58, %v10142_v50  ;;  %v5110_v24 = vpop.f32.mrf.mxu0  ;;  %v11009_v50 = vld [vmem:[%s13443_s3 + $0x26c] sm:$0xff]   ;;  %v7506_v58 = vsel %vm6688_vm2, %v12597_v36, %v12626_v49  ;;  %v11015_v36 = vld [vmem:[%s13443_s3 + $0x2b8] sm:$0xff]  }
 0x370   :  { %v10145_v26 = vpop.f32.mrf.mxu1  ;;  %10358 = vmatpush3.bf16.msra.mxu0 %v10994_v56  ;;  %v11010_v56 = vld [vmem:[%s13443_s3 + $0x308] sm:$0xff]   ;;  %v11013_v24 = vld [vmem:[%s13443_s3 + $0x2c0] sm:$0xff]  }
 0x371   :  { %v5108_v28 = vadd.f32 %v10144_v14, %v5107_v44  ;;  %v10565_v53 = vpop.f32.mrf.mxu0  ;;  %10359 = vmatprep.subr.bf16.mxu0 %v10995_v4  ;;  %v11012_v4 = vld [vmem:[%s13443_s3 + $0x300] sm:$0xff]   ;;  %v7800_v14 = vsel %vm6688_vm2, %v12628_v51, %v12599_v54  ;;  %v11014_v26 = vld [vmem:[%s13443_s3 + $0x2f8] sm:$0xff]   ;;  %v11016_v54 = vld [vmem:[%s13443_s3 + $0x2f0] sm:$0xff]  }
 0x372   :  { %v10146_v29 = vpop.f32.mrf.mxu1 }
 0x373   :  { %v5113_v1 = vadd.f32 %v5108_v28, %v4836_v57  ;;  %v7209_v57 = vsel %vm6688_vm2, %v12582_v27, %v12554_v46  ;;  %v11007_v46 = vld [vmem:[%s13443_s3 + $0x27c] sm:$0xff]  }
 0x374   :  { %10360 = vmatpush3.bf16.msra.mxu0 %v10996_v37 }
 0x375   :  { %10361 = vmatprep.subr.bf16.mxu0 %v10997_v62 }
 0x378   :  { %10362 = vmatpush3.bf16.msra.mxu0 %v10998_v43  ;;  %v11017_v43 = vld [vmem:[%s13443_s3 + $0x2b0] sm:$0xff]  }
 0x379   :  { %10363 = vmatprep.subr.bf16.mxu0 %v10999_v5 }
 0x37c   :  { %10364 = vmatpush3.bf16.msra.mxu0 %v11000_v10 }
 0x37d   :  { %10365 = vmatprep.subr.bf16.mxu0 %v11001_v20  ;;  %v11018_v20 = vld [vmem:[%s13443_s3 + $0x2e8] sm:$0xff]  }
 0x380   :  { %v5380_v41 = vpop.f32.mrf.mxu1  ;;  %10366 = vmatpush3.bf16.msra.mxu0 %v11002_v8 }
 0x381   :  { %10367 = vmatprep.subr.bf16.mxu0 %v11003_v45 }
 0x382   :  { %v10578_v22 = vpop.f32.mrf.mxu1 }
 0x383   :  { %v11022_v22 = vld [vmem:[%s13443_s3 + $0x2d8] sm:$0xff]  }
 0x384   :  { %v5383_v38 = vpop.f32.mrf.mxu1  ;;  %10368 = vmatpush3.bf16.msra.mxu0 %v11004_v40  ;;  %v11020_v40 = vld [vmem:[%s13443_s3 + $0x2e0] sm:$0xff]  }
 0x385   :  { %10686 = vmatprep.subr.bf16.mxu0 %v11185_v63  ;;  %v11023_v38 = vld [vmem:[%s13443_s3 + $0x298] sm:$0xff]  }
 0x386   :  { %v10579_v61 = vpop.f32.mrf.mxu1 }
 0x387   :  { %7376 = vmatmul.mubr.bf16.vlgmr.msra.gmra.mxu0 %v7209_v57  ;;  %v11025_v61 = vld [vmem:[%s13443_s3 + $0x290] sm:$0xff]  }
 0x388   :  { %10687 = vmatpush3.bf16.msra.mxu0 %v7636_v55  ;;  %10696 = vmatprep.mubr.msk.bf16.mxu0 %vm11186_vm12, %v11185_v63  ;;  %v11024_v55 = vld [vmem:[%s13443_s3 + $0x2d0] sm:$0xff]  }
 0x389   :  { %10688 = vmatprep.subr.bf16.mxu0 %v11185_v63 }
 0x38b   :  { %v10170_v0 = vpop.f32.mrf.mxu0 }
 0x38c   :  { %10689 = vmatpush3.bf16.msra.mxu0 %v11006_v52  ;;  %v11026_v52 = vld [vmem:[%s13443_s3 + $0x3d4] ss:$0 sps:$4 sm:$0x33]  }
 0x38d   :  { %v10171_v27 = vpop.f32.mrf.mxu0  ;;  %10690 = vmatprep.subr.bf16.mxu0 %v11185_v63 }
 0x38e   :  { %v10172_v6 = vadd.f32 %v10171_v27, %v10170_v0  ;;  %v8226_v27 = vsel %vm4548_vm1, %v11026_v52, 0 }
 0x38f   :  { %v10173_v39 = vpop.f32.mrf.mxu0 }
 0x390   :  { %v5381_v25 = vadd.f32 %v10172_v6, %v5380_v41  ;;  %10691 = vmatpush3.bf16.msra.mxu0 %v11007_v46  ;;  %v11019_v41 = vld [vmem:[%s13443_s3 + $0x2a8] sm:$0xff]   ;;  %v7799_v6 = vsel %vm6688_vm2, %v12655_v13, %v12628_v51 }
 0x391   :  { %v10174_v7 = vpop.f32.mrf.mxu0  ;;  %10692 = vmatprep.subr.bf16.mxu0 %v11185_v63 }
 0x392   :  { %v5386_v44 = vadd.f32 %v5381_v25, %v5113_v1  ;;  %v11027_v25 = vld [vmem:[%s13443_s3 + $0x3cc] sm:$0xff]   ;;  %v11028_v7 = vld [vmem:[%s13443_s3 + $0x3c4] sm:$0xff]  }
 0x394   :  { %10693 = vmatpush3.bf16.msra.mxu0 %v11008_v19 }
 0x395   :  { %10694 = vmatprep.subr.bf16.mxu0 %v11185_v63 }
 0x398   :  { %10695 = vmatpush3.bf16.msra.mxu0 %v11009_v50 }
 0x399   :  { %10409 = vmatprep.subr.bf16.mxu0 %v11010_v56  ;;  %v11030_v56 = vld [vmem:[%s13443_s3 + $0x3b4] sm:$0xff]  }
 0x39b   :  { %10697 = vmatmul.mubr.msk.bf16.vlgmr.msra.gmra.mxu0 %vm4544_vm13, %v7506_v58  ;;  %v11033_v58 = vld [vmem:[%s13443_s3 + $0x448] sm:$0xff]  }
 0x39c   :  { %10410 = vmatpush3.bf16.msra.mxu0 %v11011_v34  ;;  %7965 = vmatprep.mubr.bf16.mxu0 %v7800_v14  ;;  %v11031_v34 = vld [vmem:[%s13443_s3 + $0x450] sm:$0xff]   ;;  %v8096_v14 = vsel %vm6688_vm2, %v12670_v2, %v12688_v60  ;;  %v11036_v2 = vld [vmem:[%s13443_s3 + $0x400] sm:$0xff]  }
 0x39d   :  { %10411 = vmatprep.subr.bf16.mxu0 %v11012_v4  ;;  %v11032_v4 = vld [vmem:[%s13443_s3 + $0x410] sm:$0xff]  }
 0x39f   :  { %v5653_v37 = vpop.f32.mrf.mxu0 }
 0x3a0   :  { %v10198_v28 = vpop.f32.mrf.mxu1  ;;  %10412 = vmatpush3.bf16.msra.mxu0 %v11013_v24  ;;  %v8390_v24 = vsel %vm6688_vm2, %v12712_v15, %v12686_v21  ;;  %v11037_v21 = vld [vmem:[%s13443_s3 + $0x438] sm:$0xff]  }
 0x3a1   :  { %v10592_v49 = vpop.f32.mrf.mxu0  ;;  %10413 = vmatprep.subr.bf16.mxu0 %v11014_v26  ;;  %v11034_v26 = vld [vmem:[%s13443_s3 + $0x408] sm:$0xff]  }
 0x3a2   :  { %v10199_v53 = vpop.f32.mrf.mxu1 }
 0x3a3   :  { %v10200_v62 = vadd.f32 %v10199_v53, %v10198_v28  ;;  %v5656_v29 = vpop.f32.mrf.mxu0 }
 0x3a4   :  { %v10201_v1 = vpop.f32.mrf.mxu1  ;;  %10414 = vmatpush3.bf16.msra.mxu0 %v11015_v36 }
 0x3a5   :  { %v5654_v5 = vadd.f32 %v10200_v62, %v5653_v37  ;;  %v10593_v10 = vpop.f32.mrf.mxu0  ;;  %10415 = vmatprep.subr.bf16.mxu0 %v11016_v54  ;;  %v11035_v37 = vld [vmem:[%s13443_s3 + $0x440] sm:$0xff]   ;;  %v11038_v62 = vld [vmem:[%s13443_s3 + $0x3f8] sm:$0xff]   ;;  %v11039_v1 = vld [vmem:[%s13443_s3 + $0x430] sm:$0xff]  }
 0x3a6   :  { %v10202_v8 = vpop.f32.mrf.mxu1  ;;  %v11041_v10 = vld [vmem:[%s13443_s3 + $0x428] sm:$0xff]  }
 0x3a7   :  { %v12946_v45 = vadd.f32 %v5654_v5, %v5386_v44  ;;  %v11029_v44 = vld [vmem:[%s13443_s3 + $0x3bc] sm:$0xff]   ;;  %v11040_v5 = vld [vmem:[%s13443_s3 + $0x3f0] sm:$0xff]  }
 0x3a8   :  { %10416 = vmatpush3.bf16.msra.mxu0 %v11017_v43  ;;  %v11043_v8 = vld [vmem:[%s13443_s3 + $0x420] sm:$0xff]  }
 0x3a9   :  { %10417 = vmatprep.subr.bf16.mxu0 %v11018_v20  ;;  %v11042_v20 = vld [vmem:[%s13443_s3 + $0x3e8] sm:$0xff]  }
 0x3ac   :  { %10418 = vmatpush3.bf16.msra.mxu0 %v11019_v41  ;;  %v11044_v41 = vld [vmem:[%s13443_s3 + $0x3e0] sm:$0xff]  }
 0x3ad   :  { %10419 = vmatprep.subr.bf16.mxu0 %v11020_v40  ;;  %v11045_v40 = vld [vmem:[%s13443_s3 + $0x418] sm:$0xff]  }
 0x3b0   :  { %10420 = vmatpush3.bf16.msra.mxu0 %v11021_v35 }
 0x3b1   :  { %10421 = vmatprep.subr.bf16.mxu0 %v11022_v22  ;;  %v11046_v22 = vld [vmem:[%s13443_s3 + $0x3d8] sm:$0xff]  }
 0x3b4   :  { %v12966_v57 = vpop.f32.mrf.mxu1  ;;  %10422 = vmatpush3.bf16.msra.mxu0 %v11023_v38  ;;  %v11047_v38 = vld [vmem:[%s13443_s3 + $0x51c] ss:$0 sps:$4 sm:$0x33]  }
 0x3b5   :  { %10423 = vmatprep.subr.bf16.mxu0 %v11024_v55  ;;  %v8816_v52 = vsel %vm4548_vm1, %v11047_v38, 0  ;;  %v11071_v38 = vld [vmem:[%s13443_s3 + $0x48] sm:$0xff]  }
 0x3b6   :  { %v10606_v0 = vpop.f32.mrf.mxu1 }
 0x3b7   :  { %v8389_v0 = vsel %vm6688_vm2, %v12715_v33, %v12712_v15  ;;  %v11049_v33 = vld [vmem:[%s13443_s3 + $0x50c] sm:$0xff]  }
 0x3b8   :  { %v5929_v46 = vpop.f32.mrf.mxu1  ;;  %10424 = vmatpush3.bf16.msra.mxu0 %v11025_v61 }
 0x3b9   :  { %10714 = vmatprep.subr.bf16.mxu0 %v11185_v63 }
 0x3ba   :  { %v10607_v39 = vpop.f32.mrf.mxu1 }
 0x3bb   :  { %7966 = vmatmul.mubr.bf16.vlgmr.msra.gmra.mxu0 %v7799_v6  ;;  %v11048_v39 = vld [vmem:[%s13443_s3 + $0x514] sm:$0xff]  }
 0x3bc   :  { %10715 = vmatpush3.bf16.msra.mxu0 %v8226_v27  ;;  %10724 = vmatprep.mubr.msk.bf16.mxu0 %vm11186_vm12, %v11185_v63 }
 0x3bd   :  { %10716 = vmatprep.subr.bf16.mxu0 %v11185_v63 }
 0x3bf   :  { %v12985_v19 = vpop.f32.mrf.mxu0 }
 0x3c0   :  { %10717 = vmatpush3.bf16.msra.mxu0 %v11027_v25 }
 0x3c1   :  { %v12990_v51 = vpop.f32.mrf.mxu0  ;;  %10718 = vmatprep.subr.bf16.mxu0 %v11185_v63 }
 0x3c2   :  { %v10228_v46 = vadd.f32 %v12990_v51, %v12985_v19 }
 0x3c3   :  { %v10229_v13 = vpop.f32.mrf.mxu0 }
 0x3c4   :  { %10719 = vmatpush3.bf16.msra.mxu0 %v11028_v7  ;;  %v5927_v25 = vadd.f32 %v10228_v46, %v12966_v57  ;;  %v11051_v57 = vld [vmem:[%s13443_s3 + $0x504] sm:$0xff]  }
 0x3c5   :  { %v10230_v50 = vpop.f32.mrf.mxu0  ;;  %10720 = vmatprep.subr.bf16.mxu0 %v11185_v63 }
 0x3c6   :  { %v5932_v51 = vadd.f32 %v5927_v25, %v12946_v45  ;;  %v11076_v25 = vld [vmem:[%s13443_s3 + $0x1e0] sm:$0xff]  }
 0x3c8   :  { %10721 = vmatpush3.bf16.msra.mxu0 %v11029_v44 }
 0x3c9   :  { %10722 = vmatprep.subr.bf16.mxu0 %v11185_v63 }
 0x3cc   :  { %10723 = vmatpush3.bf16.msra.mxu0 %v11030_v56 }
 0x3cd   :  { %10465 = vmatprep.subr.bf16.mxu0 %v11031_v34  ;;  %v13084_v34 = vld [vmem:[%s13444_s4] sm:$0x1] }
 0x3cf   :  { %10725 = vmatmul.mubr.msk.bf16.vlgmr.msra.gmra.mxu0 %vm4544_vm13, %v8096_v14  ;;  %v11053_v14 = vld [vmem:[%s13443_s3 + $0x4fc] sm:$0xff]  }
 0x3d0   :  { %10466 = vmatpush3.bf16.msra.mxu0 %v11032_v4  ;;  %8555 = vmatprep.mubr.bf16.mxu0 %v8390_v24  ;;  %v11054_v24 = vld [vmem:[%s13443_s3 + $0x144] ss:$0 sps:$4 sm:$0x33]  }
 0x3d1   :  { %10467 = vmatprep.subr.bf16.mxu0 %v11033_v58 }
 0x3d3   :  { %v6199_v28 = vpop.f32.mrf.mxu0 }
 0x3d4   :  { %v10254_v36 = vpop.f32.mrf.mxu1  ;;  %10468 = vmatpush3.bf16.msra.mxu0 %v11034_v26 }
 0x3d5   :  { %v10620_v60 = vpop.f32.mrf.mxu0  ;;  %10469 = vmatprep.subr.bf16.mxu0 %v11035_v37  ;;  %v8683_v37 = vpop.permute.xlu1 %8682 }
 0x3d6   :  { %v10255_v49 = vpop.f32.mrf.mxu1  ;;  %v11055_v60 = vld [vmem:[%s13443_s3 + $0x13c] sm:$0xff]  }
 0x3d7   :  { %v6202_v54 = vpop.f32.mrf.mxu0  ;;  %v10256_v6 = vadd.f32 %v10255_v49, %v10254_v36  ;;  %v6821_v36 = vsel %vm4548_vm1, %v11054_v24, 0  ;;  %v11059_v49 = vld [vmem:[%s13443_s3 + $0x78] sm:$0xff]   ;;  %v11089_v24 = vld [vmem:[%s13443_s3 + $0x204] sm:$0xff]  }
 0x3d8   :  { %v10257_v53 = vpop.f32.mrf.mxu1  ;;  %10470 = vmatpush3.bf16.msra.mxu0 %v11036_v2  ;;  %v8686_v2 = vsel %vm6688_vm2, %v12728_v32, %v8683_v37  ;;  %v11056_v32 = vld [vmem:[%s13443_s3 + $0x134] sm:$0xff]  }
 0x3d9   :  { %v10621_v29 = vpop.f32.mrf.mxu0  ;;  %10471 = vmatprep.subr.bf16.mxu0 %v11037_v21  ;;  %v6200_v15 = vadd.f32 %v10256_v6, %v6199_v28  ;;  %v11057_v21 = vld [vmem:[%s13443_s3 + $0x12c] sm:$0xff]   ;;  %v11060_v54 = vld [vmem:[%s13443_s3 + $0x38] sm:$0xff]   ;;  %v11075_v6 = vld [vmem:[%s13443_s3 + $0x1e8] ss:$0 sps:$4 sm:$0x33]  }
 0x3da   :  { %v10258_v43 = vpop.f32.mrf.mxu1  ;;  %v11061_v53 = vld [vmem:[%s13443_s3 + $0x70] sm:$0xff]  }
 0x3db   :  { %v6205_v50 = vadd.f32 %v6200_v15, %v5932_v51  ;;  %v11062_v43 = vld [vmem:[%s13443_s3 + $0x30] sm:$0xff]   ;;  %v11079_v15 = vld [vmem:[%s13443_s3 + $0x1c8] sm:$0xff]  }
 0x3dc   :  { %10472 = vmatpush3.bf16.msra.mxu0 %v11038_v62  ;;  %v11081_v51 = vld [vmem:[%s13443_s3 + $0x224] sm:$0xff]  }
 0x3dd   :  { %10473 = vmatprep.subr.bf16.mxu0 %v11039_v1 }
 0x3e0   :  { %10474 = vmatpush3.bf16.msra.mxu0 %v11040_v5  ;;  %v11063_v5 = vld [vmem:[%s13443_s3 + $0x68] sm:$0xff]  }
 0x3e1   :  { %10475 = vmatprep.subr.bf16.mxu0 %v11041_v10 }
 0x3e4   :  { %10476 = vmatpush3.bf16.msra.mxu0 %v11042_v20  ;;  %v11064_v20 = vld [vmem:[%s13443_s3 + $0x28] sm:$0xff]  }
 0x3e5   :  { %10477 = vmatprep.subr.bf16.mxu0 %v11043_v8  ;;  %v11067_v8 = vld [vmem:[%s13443_s3 + $0x58] sm:$0xff]  }
 0x3e8   :  { %v6472_v35 = vpop.f32.mrf.mxu1  ;;  %10478 = vmatpush3.bf16.msra.mxu0 %v11044_v41  ;;  %v11068_v41 = vld [vmem:[%s13443_s3 + $0x18] sm:$0xff]  }
 0x3e9   :  { %10479 = vmatprep.subr.bf16.mxu0 %v11045_v40  ;;  %v11069_v40 = vld [vmem:[%s13443_s3 + $0x50] sm:$0xff]  }
 0x3ea   :  { %v10634_v55 = vpop.f32.mrf.mxu1 }
 0x3ec   :  { %v6475_v61 = vpop.f32.mrf.mxu1  ;;  %10480 = vmatpush3.bf16.msra.mxu0 %v11046_v22  ;;  %v11070_v22 = vld [vmem:[%s13443_s3 + $0x10] sm:$0xff]  }
 0x3ed   :  { %10742 = vmatprep.subr.bf16.mxu0 %v11185_v63 }
 0x3ee   :  { %v10635_v27 = vpop.f32.mrf.mxu1 }
 0x3ef   :  { %8556 = vmatmul.mubr.bf16.vlgmr.msra.gmra.mxu0 %v8389_v0  ;;  %v11073_v0 = vld [vmem:[%s13443_s3 + $0x40] sm:$0xff]  }
 0x3f0   :  { %10743 = vmatpush3.bf16.msra.mxu0 %v8816_v52  ;;  %10752 = vmatprep.mubr.msk.bf16.mxu0 %vm11186_vm12, %v11185_v63  ;;  %v11072_v52 = vld [vmem:[%s13443_s3 + $0x8] sm:$0xff]   ;;  %v11074_v27 = vld [vmem:[%s13443_s3] sm:$0xff]  }
 0x3f1   :  { %10744 = vmatprep.subr.bf16.mxu0 %v11185_v63 }
 0x3f3   :  { %v10282_v7 = vpop.f32.mrf.mxu0 }
 0x3f4   :  { %10745 = vmatpush3.bf16.msra.mxu0 %v11048_v39  ;;  %v7341_v39 = vsel %vm4548_vm1, %v11075_v6, 0 }
 0x3f5   :  { %v10283_v19 = vpop.f32.mrf.mxu0  ;;  %10746 = vmatprep.subr.bf16.mxu0 %v11185_v63 }
 0x3f6   :  { %v10284_v13 = vadd.f32 %v10283_v19, %v10282_v7  ;;  %v11077_v7 = vld [vmem:[%s13443_s3 + $0x1d8] sm:$0xff]  }
 0x3f7   :  { %v10285_v44 = vpop.f32.mrf.mxu0 }
 0x3f8   :  { %v6473_v56 = vadd.f32 %v10284_v13, %v6472_v35  ;;  %10747 = vmatpush3.bf16.msra.mxu0 %v11049_v33  ;;  %v11080_v33 = vld [vmem:[%s13443_s3 + $0x264] sm:$0xff]   ;;  %v11082_v13 = vld [vmem:[%s13443_s3 + $0x25c] sm:$0xff]  }
 0x3f9   :  { %v10286_v4 = vpop.f32.mrf.mxu0  ;;  %10748 = vmatprep.subr.bf16.mxu0 %v11185_v63 }
 0x3fa   :  { %v6478_v58 = vadd.f32 %v6473_v56, %v6205_v50  ;;  %v11084_v4 = vld [vmem:[%s13443_s3 + $0x254] sm:$0xff]  }
 0x3fc   :  { %v6479_v45 = vadd.f32 %v6478_v58, %v13084_v34  ;;  %10749 = vmatpush3.bf16.msra.mxu0 %v11051_v57  ;;  %v11083_v57 = vld [vmem:[%s13443_s3 + $0x21c] sm:$0xff]  }
 0x3fd   :  { %10750 = vmatprep.subr.bf16.mxu0 %v11185_v63 }
 0x3fe   :  { %v6480_v26 = vmax.f32 %v6479_v45, 0.0  ;;  %v11085_v45 = vld [vmem:[%s13443_s3 + $0x214] sm:$0xff]  }
 0x400   :  { %v6481_v28 = vpack.c.bf16 %v6480_v26, %v6480_v26  ;;  %10751 = vmatpush3.bf16.msra.mxu0 %v11053_v14  ;;  %v11088_v14 = vld [vmem:[%s13443_s3 + $0x244] sm:$0xff]   ;;  %v11090_v26 = vld [vmem:[%s13443_s3 + $0x23c] sm:$0xff]  }
 0x401   :  { %10756 = vmatprep.subr.bf16.mxu0 %v11185_v63 }
 0x402   :  { %10641 = vmatmul.mubr.msk.bf16.vlgmr.msra.gmra.mxu1 %vm6494_vm14, %v6481_v28  ;;  %v11091_v28 = vld [vmem:[%s13443_s3 + $0x1fc] sm:$0xff]  }
 0x403   :  { %10645 = vmatpush3.bf16.msra.mxu1 %v6821_v36  ;;  %10753 = vmatmul.mubr.msk.bf16.vlgmr.msra.gmra.mxu0 %vm4544_vm13, %v8686_v2  ;;  %v11092_v36 = vld [vmem:[%s13443_s3 + $0x234] sm:$0xff]  }
 0x404   :  { %10646 = vmatprep.subr.bf16.mxu1 %v11185_v63  ;;  %10654 = vmatprep.mubr.msk.bf16.mxu1 %vm11186_vm12, %v11185_v63 }
 0x405   :  { %10757 = vmatpush3.bf16.msra.mxu0 %v12875_v23  ;;  %10760 = vmatprep.mubr.msk.bf16.mxu0 %vm11186_vm12, %v11185_v63  ;;  %v11058_v23 = vld [vmem:[%s13443_s3 + $0x124] sm:$0xff]  }
 0x406   :  { %10758 = vmatprep.subr.bf16.mxu0 %v11185_v63 }
 0x407   :  { %10647 = vmatpush3.bf16.msra.mxu1 %v11055_v60 }
 0x408   :  { %10648 = vmatprep.subr.bf16.mxu1 %v11185_v63 }
 0x409   :  { %10759 = vmatpush3.bf16.msra.mxu0 %v12884_v48 }
 0x40b   :  { %10649 = vmatpush3.bf16.msra.mxu1 %v11056_v32  ;;  %v11093_v32 = vld [vmem:[%s13443_s3 + $0x1f4] sm:$0xff]  }
 0x40c   :  { %10650 = vmatprep.subr.bf16.mxu1 %v11185_v63 }
 0x40f   :  { %10651 = vmatpush3.bf16.msra.mxu1 %v11057_v21  ;;  %v11094_v21 = vld [vmem:[%s13443_s3 + $0x22c] sm:$0xff]  }
 0x410   :  { %10652 = vmatprep.subr.bf16.mxu1 %v11185_v63 }
 0x413   :  { %10653 = vmatpush3.bf16.msra.mxu1 %v11058_v23  ;;  %v10313_v48 = vpop.f32.mrf.mxu0 }
 0x414   :  { %10325 = vmatprep.subr.bf16.mxu1 %v11059_v49  ;;  %v11095_v49 = vld [vmem:[%s13443_s3 + $0x1ec] sm:$0xff]  }
 0x415   :  { %v10314_v62 = vpop.f32.mrf.mxu0 }
 0x416   :  { %v13133_v29 = vadd.f32 %v10314_v62, %v10313_v48  ;;  %10655 = vmatmul.mubr.msk.bf16.vlgmr.msra.gmra.mxu1 %vm4544_vm13, %v12502_v59  ;;  %v11065_v59 = vld [vmem:[%s13443_s3 + $0x60] sm:$0xff]   ;;  %v11096_v48 = vld [vmem:[%s13443_s3 + $0x330] ss:$0 sps:$4 sm:$0x33]  }
 0x417   :  { %10326 = vmatpush3.bf16.msra.mxu1 %v11060_v54  ;;  %7081 = vmatprep.mubr.bf16.mxu1 %v12542_v31  ;;  %v10316_v1 = vpop.f32.mrf.mxu0  ;;  %v11066_v31 = vld [vmem:[%s13443_s3 + $0x20] sm:$0xff]   ;;  %v7931_v54 = vsel %vm4548_vm1, %v11096_v48, 0 }
 0x418   :  { %10327 = vmatprep.subr.bf16.mxu1 %v11061_v53  ;;  %v11097_v53 = vld [vmem:[%s13443_s3 + $0x328] sm:$0xff]   ;;  %v11098_v62 = vld [vmem:[%s13443_s3 + $0x320] sm:$0xff]   ;;  %v11100_v1 = vld [vmem:[%s13443_s3 + $0x310] sm:$0xff]  }
 0x419   :  { %v10317_v10 = vpop.f32.mrf.mxu0 }
 0x41a   :  { %v11102_v10 = vld [vmem:[%s13443_s3 + $0x36c] sm:$0xff]  }
 0x41b   :  { %10328 = vmatpush3.bf16.msra.mxu1 %v11062_v43  ;;  %v11101_v43 = vld [vmem:[%s13443_s3 + $0x3ac] sm:$0xff]  }
 0x41c   :  { %10329 = vmatprep.subr.bf16.mxu1 %v11063_v5 }
 0x41f   :  { %10330 = vmatpush3.bf16.msra.mxu1 %v11064_v20  ;;  %v11103_v20 = vld [vmem:[%s13443_s3 + $0x3a4] sm:$0xff]  }
 0x420   :  { %10331 = vmatprep.subr.bf16.mxu1 %v11065_v59 }
 0x423   :  { %10332 = vmatpush3.bf16.msra.mxu1 %v11066_v31 }
 0x424   :  { %10333 = vmatprep.subr.bf16.mxu1 %v11067_v8 }
 0x427   :  { %10334 = vmatpush3.bf16.msra.mxu1 %v11068_v41  ;;  %v13162_v35 = vpop.f32.mrf.mxu0  ;;  %v11104_v41 = vld [vmem:[%s13443_s3 + $0x364] sm:$0xff]  }
 0x428   :  { %10335 = vmatprep.subr.bf16.mxu1 %v11069_v40  ;;  %v11105_v40 = vld [vmem:[%s13443_s3 + $0x39c] sm:$0xff]  }
 0x429   :  { %v10670_v55 = vpop.f32.mrf.mxu0 }
 0x42a   :  { %v11109_v55 = vld [vmem:[%s13443_s3 + $0x38c] sm:$0xff]  }
 0x42b   :  { %10336 = vmatpush3.bf16.msra.mxu1 %v11070_v22  ;;  %v7126_v61 = vpop.f32.mrf.mxu0 }
 0x42c   :  { %10337 = vmatprep.subr.bf16.mxu1 %v11071_v38  ;;  %v11106_v38 = vld [vmem:[%s13443_s3 + $0x35c] sm:$0xff]   ;;  %v11110_v61 = vld [vmem:[%s13443_s3 + $0x34c] sm:$0xff]  }
 0x42d   :  { %v10671_v46 = vpop.f32.mrf.mxu0 }
 0x42e   :  { %v11112_v46 = vld [vmem:[%s13443_s3 + $0x344] sm:$0xff]  }
 0x42f   :  { %10338 = vmatpush3.bf16.msra.mxu1 %v11072_v52  ;;  %v11111_v52 = vld [vmem:[%s13443_s3 + $0x384] sm:$0xff]  }
 0x430   :  { %10339 = vmatprep.subr.bf16.mxu1 %v11073_v0 }
 0x433   :  { %10340 = vmatpush3.bf16.msra.mxu1 %v11074_v27  ;;  %v11113_v27 = vld [vmem:[%s13443_s3 + $0x37c] sm:$0xff]  }
 0x434   :  { %10672 = vmatprep.subr.bf16.mxu1 %v11185_v63 }
 0x436   :  { %7082 = vmatmul.mubr.bf16.vlgmr.msra.gmra.mxu1 %v12525_v17  ;;  %v11078_v17 = vld [vmem:[%s13443_s3 + $0x1d0] sm:$0xff]  }
 0x437   :  { %10673 = vmatpush3.bf16.msra.mxu1 %v7341_v39  ;;  %10682 = vmatprep.mubr.msk.bf16.mxu1 %vm11186_vm12, %v11185_v63 }
 0x438   :  { %10674 = vmatprep.subr.bf16.mxu1 %v11185_v63 }
 0x43b   :  { %10675 = vmatpush3.bf16.msra.mxu1 %v11076_v25  ;;  %v11114_v25 = vld [vmem:[%s13443_s3 + $0x33c] sm:$0xff]  }
 0x43c   :  { %10676 = vmatprep.subr.bf16.mxu1 %v11185_v63 }
 0x43f   :  { %10677 = vmatpush3.bf16.msra.mxu1 %v11077_v7  ;;  %v11115_v7 = vld [vmem:[%s13443_s3 + $0x374] sm:$0xff]  }
 0x440   :  { %10678 = vmatprep.subr.bf16.mxu1 %v11185_v63 }
 0x443   :  { %10679 = vmatpush3.bf16.msra.mxu1 %v11078_v17 }
 0x444   :  { %10680 = vmatprep.subr.bf16.mxu1 %v11185_v63 }
 0x447   :  { %10681 = vmatpush3.bf16.msra.mxu1 %v11079_v15  ;;  %v10369_v19 = vpop.f32.mrf.mxu0  ;;  %v11116_v15 = vld [vmem:[%s13443_s3 + $0x334] sm:$0xff]  }
 0x448   :  { %10381 = vmatprep.subr.bf16.mxu1 %v11080_v33  ;;  %v11117_v33 = vld [vmem:[%s13443_s3 + $0x478] ss:$0 sps:$4 sm:$0x33]  }
 0x449   :  { %v10370_v44 = vpop.f32.mrf.mxu0 }
 0x44a   :  { %v13212_v50 = vadd.f32 %v10370_v44, %v10369_v19  ;;  %10683 = vmatmul.mubr.msk.bf16.vlgmr.msra.gmra.mxu1 %vm4544_vm13, %v12573_v3  ;;  %v11086_v3 = vld [vmem:[%s13443_s3 + $0x24c] sm:$0xff]   ;;  %v8521_v19 = vsel %vm4548_vm1, %v11117_v33, 0  ;;  %v11121_v44 = vld [vmem:[%s13443_s3 + $0x458] sm:$0xff]  }
 0x44b   :  { %10382 = vmatpush3.bf16.msra.mxu1 %v11081_v51  ;;  %7670 = vmatprep.mubr.bf16.mxu1 %v12617_v47  ;;  %v10372_v56 = vpop.f32.mrf.mxu0  ;;  %v11087_v47 = vld [vmem:[%s13443_s3 + $0x20c] sm:$0xff]  }
 0x44c   :  { %10383 = vmatprep.subr.bf16.mxu1 %v11082_v13  ;;  %v11118_v51 = vld [vmem:[%s13443_s3 + $0x470] sm:$0xff]   ;;  %v11119_v13 = vld [vmem:[%s13443_s3 + $0x468] sm:$0xff]  }
 0x44d   :  { %v10373_v58 = vpop.f32.mrf.mxu0  ;;  %v11122_v56 = vld [vmem:[%s13443_s3 + $0x4f4] sm:$0xff]  }
 0x44e   :  { %v11124_v58 = vld [vmem:[%s13443_s3 + $0x4ec] sm:$0xff]  }
 0x44f   :  { %10384 = vmatpush3.bf16.msra.mxu1 %v11083_v57 }
 0x450   :  { %10385 = vmatprep.subr.bf16.mxu1 %v11084_v4  ;;  %v11123_v4 = vld [vmem:[%s13443_s3 + $0x4b4] sm:$0xff]  }
 0x453   :  { %10386 = vmatpush3.bf16.msra.mxu1 %v11085_v45 }
 0x454   :  { %10387 = vmatprep.subr.bf16.mxu1 %v11086_v3 }
 0x457   :  { %10388 = vmatpush3.bf16.msra.mxu1 %v11087_v47  ;;  %v11125_v47 = vld [vmem:[%s13443_s3 + $0x4ac] sm:$0xff]  }
 0x458   :  { %10389 = vmatprep.subr.bf16.mxu1 %v11088_v14  ;;  %v11126_v14 = vld [vmem:[%s13443_s3 + $0x4e4] sm:$0xff]  }
 0x45b   :  { %10390 = vmatpush3.bf16.msra.mxu1 %v11089_v24  ;;  %v13241_v37 = vpop.f32.mrf.mxu0 }
 0x45c   :  { %10391 = vmatprep.subr.bf16.mxu1 %v11090_v26  ;;  %v11127_v26 = vld [vmem:[%s13443_s3 + $0x4a4] sm:$0xff]  }
 0x45d   :  { %v10698_v2 = vpop.f32.mrf.mxu0 }
 0x45e   :  { %v13399_v2 = vld [vmem:[%s13446_s6] sm:$0x1] }
 0x45f   :  { %10392 = vmatpush3.bf16.msra.mxu1 %v11091_v28  ;;  %v7715_v60 = vpop.f32.mrf.mxu0  ;;  %v11130_v28 = vld [vmem:[%s13443_s3 + $0x4d4] sm:$0xff]  }
 0x460   :  { %10393 = vmatprep.subr.bf16.mxu1 %v11092_v36  ;;  %v11131_v36 = vld [vmem:[%s13443_s3 + $0x494] sm:$0xff]   ;;  %v11132_v60 = vld [vmem:[%s13443_s3 + $0x4cc] sm:$0xff]  }
 0x461   :  { %v10699_v23 = vpop.f32.mrf.mxu0 }
 0x463   :  { %10394 = vmatpush3.bf16.msra.mxu1 %v11093_v32 }
 0x464   :  { %10395 = vmatprep.subr.bf16.mxu1 %v11094_v21 }
 0x467   :  { %10396 = vmatpush3.bf16.msra.mxu1 %v11095_v49  ;;  %v11133_v49 = vld [vmem:[%s13443_s3 + $0x48c] sm:$0xff]  }
 0x468   :  { %10700 = vmatprep.subr.bf16.mxu1 %v11185_v63 }
 0x46a   :  { %7671 = vmatmul.mubr.bf16.vlgmr.msra.gmra.mxu1 %v12588_v16  ;;  %v11099_v16 = vld [vmem:[%s13443_s3 + $0x318] sm:$0xff]  }
 0x46b   :  { %10701 = vmatpush3.bf16.msra.mxu1 %v7931_v54  ;;  %10710 = vmatprep.mubr.msk.bf16.mxu1 %vm11186_vm12, %v11185_v63  ;;  %v11134_v54 = vld [vmem:[%s13443_s3 + $0x4c4] sm:$0xff]  }
 0x46c   :  { %10702 = vmatprep.subr.bf16.mxu1 %v11185_v63 }
 0x46f   :  { %10703 = vmatpush3.bf16.msra.mxu1 %v11097_v53 }
 0x470   :  { %10704 = vmatprep.subr.bf16.mxu1 %v11185_v63 }
 0x473   :  { %10705 = vmatpush3.bf16.msra.mxu1 %v11098_v62 }
 0x474   :  { %10706 = vmatprep.subr.bf16.mxu1 %v11185_v63 }
 0x477   :  { %10707 = vmatpush3.bf16.msra.mxu1 %v11099_v16 }
 0x478   :  { %10708 = vmatprep.subr.bf16.mxu1 %v11185_v63 }
 0x47b   :  { %10709 = vmatpush3.bf16.msra.mxu1 %v11100_v1  ;;  %v10425_v5 = vpop.f32.mrf.mxu0  ;;  %v11135_v1 = vld [vmem:[%s13443_s3 + $0x484] sm:$0xff]  }
 0x47c   :  { %10437 = vmatprep.subr.bf16.mxu1 %v11101_v43 }
 0x47d   :  { %v10426_v59 = vpop.f32.mrf.mxu0 }
 0x47e   :  { %v13291_v31 = vadd.f32 %v10426_v59, %v10425_v5  ;;  %10711 = vmatmul.mubr.msk.bf16.vlgmr.msra.gmra.mxu1 %vm4544_vm13, %v12644_v42  ;;  %v11107_v42 = vld [vmem:[%s13443_s3 + $0x394] sm:$0xff]   ;;  %v11136_v5 = vld [vmem:[%s13443_s3 + $0x4bc] sm:$0xff]   ;;  %v8677_v59 = vpop.permute.xlu0 %8676 }
 0x47f   :  { %10438 = vmatpush3.bf16.msra.mxu1 %v11102_v10  ;;  %8260 = vmatprep.mubr.bf16.mxu1 %v12683_v12  ;;  %v10428_v8 = vpop.f32.mrf.mxu0  ;;  %v11108_v12 = vld [vmem:[%s13443_s3 + $0x354] sm:$0xff]  }
 0x480   :  { %10439 = vmatprep.subr.bf16.mxu1 %v11103_v20  ;;  %v11137_v20 = vld [vmem:[%s13443_s3 + $0x47c] sm:$0xff]   ;;  %v8684_v8 = vsel %vm6688_vm2, %v8677_v59, %v12726_v18 }
 0x481   :  { %v10429_v22 = vpop.f32.mrf.mxu0 }
 0x483   :  { %10440 = vmatpush3.bf16.msra.mxu1 %v11104_v41 }
 0x484   :  { %10441 = vmatprep.subr.bf16.mxu1 %v11105_v40 }
 0x487   :  { %10442 = vmatpush3.bf16.msra.mxu1 %v11106_v38 }
 0x488   :  { %10443 = vmatprep.subr.bf16.mxu1 %v11107_v42 }
 0x48b   :  { %10444 = vmatpush3.bf16.msra.mxu1 %v11108_v12 }
 0x48c   :  { %10445 = vmatprep.subr.bf16.mxu1 %v11109_v55 }
 0x48f   :  { %10446 = vmatpush3.bf16.msra.mxu1 %v11110_v61  ;;  %v13320_v0 = vpop.f32.mrf.mxu0 }
 0x490   :  { %10447 = vmatprep.subr.bf16.mxu1 %v11111_v52 }
 0x491   :  { %v10726_v6 = vpop.f32.mrf.mxu0 }
 0x493   :  { %10448 = vmatpush3.bf16.msra.mxu1 %v11112_v46  ;;  %v8305_v39 = vpop.f32.mrf.mxu0 }
 0x494   :  { %10449 = vmatprep.subr.bf16.mxu1 %v11113_v27 }
 0x495   :  { %v10727_v17 = vpop.f32.mrf.mxu0 }
 0x497   :  { %10450 = vmatpush3.bf16.msra.mxu1 %v11114_v25 }
 0x498   :  { %10451 = vmatprep.subr.bf16.mxu1 %v11115_v7 }
 0x49b   :  { %10452 = vmatpush3.bf16.msra.mxu1 %v11116_v15 }
 0x49c   :  { %10728 = vmatprep.subr.bf16.mxu1 %v11185_v63 }
 0x49e   :  { %8261 = vmatmul.mubr.bf16.vlgmr.msra.gmra.mxu1 %v12661_v11  ;;  %v11120_v11 = vld [vmem:[%s13443_s3 + $0x460] sm:$0xff]  }
 0x49f   :  { %10729 = vmatpush3.bf16.msra.mxu1 %v8521_v19  ;;  %10738 = vmatprep.mubr.msk.bf16.mxu1 %vm11186_vm12, %v11185_v63 }
 0x4a0   :  { %10730 = vmatprep.subr.bf16.mxu1 %v11185_v63 }
 0x4a3   :  { %10731 = vmatpush3.bf16.msra.mxu1 %v11118_v51 }
 0x4a4   :  { %10732 = vmatprep.subr.bf16.mxu1 %v11185_v63 }
 0x4a7   :  { %10733 = vmatpush3.bf16.msra.mxu1 %v11119_v13 }
 0x4a8   :  { %10734 = vmatprep.subr.bf16.mxu1 %v11185_v63 }
 0x4ab   :  { %10735 = vmatpush3.bf16.msra.mxu1 %v11120_v11 }
 0x4ac   :  { %10736 = vmatprep.subr.bf16.mxu1 %v11185_v63 }
 0x4af   :  { %10737 = vmatpush3.bf16.msra.mxu1 %v11121_v44  ;;  %v10481_v57 = vpop.f32.mrf.mxu0 }
 0x4b0   :  { %10493 = vmatprep.subr.bf16.mxu1 %v11122_v56 }
 0x4b1   :  { %v10482_v45 = vpop.f32.mrf.mxu0 }
 0x4b2   :  { %v13370_v3 = vadd.f32 %v10482_v45, %v10481_v57  ;;  %10739 = vmatmul.mubr.msk.bf16.vlgmr.msra.gmra.mxu1 %vm4544_vm13, %v12707_v30  ;;  %v11128_v30 = vld [vmem:[%s13443_s3 + $0x4dc] sm:$0xff]  }
 0x4b3   :  { %10494 = vmatpush3.bf16.msra.mxu1 %v11123_v4  ;;  %8850 = vmatprep.mubr.bf16.mxu1 %v12741_v9  ;;  %v10484_v63 = vpop.f32.mrf.mxu0  ;;  %v11129_v9 = vld [vmem:[%s13443_s3 + $0x49c] sm:$0xff]   ;;  %s11188_s3 = smov [#allocation3]  }
 0x4b4   :  { %10495 = vmatprep.subr.bf16.mxu1 %v11124_v58  ;;  %s8952_s25 = sshll.u32 %s11188_s3, 4  ;;  %s8953_s25 = int_to_ptr.vmem [resolvable:$true] %s8952_s25 }
 0x4b5   :  { %v10485_v24 = vpop.f32.mrf.mxu0  ;;  %s11138_s4 = scalar_lea.vmem %s8953_s25, 32  ;;  %p11143_p1 = scmp.lt.s32.totalorder %s8953_s25, %s8953_s25 }
 0x4b6   :  { %p11139_p0 = scmp.ne.s32.totalorder %s8953_s25, %s11138_s4  ;;  %p11144_p2 = scmp.lt.s32.totalorder %s11138_s4, %s11138_s4 }
 0x4b7   :  { %10496 = vmatpush3.bf16.msra.mxu1 %v11125_v47 }
 0x4b8   :  { %10497 = vmatprep.subr.bf16.mxu1 %v11126_v14  ;;  %p11145_p3 = por %p11144_p2, %p11143_p1 }
 0x4ba   :  { %p11146_p4 = pnand %p11145_p3, %p11139_p0 }
 0x4bb   :  { %10498 = vmatpush3.bf16.msra.mxu1 %v11127_v26 }
 0x4bc   :  { %10499 = vmatprep.subr.bf16.mxu1 %v11128_v30 }
 0x4bf   :  { %10500 = vmatpush3.bf16.msra.mxu1 %v11129_v9 }
 0x4c0   :  { %10501 = vmatprep.subr.bf16.mxu1 %v11130_v28 }
 0x4c2   :  { %v6532_v32 = vpop.f32.mrf.mxu1 }
 0x4c3   :  { %v6533_v21 = vadd.f32 %v6532_v32, %v13399_v2  ;;  %10502 = vmatpush3.bf16.msra.mxu1 %v11131_v36  ;;  %v13405_v23 = vpop.f32.mrf.mxu0 }
 0x4c4   :  { %v10642_v48 = vpop.f32.mrf.mxu1  ;;  %10503 = vmatprep.subr.bf16.mxu1 %v11132_v60 }
 0x4c5   :  { %6539 = vst.msk [vmem:[#allocation3] sm:$0x1] %vm6538_vm15, %v6533_v21  ;;  %v10754_v53 = vpop.f32.mrf.mxu0 }
 0x4c6   :  { %v6535_v62 = vpop.f32.mrf.mxu1 }
 0x4c7   :  { %10504 = vmatpush3.bf16.msra.mxu1 %v11133_v49  ;;  %v8895_v16 = vpop.f32.mrf.mxu0 }
 0x4c8   :  { %v10643_v43 = vpop.f32.mrf.mxu1  ;;  %10505 = vmatprep.subr.bf16.mxu1 %v11134_v54 }
 0x4c9   :  { %v10755_v10 = vpop.f32.mrf.mxu0 }
 0x4cb   :  { %10506 = vmatpush3.bf16.msra.mxu1 %v11135_v1 }
 0x4cc   :  { %10507 = vmatprep.subr.bf16.mxu1 %v11136_v5 }
 0x4cf   :  { %10508 = vmatpush3.bf16.msra.mxu1 %v11137_v20 }
 0x4d2   :  { %8851 = vmatmul.mubr.bf16.vlgmr.msra.gmra.mxu1 %v8684_v8 }
 0x4d6   :  { %v6897_v41 = vpop.f32.mrf.mxu1 }
 0x4d7   :  { %v6898_v40 = vadd.f32 %v13133_v29, %v6897_v41 }
 0x4d8   :  { %v10656_v22 = vpop.f32.mrf.mxu1 }
 0x4da   :  { %v6900_v38 = vpop.f32.mrf.mxu1 }
 0x4dc   :  { %v10657_v42 = vpop.f32.mrf.mxu1 }
 0x4f6   :  { %v10341_v12 = vpop.f32.mrf.mxu1 }
 0x4f8   :  { %v10342_v55 = vpop.f32.mrf.mxu1 }
 0x4f9   :  { %v10343_v61 = vadd.f32 %v10342_v55, %v10341_v12 }
 0x4fa   :  { %v10344_v52 = vpop.f32.mrf.mxu1 }
 0x4fb   :  { %v7084_v46 = vadd.f32 %v10343_v61, %v6898_v40 }
 0x4fc   :  { %v10345_v27 = vpop.f32.mrf.mxu1 }
 0x4fd   :  { %v7124_v39 = vadd.f32 %v13162_v35, %v7084_v46 }
 0x50a   :  { %v7417_v6 = vpop.f32.mrf.mxu1 }
 0x50b   :  { %v7418_v25 = vadd.f32 %v13212_v50, %v7417_v6 }
 0x50c   :  { %v10684_v7 = vpop.f32.mrf.mxu1 }
 0x50d   :  { %v7423_v18 = vadd.f32 %v7418_v25, %v7124_v39 }
 0x50e   :  { %v7420_v17 = vpop.f32.mrf.mxu1 }
 0x510   :  { %v10685_v15 = vpop.f32.mrf.mxu1 }
 0x52a   :  { %v10397_v33 = vpop.f32.mrf.mxu1 }
 0x52c   :  { %v10398_v29 = vpop.f32.mrf.mxu1 }
 0x52d   :  { %v10399_v19 = vadd.f32 %v10398_v29, %v10397_v33 }
 0x52e   :  { %v10400_v51 = vpop.f32.mrf.mxu1 }
 0x52f   :  { %v7713_v13 = vadd.f32 %v10399_v19, %v13241_v37 }
 0x530   :  { %v10401_v11 = vpop.f32.mrf.mxu1 }
 0x531   :  { %v7718_v44 = vadd.f32 %v7713_v13, %v7423_v18 }
 0x53e   :  { %v8007_v56 = vpop.f32.mrf.mxu1 }
 0x53f   :  { %v8008_v57 = vadd.f32 %v13291_v31, %v8007_v56 }
 0x540   :  { %v10712_v4 = vpop.f32.mrf.mxu1 }
 0x541   :  { %v8013_v58 = vadd.f32 %v8008_v57, %v7718_v44 }
 0x542   :  { %v8010_v35 = vpop.f32.mrf.mxu1 }
 0x544   :  { %v10713_v45 = vpop.f32.mrf.mxu1 }
 0x55e   :  { %v10453_v50 = vpop.f32.mrf.mxu1 }
 0x560   :  { %v10454_v63 = vpop.f32.mrf.mxu1 }
 0x561   :  { %v10455_v24 = vadd.f32 %v10454_v63, %v10453_v50 }
 0x562   :  { %v10456_v47 = vpop.f32.mrf.mxu1 }
 0x563   :  { %v8303_v26 = vadd.f32 %v10455_v24, %v13320_v0 }
 0x564   :  { %v10457_v14 = vpop.f32.mrf.mxu1 }
 0x565   :  { %v8308_v9 = vadd.f32 %v8303_v26, %v8013_v58 }
 0x572   :  { %v8597_v30 = vpop.f32.mrf.mxu1 }
 0x573   :  { %v8598_v37 = vadd.f32 %v13370_v3, %v8597_v30 }
 0x574   :  { %v10740_v28 = vpop.f32.mrf.mxu1 }
 0x575   :  { %v8603_v36 = vadd.f32 %v8598_v37, %v8308_v9 }
 0x576   :  { %v8600_v60 = vpop.f32.mrf.mxu1 }
 0x578   :  { %v10741_v32 = vpop.f32.mrf.mxu1 }
 0x592   :  { %v10509_v31 = vpop.f32.mrf.mxu1 }
 0x594   :  { %v10510_v21 = vpop.f32.mrf.mxu1 }
 0x595   :  { %v10511_v49 = vadd.f32 %v10510_v21, %v10509_v31 }
 0x596   :  { %v10512_v48 = vpop.f32.mrf.mxu1 }
 0x597   :  { %v8893_v54 = vadd.f32 %v10511_v49, %v13405_v23 }
 0x598   :  { %v10513_v53 = vpop.f32.mrf.mxu1 }
 0x599   :  { %v8898_v62 = vadd.f32 %v8893_v54, %v8603_v36 }
 0x59b   :  { %v8899_v16 = vadd.f32 %v8898_v62, %v13084_v34 }
 0x59d   :  { %v8900_v1 = vmax.f32 %v8899_v16, 0.0 }
 0x59f   :  { %v8901_v0 = vpack.c.bf16 %v8900_v1, %v8900_v1 }
 0x5a1   :  { %10761 = vmatmul.mubr.msk.bf16.vlgmr.msra.gmra.mxu0 %vm6494_vm14, %v8901_v0 }
 0x661   :  { %v8939_v3 = vpop.f32.mrf.mxu0 }
 0x662   :  { %v8940_v43 = vadd.f32 %v8939_v3, %v13399_v2 }
 0x663   :  { %v10762_v5 = vpop.f32.mrf.mxu0 }
 0x664   :  { %8945 = vst.msk [vmem:[#allocation3 + $0x1] sm:$0x1] %vm6538_vm15, %v8940_v43 }
 0x665   :  { %v8942_v10 = vpop.f32.mrf.mxu0 }
 0x666   :  { %11149 = shalt.err (!%p11146_p4)
}
 0x667   :  { %8955 = dma.vmem_to_hbm [thread:$0]  %s8953_s25, 32, %s13447_s7, [#allocation4]   ;;  %v10763_v34 = vpop.f32.mrf.mxu0 }
 0x668   :  { %11158 = dma.done.wait [#allocation4], 32  }
 0x669   :  { %11159 = vsyncadd [#allocation4], 4294967264 }
 0x66a   :  { %8959 = vsyncpa [#allocation4], 1 }

</bundles_post_ra>
